<compile_context>
chip_gen: v7x
topology: tpu7x:2x2x1
jax: 0.10.0
libtpu: 0.0.40
codegen_flags: <defaults>
</compile_context>

<pallas_src>
import jax
import jax.numpy as jnp
from jax.experimental import pallas as pl
from jax.experimental.pallas import tpu as pltpu

# On v6e/v7x at production sizes set to jnp.bfloat16 for the two big matmuls
# (projection + hidden2tag); CRF log-space math and LSTM state stay in f32.
MATMUL_IN_DTYPE = jnp.float32


def _mm(a, b):
    return jnp.dot(a.astype(MATMUL_IN_DTYPE), b.astype(MATMUL_IN_DTYPE),
                   preferred_element_type=jnp.float32)


def bilstm_crf_kernel(lens_ref, emb_ref, ohm_ref, ohl_ref,
                      wih_ref, b_ref, whhf_ref, whhb_ref,
                      wtag_ref, btag_ref, trans_ref, start_ref, end_ref,
                      loss_ref,
                      xp_ref, hidf_ref, hidb_ref, emis_ref):
    T, Bp, _ = xp_ref.shape
    Hd = whhf_ref.shape[0]              # whh passed transposed: (Hd, 4*Hd)
    K = trans_ref.shape[0]

    lens = lens_ref[...]                # (Bp, 1) int32, resident in a vreg
    whh_f = whhf_ref[...]
    whh_b = whhb_ref[...]
    trans = trans_ref[...]
    start_t = start_ref[...]
    end_t = end_ref[...]

    # ---- single hoisted input projection for BOTH directions ---------------
    xp = _mm(emb_ref[...], wih_ref[...]) + b_ref[...]          # (T*Bp, 8Hd)
    xp_ref[...] = xp.reshape(T, Bp, 8 * Hd)                    # free: Bp % 8 == 0

    def cell(gates, c):
        i = jax.nn.sigmoid(gates[:, 0 * Hd:1 * Hd])
        f = jax.nn.sigmoid(gates[:, 1 * Hd:2 * Hd])
        g = jnp.tanh(gates[:, 2 * Hd:3 * Hd])
        o = jax.nn.sigmoid(gates[:, 3 * Hd:4 * Hd])
        c_new = f * c + i * g
        return o * jnp.tanh(c_new), c_new

    zeros_h = jnp.zeros((Bp, Hd), jnp.float32)

    # ---- fused forward + backward recurrence (packed-seq semantics) --------
    def step(s, carry):
        hf, cf, hb, cb = carry
        tb = T - 1 - s
        mf = (s < lens).astype(jnp.float32)                    # (Bp, 1) VPU compare
        mb = (tb < lens).astype(jnp.float32)
        xpf = xp_ref[s]                                        # (Bp, 8Hd)
        xpb = xp_ref[tb]
        gf = xpf[:, :4 * Hd] + jnp.dot(hf, whh_f,
                                       preferred_element_type=jnp.float32)
        gb = xpb[:, 4 * Hd:] + jnp.dot(hb, whh_b,
                                       preferred_element_type=jnp.float32)
        hf_n, cf_n = cell(gf, cf)
        hb_n, cb_n = cell(gb, cb)
        hf = hf + mf * (hf_n - hf)                             # freeze past length
        cf = cf + mf * (cf_n - cf)
        hb = hb + mb * (hb_n - hb)
        cb = cb + mb * (cb_n - cb)
        hidf_ref[s] = mf * hf                                  # pad_packed pads with 0
        hidb_ref[tb] = mb * hb
        return (hf, cf, hb, cb)

    jax.lax.fori_loop(0, T, step, (zeros_h, zeros_h, zeros_h, zeros_h),
                      unroll=True)

    # ---- hidden2tag: ONE matmul against stacked [wtag_f; wtag_b] ----------
    hcat = jnp.concatenate([hidf_ref[...].reshape(T * Bp, Hd),
                            hidb_ref[...].reshape(T * Bp, Hd)], axis=-1)
    em = _mm(hcat, wtag_ref[...]) + btag_ref[...]              # (T*Bp, K)
    emis_ref[...] = em.reshape(T, Bp, K)                       # only for alpha reads

    # ---- CRF numerator (fully vectorized, summed over batch) ---------------
    # ohm = mask * one_hot(tags); ohl = is_last * one_hot(tags) (wrapper glue).
    ohm = ohm_ref[...]                                         # (T*Bp, K)
    start_tot = jnp.sum(ohm[:Bp] * start_t, keepdims=True)     # (1,1)
    emit_tot = jnp.sum(em * ohm, keepdims=True)
    prev = ohm[:(T - 1) * Bp]
    nxt = ohm[Bp:]
    trans_tot = jnp.sum(jnp.dot(prev, trans,
                                preferred_element_type=jnp.float32) * nxt,
                        keepdims=True)
    end_tot = jnp.sum(ohl_ref[...] * end_t, keepdims=True)
    num_tot = start_tot + emit_tot + trans_tot + end_tot       # (1,1)

    # ---- CRF normalizer (forward algorithm; per-column shift of trans) -----
    valid = (lens > 0).astype(jnp.float32)                     # mask padded batch rows
    tcol = jnp.max(trans, axis=0, keepdims=True)               # (1, K)
    et = jnp.exp(trans - tcol)                                 # (K, K)

    alpha0 = start_t + emis_ref[0]                             # (Bp, K); mask[0]==1 assumed

    def alpha_step(t, alpha):
        m = (t < lens).astype(jnp.float32)                     # (Bp, 1)
        a_max = jnp.max(alpha, axis=-1, keepdims=True)
        scores = jnp.dot(jnp.exp(alpha - a_max), et,
                         preferred_element_type=jnp.float32)
        nxt_a = a_max + tcol + jnp.log(scores) + emis_ref[t]
        return jnp.where(m > 0.5, nxt_a, alpha)

    alpha = jax.lax.fori_loop(1, T, alpha_step, alpha0, unroll=True)
    alpha = alpha + end_t
    a_max = jnp.max(alpha, axis=-1, keepdims=True)
    denom_b = a_max + jnp.log(jnp.sum(jnp.exp(alpha - a_max),
                                      axis=-1, keepdims=True))  # (Bp, 1)
    denom_tot = jnp.sum(denom_b * valid, keepdims=True)          # (1,1)

    loss_ref[...] = num_tot - denom_tot


def bilstm_crf_forward(sentence, lengths, tags, params):
    """sentence: (B, T) int32; lengths: (B,) int32 (>=1, sorted desc); tags: (B, T)."""
    B, T = sentence.shape
    K = params["trans"].shape[0]
    Hd = params["whh_f"].shape[1]
    Bp = max(8, ((B + 7) // 8) * 8)          # pad batch to a sublane multiple
    pad_b = Bp - B

    # ---- plain-JAX glue: gather, one-hot, masks, weight layout -------------
    embeds = params["embedding"][sentence]                           # (B,T,E)
    E = embeds.shape[-1]
    embeds_tm = jnp.transpose(embeds, (1, 0, 2)).astype(jnp.float32)  # (T,B,E)
    embeds_tm = jnp.pad(embeds_tm, ((0, 0), (0, pad_b), (0, 0)))
    emb_flat = embeds_tm.reshape(T * Bp, E)

    lens_p = jnp.pad(lengths.astype(jnp.int32), (0, pad_b))           # padded -> len 0
    lens2d = lens_p.reshape(Bp, 1)

    oh = jnp.transpose(jax.nn.one_hot(tags, K, dtype=jnp.float32), (1, 0, 2))
    oh = jnp.pad(oh, ((0, 0), (0, pad_b), (0, 0)))                    # (T,Bp,K)
    t_idx = jnp.arange(T)[:, None, None]
    mask = (t_idx < lens_p[None, :, None]).astype(jnp.float32)        # (T,Bp,1)
    is_last = (t_idx == (lens_p[None, :, None] - 1)).astype(jnp.float32)
    oh_m = (oh * mask).reshape(T * Bp, K)
    oh_last = (oh * is_last).reshape(T * Bp, K)

    wih_cat = jnp.concatenate([params["wih_f"].T, params["wih_b"].T], axis=1)  # (E, 8Hd)
    b_cat = jnp.concatenate([params["bih_f"] + params["bhh_f"],
                             params["bih_b"] + params["bhh_b"]]).reshape(1, 8 * Hd)
    whh_f = params["whh_f"].T                                         # (Hd, 4Hd)
    whh_b = params["whh_b"].T
    wtag_cat = params["wtag"].T                                       # (2Hd, K)
    btag = params["btag"].reshape(1, K)
    trans = params["trans"]
    start_t = params["start"].reshape(1, K)
    end_t = params["end"].reshape(1, K)

    args = (lens2d, emb_flat, oh_m, oh_last,
            wih_cat, b_cat, whh_f, whh_b,
            wtag_cat, btag, trans, start_t, end_t)

    vspec = pl.BlockSpec(memory_space=pltpu.MemorySpace.VMEM)

    loss = pl.pallas_call(
        bilstm_crf_kernel,
        out_shape=jax.ShapeDtypeStruct((1, 1), jnp.float32),
        in_specs=[vspec] * len(args),
        out_specs=vspec,
        scratch_shapes=[
            pltpu.VMEM((T, Bp, 8 * Hd), jnp.float32),   # combined x-projection
            pltpu.VMEM((T, Bp, Hd), jnp.float32),       # fwd hidden outputs
            pltpu.VMEM((T, Bp, Hd), jnp.float32),       # bwd hidden outputs
            pltpu.VMEM((T, Bp, K), jnp.float32),        # emissions (alpha reads)
        ],
    )(*args)
    return loss[0, 0]


def init_params(key, vocab_size, embedding_dim, hidden_dim, tag_size):
    Hd = hidden_dim // 2
    ks = jax.random.split(key, 16)
    u = lambda k, shape, s: jax.random.uniform(k, shape, jnp.float32, -s, s)
    k_lstm = 1.0 / jnp.sqrt(Hd)
    k_lin = 1.0 / jnp.sqrt(hidden_dim)
    return {
        "embedding": jax.random.normal(ks[0], (vocab_size, embedding_dim), jnp.float32),
        "wih_f": u(ks[1], (4 * Hd, embedding_dim), k_lstm),
        "whh_f": u(ks[2], (4 * Hd, Hd), k_lstm),
        "bih_f": u(ks[3], (4 * Hd,), k_lstm),
        "bhh_f": u(ks[4], (4 * Hd,), k_lstm),
        "wih_b": u(ks[5], (4 * Hd, embedding_dim), k_lstm),
        "whh_b": u(ks[6], (4 * Hd, Hd), k_lstm),
        "bih_b": u(ks[7], (4 * Hd,), k_lstm),
        "bhh_b": u(ks[8], (4 * Hd,), k_lstm),
        "wtag": u(ks[9], (tag_size, hidden_dim), k_lin),
        "btag": u(ks[10], (tag_size,), k_lin),
        "trans": u(ks[11], (tag_size, tag_size), 0.1),
        "start": u(ks[12], (tag_size,), 0.1),
        "end": u(ks[13], (tag_size,), 0.1),
    }


if __name__ == "__main__":
    B, T = 2, 8
    embedding_dim, hidden_dim, vocab_size, tag_size = 16, 32, 50, 5

    key = jax.random.PRNGKey(0)
    kp, ks, kt = jax.random.split(key, 3)
    params = init_params(kp, vocab_size, embedding_dim, hidden_dim, tag_size)

    sentence = jax.random.randint(ks, (B, T), 0, vocab_size, dtype=jnp.int32)
    tags = jax.random.randint(kt, (B, T), 0, tag_size, dtype=jnp.int32)
    lengths = jnp.array([8, 6], dtype=jnp.int32)   # sorted desc (pack_padded_sequence)

    loss = bilstm_crf_forward(sentence, lengths, tags, params)
    jax.block_until_ready(loss)
    print("KERNEL_OK")
</pallas_src>

<mosaic_0001>
module attributes {stable_mosaic.version = 11 : i64} {
  func.func @bilstm_crf_kernel(%arg0: memref<8x1xi32, #tpu.memory_space<vmem>>, %arg1: memref<64x16xf32, #tpu.memory_space<vmem>>, %arg2: memref<64x5xf32, #tpu.memory_space<vmem>>, %arg3: memref<64x5xf32, #tpu.memory_space<vmem>>, %arg4: memref<16x128xf32, #tpu.memory_space<vmem>>, %arg5: memref<1x128xf32, #tpu.memory_space<vmem>>, %arg6: memref<16x64xf32, #tpu.memory_space<vmem>>, %arg7: memref<16x64xf32, #tpu.memory_space<vmem>>, %arg8: memref<32x5xf32, #tpu.memory_space<vmem>>, %arg9: memref<1x5xf32, #tpu.memory_space<vmem>>, %arg10: memref<5x5xf32, #tpu.memory_space<vmem>>, %arg11: memref<1x5xf32, #tpu.memory_space<vmem>>, %arg12: memref<1x5xf32, #tpu.memory_space<vmem>>, %arg13: memref<1x1xf32, #tpu.memory_space<vmem>>, %arg14: memref<8x8x128xf32, #tpu.memory_space<vmem>>, %arg15: memref<8x8x16xf32, #tpu.memory_space<vmem>>, %arg16: memref<8x8x16xf32, #tpu.memory_space<vmem>>, %arg17: memref<8x8x5xf32, #tpu.memory_space<vmem>>) attributes {dimension_semantics = [], scalar_prefetch = 0 : i64, scratch_operands = 4 : i64, tpu.core_type = #tpu.core_type<tc>} {
    %c0 = arith.constant 0 : index
    %c0_0 = arith.constant 0 : index
    %0 = vector.load %arg0[%c0, %c0_0] : memref<8x1xi32, #tpu.memory_space<vmem>>, vector<8x1xi32>
    %c0_1 = arith.constant 0 : index
    %c0_2 = arith.constant 0 : index
    %1 = vector.load %arg6[%c0_1, %c0_2] : memref<16x64xf32, #tpu.memory_space<vmem>>, vector<16x64xf32>
    %c0_3 = arith.constant 0 : index
    %c0_4 = arith.constant 0 : index
    %2 = vector.load %arg7[%c0_3, %c0_4] : memref<16x64xf32, #tpu.memory_space<vmem>>, vector<16x64xf32>
    %c0_5 = arith.constant 0 : index
    %c0_6 = arith.constant 0 : index
    %3 = vector.load %arg10[%c0_5, %c0_6] : memref<5x5xf32, #tpu.memory_space<vmem>>, vector<5x5xf32>
    %c0_7 = arith.constant 0 : index
    %c0_8 = arith.constant 0 : index
    %4 = vector.load %arg11[%c0_7, %c0_8] : memref<1x5xf32, #tpu.memory_space<vmem>>, vector<1x5xf32>
    %c0_9 = arith.constant 0 : index
    %c0_10 = arith.constant 0 : index
    %5 = vector.load %arg12[%c0_9, %c0_10] : memref<1x5xf32, #tpu.memory_space<vmem>>, vector<1x5xf32>
    %c0_11 = arith.constant 0 : index
    %c0_12 = arith.constant 0 : index
    %6 = vector.load %arg1[%c0_11, %c0_12] : memref<64x16xf32, #tpu.memory_space<vmem>>, vector<64x16xf32>
    %c0_13 = arith.constant 0 : index
    %c0_14 = arith.constant 0 : index
    %7 = vector.load %arg4[%c0_13, %c0_14] : memref<16x128xf32, #tpu.memory_space<vmem>>, vector<16x128xf32>
    %cst = arith.constant dense<0.000000e+00> : vector<64x128xf32>
    %8 = tpu.matmul %6, %7, %cst {dimension_numbers = #tpu.dot_dimension_numbers<[1], [0], [0], [1], [0, 0, 1, 1], [], []>} : vector<64x16xf32>, vector<16x128xf32>, vector<64x128xf32> -> vector<64x128xf32>
    %c0_15 = arith.constant 0 : index
    %c0_16 = arith.constant 0 : index
    %9 = vector.load %arg5[%c0_15, %c0_16] : memref<1x128xf32, #tpu.memory_space<vmem>>, vector<1x128xf32>
    %10 = vector.broadcast %9 : vector<1x128xf32> to vector<64x128xf32>
    %11 = arith.addf %8, %10 : vector<64x128xf32>
    %12 = vector.shape_cast %11 : vector<64x128xf32> to vector<8x8x128xf32>
    %c0_17 = arith.constant 0 : index
    %c0_18 = arith.constant 0 : index
    %c0_19 = arith.constant 0 : index
    %13 = vector.load %arg14[%c0_17, %c0_18, %c0_19] : memref<8x8x128xf32, #tpu.memory_space<vmem>>, vector<8x8x128xf32>
    tpu.vector_store %arg14[%c0_17, %c0_18, %c0_19], %12 {strides = array<i32>} : memref<8x8x128xf32, #tpu.memory_space<vmem>>, vector<8x8x128xf32>,
    %cst_20 = arith.constant 0.000000e+00 : f32
    %14 = vector.broadcast %cst_20 : f32 to vector<8x16xf32>
    %c0_i32 = arith.constant 0 : i32
    %c7_i32 = arith.constant 7 : i32
    %15 = arith.subi %c7_i32, %c0_i32 : i32
    %16 = vector.broadcast %c0_i32 : i32 to vector<8x1xi32>
    %17 = arith.cmpi slt, %16, %0 : vector<8x1xi32>
    %18 = arith.extui %17 : vector<8x1xi1> to vector<8x1xi32>
    %19 = arith.sitofp %18 : vector<8x1xi32> to vector<8x1xf32>
    %20 = vector.broadcast %15 : i32 to vector<8x1xi32>
    %21 = arith.cmpi slt, %20, %0 : vector<8x1xi32>
    %22 = arith.extui %21 : vector<8x1xi1> to vector<8x1xi32>
    %23 = arith.sitofp %22 : vector<8x1xi32> to vector<8x1xf32>
    %24 = arith.index_cast %c0_i32 : i32 to index
    %c0_21 = arith.constant 0 : index
    %c0_22 = arith.constant 0 : index
    %25 = vector.load %arg14[%24, %c0_21, %c0_22] : memref<8x8x128xf32, #tpu.memory_space<vmem>>, vector<1x8x128xf32>
    %26 = vector.shape_cast %25 : vector<1x8x128xf32> to vector<8x128xf32>
    %27 = arith.index_cast %15 : i32 to index
    %c0_23 = arith.constant 0 : index
    %c0_24 = arith.constant 0 : index
    %28 = vector.load %arg14[%27, %c0_23, %c0_24] : memref<8x8x128xf32, #tpu.memory_space<vmem>>, vector<1x8x128xf32>
    %29 = vector.shape_cast %28 : vector<1x8x128xf32> to vector<8x128xf32>
    %30 = vector.extract_strided_slice %26 {offsets = [0, 0], sizes = [8, 64], strides = [1, 1]} : vector<8x128xf32> to vector<8x64xf32>
    %cst_25 = arith.constant dense<0.000000e+00> : vector<8x64xf32>
    %31 = tpu.matmul %14, %1, %cst_25 {dimension_numbers = #tpu.dot_dimension_numbers<[1], [0], [0], [1], [0, 0, 1, 1], [], []>} : vector<8x16xf32>, vector<16x64xf32>, vector<8x64xf32> -> vector<8x64xf32>
    %32 = arith.addf %30, %31 : vector<8x64xf32>
    %33 = vector.extract_strided_slice %29 {offsets = [0, 64], sizes = [8, 64], strides = [1, 1]} : vector<8x128xf32> to vector<8x64xf32>
    %cst_26 = arith.constant dense<0.000000e+00> : vector<8x64xf32>
    %34 = tpu.matmul %14, %2, %cst_26 {dimension_numbers = #tpu.dot_dimension_numbers<[1], [0], [0], [1], [0, 0, 1, 1], [], []>} : vector<8x16xf32>, vector<16x64xf32>, vector<8x64xf32> -> vector<8x64xf32>
    %35 = arith.addf %33, %34 : vector<8x64xf32>
    %36 = vector.extract_strided_slice %32 {offsets = [0, 0], sizes = [8, 16], strides = [1, 1]} : vector<8x64xf32> to vector<8x16xf32>
    %37 = arith.negf %36 : vector<8x16xf32>
    %38 = math.exp %37 : vector<8x16xf32>
    %cst_27 = arith.constant 1.000000e+00 : f32
    %39 = vector.broadcast %cst_27 : f32 to vector<8x16xf32>
    %40 = arith.addf %39, %38 : vector<8x16xf32>
    %41 = arith.divf %39, %40 : vector<8x16xf32>
    %42 = vector.extract_strided_slice %32 {offsets = [0, 16], sizes = [8, 16], strides = [1, 1]} : vector<8x64xf32> to vector<8x16xf32>
    %43 = arith.negf %42 : vector<8x16xf32>
    %44 = math.exp %43 : vector<8x16xf32>
    %cst_28 = arith.constant 1.000000e+00 : f32
    %45 = vector.broadcast %cst_28 : f32 to vector<8x16xf32>
    %46 = arith.addf %45, %44 : vector<8x16xf32>
    %47 = arith.divf %45, %46 : vector<8x16xf32>
    %48 = vector.extract_strided_slice %32 {offsets = [0, 32], sizes = [8, 16], strides = [1, 1]} : vector<8x64xf32> to vector<8x16xf32>
    %49 = math.tanh %48 : vector<8x16xf32>
    %50 = vector.extract_strided_slice %32 {offsets = [0, 48], sizes = [8, 16], strides = [1, 1]} : vector<8x64xf32> to vector<8x16xf32>
    %51 = arith.negf %50 : vector<8x16xf32>
    %52 = math.exp %51 : vector<8x16xf32>
    %cst_29 = arith.constant 1.000000e+00 : f32
    %53 = vector.broadcast %cst_29 : f32 to vector<8x16xf32>
    %54 = arith.addf %53, %52 : vector<8x16xf32>
    %55 = arith.divf %53, %54 : vector<8x16xf32>
    %56 = arith.mulf %47, %14 : vector<8x16xf32>
    %57 = arith.mulf %41, %49 : vector<8x16xf32>
    %58 = arith.addf %56, %57 : vector<8x16xf32>
    %59 = math.tanh %58 : vector<8x16xf32>
    %60 = arith.mulf %55, %59 : vector<8x16xf32>
    %61 = vector.extract_strided_slice %35 {offsets = [0, 0], sizes = [8, 16], strides = [1, 1]} : vector<8x64xf32> to vector<8x16xf32>
    %62 = arith.negf %61 : vector<8x16xf32>
    %63 = math.exp %62 : vector<8x16xf32>
    %cst_30 = arith.constant 1.000000e+00 : f32
    %64 = vector.broadcast %cst_30 : f32 to vector<8x16xf32>
    %65 = arith.addf %64, %63 : vector<8x16xf32>
    %66 = arith.divf %64, %65 : vector<8x16xf32>
    %67 = vector.extract_strided_slice %35 {offsets = [0, 16], sizes = [8, 16], strides = [1, 1]} : vector<8x64xf32> to vector<8x16xf32>
    %68 = arith.negf %67 : vector<8x16xf32>
    %69 = math.exp %68 : vector<8x16xf32>
    %cst_31 = arith.constant 1.000000e+00 : f32
    %70 = vector.broadcast %cst_31 : f32 to vector<8x16xf32>
    %71 = arith.addf %70, %69 : vector<8x16xf32>
    %72 = arith.divf %70, %71 : vector<8x16xf32>
    %73 = vector.extract_strided_slice %35 {offsets = [0, 32], sizes = [8, 16], strides = [1, 1]} : vector<8x64xf32> to vector<8x16xf32>
    %74 = math.tanh %73 : vector<8x16xf32>
    %75 = vector.extract_strided_slice %35 {offsets = [0, 48], sizes = [8, 16], strides = [1, 1]} : vector<8x64xf32> to vector<8x16xf32>
    %76 = arith.negf %75 : vector<8x16xf32>
    %77 = math.exp %76 : vector<8x16xf32>
    %cst_32 = arith.constant 1.000000e+00 : f32
    %78 = vector.broadcast %cst_32 : f32 to vector<8x16xf32>
    %79 = arith.addf %78, %77 : vector<8x16xf32>
    %80 = arith.divf %78, %79 : vector<8x16xf32>
    %81 = arith.mulf %72, %14 : vector<8x16xf32>
    %82 = arith.mulf %66, %74 : vector<8x16xf32>
    %83 = arith.addf %81, %82 : vector<8x16xf32>
    %84 = math.tanh %83 : vector<8x16xf32>
    %85 = arith.mulf %80, %84 : vector<8x16xf32>
    %86 = arith.subf %60, %14 : vector<8x16xf32>
    %87 = vector.broadcast %19 : vector<8x1xf32> to vector<8x16xf32>
    %88 = arith.mulf %87, %86 : vector<8x16xf32>
    %89 = arith.addf %14, %88 : vector<8x16xf32>
    %90 = arith.subf %58, %14 : vector<8x16xf32>
    %91 = vector.broadcast %19 : vector<8x1xf32> to vector<8x16xf32>
    %92 = arith.mulf %91, %90 : vector<8x16xf32>
    %93 = arith.addf %14, %92 : vector<8x16xf32>
    %94 = arith.subf %85, %14 : vector<8x16xf32>
    %95 = vector.broadcast %23 : vector<8x1xf32> to vector<8x16xf32>
    %96 = arith.mulf %95, %94 : vector<8x16xf32>
    %97 = arith.addf %14, %96 : vector<8x16xf32>
    %98 = arith.subf %83, %14 : vector<8x16xf32>
    %99 = vector.broadcast %23 : vector<8x1xf32> to vector<8x16xf32>
    %100 = arith.mulf %99, %98 : vector<8x16xf32>
    %101 = arith.addf %14, %100 : vector<8x16xf32>
    %102 = vector.broadcast %19 : vector<8x1xf32> to vector<8x16xf32>
    %103 = arith.mulf %102, %89 : vector<8x16xf32>
    %104 = arith.index_cast %c0_i32 : i32 to index
    %c0_33 = arith.constant 0 : index
    %c0_34 = arith.constant 0 : index
    %105 = vector.load %arg15[%104, %c0_33, %c0_34] : memref<8x8x16xf32, #tpu.memory_space<vmem>>, vector<1x8x16xf32>
    %106 = vector.shape_cast %105 : vector<1x8x16xf32> to vector<8x16xf32>
    %107 = vector.shape_cast %103 : vector<8x16xf32> to vector<1x8x16xf32>
    tpu.vector_store %arg15[%104, %c0_33, %c0_34], %107 {strides = array<i32>} : memref<8x8x16xf32, #tpu.memory_space<vmem>>, vector<1x8x16xf32>,
    %108 = vector.broadcast %23 : vector<8x1xf32> to vector<8x16xf32>
    %109 = arith.mulf %108, %97 : vector<8x16xf32>
    %110 = arith.index_cast %15 : i32 to index
    %c0_35 = arith.constant 0 : index
    %c0_36 = arith.constant 0 : index
    %111 = vector.load %arg16[%110, %c0_35, %c0_36] : memref<8x8x16xf32, #tpu.memory_space<vmem>>, vector<1x8x16xf32>
    %112 = vector.shape_cast %111 : vector<1x8x16xf32> to vector<8x16xf32>
    %113 = vector.shape_cast %109 : vector<8x16xf32> to vector<1x8x16xf32>
    tpu.vector_store %arg16[%110, %c0_35, %c0_36], %113 {strides = array<i32>} : memref<8x8x16xf32, #tpu.memory_space<vmem>>, vector<1x8x16xf32>,
    %c1_i32 = arith.constant 1 : i32
    %c7_i32_37 = arith.constant 7 : i32
    %114 = arith.subi %c7_i32_37, %c1_i32 : i32
    %115 = vector.broadcast %c1_i32 : i32 to vector<8x1xi32>
    %116 = arith.cmpi slt, %115, %0 : vector<8x1xi32>
    %117 = arith.extui %116 : vector<8x1xi1> to vector<8x1xi32>
    %118 = arith.sitofp %117 : vector<8x1xi32> to vector<8x1xf32>
    %119 = vector.broadcast %114 : i32 to vector<8x1xi32>
    %120 = arith.cmpi slt, %119, %0 : vector<8x1xi32>
    %121 = arith.extui %120 : vector<8x1xi1> to vector<8x1xi32>
    %122 = arith.sitofp %121 : vector<8x1xi32> to vector<8x1xf32>
    %123 = arith.index_cast %c1_i32 : i32 to index
    %c0_38 = arith.constant 0 : index
    %c0_39 = arith.constant 0 : index
    %124 = vector.load %arg14[%123, %c0_38, %c0_39] : memref<8x8x128xf32, #tpu.memory_space<vmem>>, vector<1x8x128xf32>
    %125 = vector.shape_cast %124 : vector<1x8x128xf32> to vector<8x128xf32>
    %126 = arith.index_cast %114 : i32 to index
    %c0_40 = arith.constant 0 : index
    %c0_41 = arith.constant 0 : index
    %127 = vector.load %arg14[%126, %c0_40, %c0_41] : memref<8x8x128xf32, #tpu.memory_space<vmem>>, vector<1x8x128xf32>
    %128 = vector.shape_cast %127 : vector<1x8x128xf32> to vector<8x128xf32>
    %129 = vector.extract_strided_slice %125 {offsets = [0, 0], sizes = [8, 64], strides = [1, 1]} : vector<8x128xf32> to vector<8x64xf32>
    %cst_42 = arith.constant dense<0.000000e+00> : vector<8x64xf32>
    %130 = tpu.matmul %89, %1, %cst_42 {dimension_numbers = #tpu.dot_dimension_numbers<[1], [0], [0], [1], [0, 0, 1, 1], [], []>} : vector<8x16xf32>, vector<16x64xf32>, vector<8x64xf32> -> vector<8x64xf32>
    %131 = arith.addf %129, %130 : vector<8x64xf32>
    %132 = vector.extract_strided_slice %128 {offsets = [0, 64], sizes = [8, 64], strides = [1, 1]} : vector<8x128xf32> to vector<8x64xf32>
    %cst_43 = arith.constant dense<0.000000e+00> : vector<8x64xf32>
    %133 = tpu.matmul %97, %2, %cst_43 {dimension_numbers = #tpu.dot_dimension_numbers<[1], [0], [0], [1], [0, 0, 1, 1], [], []>} : vector<8x16xf32>, vector<16x64xf32>, vector<8x64xf32> -> vector<8x64xf32>
    %134 = arith.addf %132, %133 : vector<8x64xf32>
    %135 = vector.extract_strided_slice %131 {offsets = [0, 0], sizes = [8, 16], strides = [1, 1]} : vector<8x64xf32> to vector<8x16xf32>
    %136 = arith.negf %135 : vector<8x16xf32>
    %137 = math.exp %136 : vector<8x16xf32>
    %cst_44 = arith.constant 1.000000e+00 : f32
    %138 = vector.broadcast %cst_44 : f32 to vector<8x16xf32>
    %139 = arith.addf %138, %137 : vector<8x16xf32>
    %140 = arith.divf %138, %139 : vector<8x16xf32>
    %141 = vector.extract_strided_slice %131 {offsets = [0, 16], sizes = [8, 16], strides = [1, 1]} : vector<8x64xf32> to vector<8x16xf32>
    %142 = arith.negf %141 : vector<8x16xf32>
    %143 = math.exp %142 : vector<8x16xf32>
    %cst_45 = arith.constant 1.000000e+00 : f32
    %144 = vector.broadcast %cst_45 : f32 to vector<8x16xf32>
    %145 = arith.addf %144, %143 : vector<8x16xf32>
    %146 = arith.divf %144, %145 : vector<8x16xf32>
    %147 = vector.extract_strided_slice %131 {offsets = [0, 32], sizes = [8, 16], strides = [1, 1]} : vector<8x64xf32> to vector<8x16xf32>
    %148 = math.tanh %147 : vector<8x16xf32>
    %149 = vector.extract_strided_slice %131 {offsets = [0, 48], sizes = [8, 16], strides = [1, 1]} : vector<8x64xf32> to vector<8x16xf32>
    %150 = arith.negf %149 : vector<8x16xf32>
    %151 = math.exp %150 : vector<8x16xf32>
    %cst_46 = arith.constant 1.000000e+00 : f32
    %152 = vector.broadcast %cst_46 : f32 to vector<8x16xf32>
    %153 = arith.addf %152, %151 : vector<8x16xf32>
    %154 = arith.divf %152, %153 : vector<8x16xf32>
    %155 = arith.mulf %146, %93 : vector<8x16xf32>
    %156 = arith.mulf %140, %148 : vector<8x16xf32>
    %157 = arith.addf %155, %156 : vector<8x16xf32>
    %158 = math.tanh %157 : vector<8x16xf32>
    %159 = arith.mulf %154, %158 : vector<8x16xf32>
    %160 = vector.extract_strided_slice %134 {offsets = [0, 0], sizes = [8, 16], strides = [1, 1]} : vector<8x64xf32> to vector<8x16xf32>
    %161 = arith.negf %160 : vector<8x16xf32>
    %162 = math.exp %161 : vector<8x16xf32>
    %cst_47 = arith.constant 1.000000e+00 : f32
    %163 = vector.broadcast %cst_47 : f32 to vector<8x16xf32>
    %164 = arith.addf %163, %162 : vector<8x16xf32>
    %165 = arith.divf %163, %164 : vector<8x16xf32>
    %166 = vector.extract_strided_slice %134 {offsets = [0, 16], sizes = [8, 16], strides = [1, 1]} : vector<8x64xf32> to vector<8x16xf32>
    %167 = arith.negf %166 : vector<8x16xf32>
    %168 = math.exp %167 : vector<8x16xf32>
    %cst_48 = arith.constant 1.000000e+00 : f32
    %169 = vector.broadcast %cst_48 : f32 to vector<8x16xf32>
    %170 = arith.addf %169, %168 : vector<8x16xf32>
    %171 = arith.divf %169, %170 : vector<8x16xf32>
    %172 = vector.extract_strided_slice %134 {offsets = [0, 32], sizes = [8, 16], strides = [1, 1]} : vector<8x64xf32> to vector<8x16xf32>
    %173 = math.tanh %172 : vector<8x16xf32>
    %174 = vector.extract_strided_slice %134 {offsets = [0, 48], sizes = [8, 16], strides = [1, 1]} : vector<8x64xf32> to vector<8x16xf32>
    %175 = arith.negf %174 : vector<8x16xf32>
    %176 = math.exp %175 : vector<8x16xf32>
    %cst_49 = arith.constant 1.000000e+00 : f32
    %177 = vector.broadcast %cst_49 : f32 to vector<8x16xf32>
    %178 = arith.addf %177, %176 : vector<8x16xf32>
    %179 = arith.divf %177, %178 : vector<8x16xf32>
    %180 = arith.mulf %171, %101 : vector<8x16xf32>
    %181 = arith.mulf %165, %173 : vector<8x16xf32>
    %182 = arith.addf %180, %181 : vector<8x16xf32>
    %183 = math.tanh %182 : vector<8x16xf32>
    %184 = arith.mulf %179, %183 : vector<8x16xf32>
    %185 = arith.subf %159, %89 : vector<8x16xf32>
    %186 = vector.broadcast %118 : vector<8x1xf32> to vector<8x16xf32>
    %187 = arith.mulf %186, %185 : vector<8x16xf32>
    %188 = arith.addf %89, %187 : vector<8x16xf32>
    %189 = arith.subf %157, %93 : vector<8x16xf32>
    %190 = vector.broadcast %118 : vector<8x1xf32> to vector<8x16xf32>
    %191 = arith.mulf %190, %189 : vector<8x16xf32>
    %192 = arith.addf %93, %191 : vector<8x16xf32>
    %193 = arith.subf %184, %97 : vector<8x16xf32>
    %194 = vector.broadcast %122 : vector<8x1xf32> to vector<8x16xf32>
    %195 = arith.mulf %194, %193 : vector<8x16xf32>
    %196 = arith.addf %97, %195 : vector<8x16xf32>
    %197 = arith.subf %182, %101 : vector<8x16xf32>
    %198 = vector.broadcast %122 : vector<8x1xf32> to vector<8x16xf32>
    %199 = arith.mulf %198, %197 : vector<8x16xf32>
    %200 = arith.addf %101, %199 : vector<8x16xf32>
    %201 = vector.broadcast %118 : vector<8x1xf32> to vector<8x16xf32>
    %202 = arith.mulf %201, %188 : vector<8x16xf32>
    %203 = arith.index_cast %c1_i32 : i32 to index
    %c0_50 = arith.constant 0 : index
    %c0_51 = arith.constant 0 : index
    %204 = vector.load %arg15[%203, %c0_50, %c0_51] : memref<8x8x16xf32, #tpu.memory_space<vmem>>, vector<1x8x16xf32>
    %205 = vector.shape_cast %204 : vector<1x8x16xf32> to vector<8x16xf32>
    %206 = vector.shape_cast %202 : vector<8x16xf32> to vector<1x8x16xf32>
    tpu.vector_store %arg15[%203, %c0_50, %c0_51], %206 {strides = array<i32>} : memref<8x8x16xf32, #tpu.memory_space<vmem>>, vector<1x8x16xf32>,
    %207 = vector.broadcast %122 : vector<8x1xf32> to vector<8x16xf32>
    %208 = arith.mulf %207, %196 : vector<8x16xf32>
    %209 = arith.index_cast %114 : i32 to index
    %c0_52 = arith.constant 0 : index
    %c0_53 = arith.constant 0 : index
    %210 = vector.load %arg16[%209, %c0_52, %c0_53] : memref<8x8x16xf32, #tpu.memory_space<vmem>>, vector<1x8x16xf32>
    %211 = vector.shape_cast %210 : vector<1x8x16xf32> to vector<8x16xf32>
    %212 = vector.shape_cast %208 : vector<8x16xf32> to vector<1x8x16xf32>
    tpu.vector_store %arg16[%209, %c0_52, %c0_53], %212 {strides = array<i32>} : memref<8x8x16xf32, #tpu.memory_space<vmem>>, vector<1x8x16xf32>,
    %c2_i32 = arith.constant 2 : i32
    %c7_i32_54 = arith.constant 7 : i32
    %213 = arith.subi %c7_i32_54, %c2_i32 : i32
    %214 = vector.broadcast %c2_i32 : i32 to vector<8x1xi32>
    %215 = arith.cmpi slt, %214, %0 : vector<8x1xi32>
    %216 = arith.extui %215 : vector<8x1xi1> to vector<8x1xi32>
    %217 = arith.sitofp %216 : vector<8x1xi32> to vector<8x1xf32>
    %218 = vector.broadcast %213 : i32 to vector<8x1xi32>
    %219 = arith.cmpi slt, %218, %0 : vector<8x1xi32>
    %220 = arith.extui %219 : vector<8x1xi1> to vector<8x1xi32>
    %221 = arith.sitofp %220 : vector<8x1xi32> to vector<8x1xf32>
    %222 = arith.index_cast %c2_i32 : i32 to index
    %c0_55 = arith.constant 0 : index
    %c0_56 = arith.constant 0 : index
    %223 = vector.load %arg14[%222, %c0_55, %c0_56] : memref<8x8x128xf32, #tpu.memory_space<vmem>>, vector<1x8x128xf32>
    %224 = vector.shape_cast %223 : vector<1x8x128xf32> to vector<8x128xf32>
    %225 = arith.index_cast %213 : i32 to index
    %c0_57 = arith.constant 0 : index
    %c0_58 = arith.constant 0 : index
    %226 = vector.load %arg14[%225, %c0_57, %c0_58] : memref<8x8x128xf32, #tpu.memory_space<vmem>>, vector<1x8x128xf32>
    %227 = vector.shape_cast %226 : vector<1x8x128xf32> to vector<8x128xf32>
    %228 = vector.extract_strided_slice %224 {offsets = [0, 0], sizes = [8, 64], strides = [1, 1]} : vector<8x128xf32> to vector<8x64xf32>
    %cst_59 = arith.constant dense<0.000000e+00> : vector<8x64xf32>
    %229 = tpu.matmul %188, %1, %cst_59 {dimension_numbers = #tpu.dot_dimension_numbers<[1], [0], [0], [1], [0, 0, 1, 1], [], []>} : vector<8x16xf32>, vector<16x64xf32>, vector<8x64xf32> -> vector<8x64xf32>
    %230 = arith.addf %228, %229 : vector<8x64xf32>
    %231 = vector.extract_strided_slice %227 {offsets = [0, 64], sizes = [8, 64], strides = [1, 1]} : vector<8x128xf32> to vector<8x64xf32>
    %cst_60 = arith.constant dense<0.000000e+00> : vector<8x64xf32>
    %232 = tpu.matmul %196, %2, %cst_60 {dimension_numbers = #tpu.dot_dimension_numbers<[1], [0], [0], [1], [0, 0, 1, 1], [], []>} : vector<8x16xf32>, vector<16x64xf32>, vector<8x64xf32> -> vector<8x64xf32>
    %233 = arith.addf %231, %232 : vector<8x64xf32>
    %234 = vector.extract_strided_slice %230 {offsets = [0, 0], sizes = [8, 16], strides = [1, 1]} : vector<8x64xf32> to vector<8x16xf32>
    %235 = arith.negf %234 : vector<8x16xf32>
    %236 = math.exp %235 : vector<8x16xf32>
    %cst_61 = arith.constant 1.000000e+00 : f32
    %237 = vector.broadcast %cst_61 : f32 to vector<8x16xf32>
    %238 = arith.addf %237, %236 : vector<8x16xf32>
    %239 = arith.divf %237, %238 : vector<8x16xf32>
    %240 = vector.extract_strided_slice %230 {offsets = [0, 16], sizes = [8, 16], strides = [1, 1]} : vector<8x64xf32> to vector<8x16xf32>
    %241 = arith.negf %240 : vector<8x16xf32>
    %242 = math.exp %241 : vector<8x16xf32>
    %cst_62 = arith.constant 1.000000e+00 : f32
    %243 = vector.broadcast %cst_62 : f32 to vector<8x16xf32>
    %244 = arith.addf %243, %242 : vector<8x16xf32>
    %245 = arith.divf %243, %244 : vector<8x16xf32>
    %246 = vector.extract_strided_slice %230 {offsets = [0, 32], sizes = [8, 16], strides = [1, 1]} : vector<8x64xf32> to vector<8x16xf32>
    %247 = math.tanh %246 : vector<8x16xf32>
    %248 = vector.extract_strided_slice %230 {offsets = [0, 48], sizes = [8, 16], strides = [1, 1]} : vector<8x64xf32> to vector<8x16xf32>
    %249 = arith.negf %248 : vector<8x16xf32>
    %250 = math.exp %249 : vector<8x16xf32>
    %cst_63 = arith.constant 1.000000e+00 : f32
    %251 = vector.broadcast %cst_63 : f32 to vector<8x16xf32>
    %252 = arith.addf %251, %250 : vector<8x16xf32>
    %253 = arith.divf %251, %252 : vector<8x16xf32>
    %254 = arith.mulf %245, %192 : vector<8x16xf32>
    %255 = arith.mulf %239, %247 : vector<8x16xf32>
    %256 = arith.addf %254, %255 : vector<8x16xf32>
    %257 = math.tanh %256 : vector<8x16xf32>
    %258 = arith.mulf %253, %257 : vector<8x16xf32>
    %259 = vector.extract_strided_slice %233 {offsets = [0, 0], sizes = [8, 16], strides = [1, 1]} : vector<8x64xf32> to vector<8x16xf32>
    %260 = arith.negf %259 : vector<8x16xf32>
    %261 = math.exp %260 : vector<8x16xf32>
    %cst_64 = arith.constant 1.000000e+00 : f32
    %262 = vector.broadcast %cst_64 : f32 to vector<8x16xf32>
    %263 = arith.addf %262, %261 : vector<8x16xf32>
    %264 = arith.divf %262, %263 : vector<8x16xf32>
    %265 = vector.extract_strided_slice %233 {offsets = [0, 16], sizes = [8, 16], strides = [1, 1]} : vector<8x64xf32> to vector<8x16xf32>
    %266 = arith.negf %265 : vector<8x16xf32>
    %267 = math.exp %266 : vector<8x16xf32>
    %cst_65 = arith.constant 1.000000e+00 : f32
    %268 = vector.broadcast %cst_65 : f32 to vector<8x16xf32>
    %269 = arith.addf %268, %267 : vector<8x16xf32>
    %270 = arith.divf %268, %269 : vector<8x16xf32>
    %271 = vector.extract_strided_slice %233 {offsets = [0, 32], sizes = [8, 16], strides = [1, 1]} : vector<8x64xf32> to vector<8x16xf32>
    %272 = math.tanh %271 : vector<8x16xf32>
    %273 = vector.extract_strided_slice %233 {offsets = [0, 48], sizes = [8, 16], strides = [1, 1]} : vector<8x64xf32> to vector<8x16xf32>
    %274 = arith.negf %273 : vector<8x16xf32>
    %275 = math.exp %274 : vector<8x16xf32>
    %cst_66 = arith.constant 1.000000e+00 : f32
    %276 = vector.broadcast %cst_66 : f32 to vector<8x16xf32>
    %277 = arith.addf %276, %275 : vector<8x16xf32>
    %278 = arith.divf %276, %277 : vector<8x16xf32>
    %279 = arith.mulf %270, %200 : vector<8x16xf32>
    %280 = arith.mulf %264, %272 : vector<8x16xf32>
    %281 = arith.addf %279, %280 : vector<8x16xf32>
    %282 = math.tanh %281 : vector<8x16xf32>
    %283 = arith.mulf %278, %282 : vector<8x16xf32>
    %284 = arith.subf %258, %188 : vector<8x16xf32>
    %285 = vector.broadcast %217 : vector<8x1xf32> to vector<8x16xf32>
    %286 = arith.mulf %285, %284 : vector<8x16xf32>
    %287 = arith.addf %188, %286 : vector<8x16xf32>
    %288 = arith.subf %256, %192 : vector<8x16xf32>
    %289 = vector.broadcast %217 : vector<8x1xf32> to vector<8x16xf32>
    %290 = arith.mulf %289, %288 : vector<8x16xf32>
    %291 = arith.addf %192, %290 : vector<8x16xf32>
    %292 = arith.subf %283, %196 : vector<8x16xf32>
    %293 = vector.broadcast %221 : vector<8x1xf32> to vector<8x16xf32>
    %294 = arith.mulf %293, %292 : vector<8x16xf32>
    %295 = arith.addf %196, %294 : vector<8x16xf32>
    %296 = arith.subf %281, %200 : vector<8x16xf32>
    %297 = vector.broadcast %221 : vector<8x1xf32> to vector<8x16xf32>
    %298 = arith.mulf %297, %296 : vector<8x16xf32>
    %299 = arith.addf %200, %298 : vector<8x16xf32>
    %300 = vector.broadcast %217 : vector<8x1xf32> to vector<8x16xf32>
    %301 = arith.mulf %300, %287 : vector<8x16xf32>
    %302 = arith.index_cast %c2_i32 : i32 to index
    %c0_67 = arith.constant 0 : index
    %c0_68 = arith.constant 0 : index
    %303 = vector.load %arg15[%302, %c0_67, %c0_68] : memref<8x8x16xf32, #tpu.memory_space<vmem>>, vector<1x8x16xf32>
    %304 = vector.shape_cast %303 : vector<1x8x16xf32> to vector<8x16xf32>
    %305 = vector.shape_cast %301 : vector<8x16xf32> to vector<1x8x16xf32>
    tpu.vector_store %arg15[%302, %c0_67, %c0_68], %305 {strides = array<i32>} : memref<8x8x16xf32, #tpu.memory_space<vmem>>, vector<1x8x16xf32>,
    %306 = vector.broadcast %221 : vector<8x1xf32> to vector<8x16xf32>
    %307 = arith.mulf %306, %295 : vector<8x16xf32>
    %308 = arith.index_cast %213 : i32 to index
    %c0_69 = arith.constant 0 : index
    %c0_70 = arith.constant 0 : index
    %309 = vector.load %arg16[%308, %c0_69, %c0_70] : memref<8x8x16xf32, #tpu.memory_space<vmem>>, vector<1x8x16xf32>
    %310 = vector.shape_cast %309 : vector<1x8x16xf32> to vector<8x16xf32>
    %311 = vector.shape_cast %307 : vector<8x16xf32> to vector<1x8x16xf32>
    tpu.vector_store %arg16[%308, %c0_69, %c0_70], %311 {strides = array<i32>} : memref<8x8x16xf32, #tpu.memory_space<vmem>>, vector<1x8x16xf32>,
    %c3_i32 = arith.constant 3 : i32
    %c7_i32_71 = arith.constant 7 : i32
    %312 = arith.subi %c7_i32_71, %c3_i32 : i32
    %313 = vector.broadcast %c3_i32 : i32 to vector<8x1xi32>
    %314 = arith.cmpi slt, %313, %0 : vector<8x1xi32>
    %315 = arith.extui %314 : vector<8x1xi1> to vector<8x1xi32>
    %316 = arith.sitofp %315 : vector<8x1xi32> to vector<8x1xf32>
    %317 = vector.broadcast %312 : i32 to vector<8x1xi32>
    %318 = arith.cmpi slt, %317, %0 : vector<8x1xi32>
    %319 = arith.extui %318 : vector<8x1xi1> to vector<8x1xi32>
    %320 = arith.sitofp %319 : vector<8x1xi32> to vector<8x1xf32>
    %321 = arith.index_cast %c3_i32 : i32 to index
    %c0_72 = arith.constant 0 : index
    %c0_73 = arith.constant 0 : index
    %322 = vector.load %arg14[%321, %c0_72, %c0_73] : memref<8x8x128xf32, #tpu.memory_space<vmem>>, vector<1x8x128xf32>
    %323 = vector.shape_cast %322 : vector<1x8x128xf32> to vector<8x128xf32>
    %324 = arith.index_cast %312 : i32 to index
    %c0_74 = arith.constant 0 : index
    %c0_75 = arith.constant 0 : index
    %325 = vector.load %arg14[%324, %c0_74, %c0_75] : memref<8x8x128xf32, #tpu.memory_space<vmem>>, vector<1x8x128xf32>
    %326 = vector.shape_cast %325 : vector<1x8x128xf32> to vector<8x128xf32>
    %327 = vector.extract_strided_slice %323 {offsets = [0, 0], sizes = [8, 64], strides = [1, 1]} : vector<8x128xf32> to vector<8x64xf32>
    %cst_76 = arith.constant dense<0.000000e+00> : vector<8x64xf32>
    %328 = tpu.matmul %287, %1, %cst_76 {dimension_numbers = #tpu.dot_dimension_numbers<[1], [0], [0], [1], [0, 0, 1, 1], [], []>} : vector<8x16xf32>, vector<16x64xf32>, vector<8x64xf32> -> vector<8x64xf32>
    %329 = arith.addf %327, %328 : vector<8x64xf32>
    %330 = vector.extract_strided_slice %326 {offsets = [0, 64], sizes = [8, 64], strides = [1, 1]} : vector<8x128xf32> to vector<8x64xf32>
    %cst_77 = arith.constant dense<0.000000e+00> : vector<8x64xf32>
    %331 = tpu.matmul %295, %2, %cst_77 {dimension_numbers = #tpu.dot_dimension_numbers<[1], [0], [0], [1], [0, 0, 1, 1], [], []>} : vector<8x16xf32>, vector<16x64xf32>, vector<8x64xf32> -> vector<8x64xf32>
    %332 = arith.addf %330, %331 : vector<8x64xf32>
    %333 = vector.extract_strided_slice %329 {offsets = [0, 0], sizes = [8, 16], strides = [1, 1]} : vector<8x64xf32> to vector<8x16xf32>
    %334 = arith.negf %333 : vector<8x16xf32>
    %335 = math.exp %334 : vector<8x16xf32>
    %cst_78 = arith.constant 1.000000e+00 : f32
    %336 = vector.broadcast %cst_78 : f32 to vector<8x16xf32>
    %337 = arith.addf %336, %335 : vector<8x16xf32>
    %338 = arith.divf %336, %337 : vector<8x16xf32>
    %339 = vector.extract_strided_slice %329 {offsets = [0, 16], sizes = [8, 16], strides = [1, 1]} : vector<8x64xf32> to vector<8x16xf32>
    %340 = arith.negf %339 : vector<8x16xf32>
    %341 = math.exp %340 : vector<8x16xf32>
    %cst_79 = arith.constant 1.000000e+00 : f32
    %342 = vector.broadcast %cst_79 : f32 to vector<8x16xf32>
    %343 = arith.addf %342, %341 : vector<8x16xf32>
    %344 = arith.divf %342, %343 : vector<8x16xf32>
    %345 = vector.extract_strided_slice %329 {offsets = [0, 32], sizes = [8, 16], strides = [1, 1]} : vector<8x64xf32> to vector<8x16xf32>
    %346 = math.tanh %345 : vector<8x16xf32>
    %347 = vector.extract_strided_slice %329 {offsets = [0, 48], sizes = [8, 16], strides = [1, 1]} : vector<8x64xf32> to vector<8x16xf32>
    %348 = arith.negf %347 : vector<8x16xf32>
    %349 = math.exp %348 : vector<8x16xf32>
    %cst_80 = arith.constant 1.000000e+00 : f32
    %350 = vector.broadcast %cst_80 : f32 to vector<8x16xf32>
    %351 = arith.addf %350, %349 : vector<8x16xf32>
    %352 = arith.divf %350, %351 : vector<8x16xf32>
    %353 = arith.mulf %344, %291 : vector<8x16xf32>
    %354 = arith.mulf %338, %346 : vector<8x16xf32>
    %355 = arith.addf %353, %354 : vector<8x16xf32>
    %356 = math.tanh %355 : vector<8x16xf32>
    %357 = arith.mulf %352, %356 : vector<8x16xf32>
    %358 = vector.extract_strided_slice %332 {offsets = [0, 0], sizes = [8, 16], strides = [1, 1]} : vector<8x64xf32> to vector<8x16xf32>
    %359 = arith.negf %358 : vector<8x16xf32>
    %360 = math.exp %359 : vector<8x16xf32>
    %cst_81 = arith.constant 1.000000e+00 : f32
    %361 = vector.broadcast %cst_81 : f32 to vector<8x16xf32>
    %362 = arith.addf %361, %360 : vector<8x16xf32>
    %363 = arith.divf %361, %362 : vector<8x16xf32>
    %364 = vector.extract_strided_slice %332 {offsets = [0, 16], sizes = [8, 16], strides = [1, 1]} : vector<8x64xf32> to vector<8x16xf32>
    %365 = arith.negf %364 : vector<8x16xf32>
    %366 = math.exp %365 : vector<8x16xf32>
    %cst_82 = arith.constant 1.000000e+00 : f32
    %367 = vector.broadcast %cst_82 : f32 to vector<8x16xf32>
    %368 = arith.addf %367, %366 : vector<8x16xf32>
    %369 = arith.divf %367, %368 : vector<8x16xf32>
    %370 = vector.extract_strided_slice %332 {offsets = [0, 32], sizes = [8, 16], strides = [1, 1]} : vector<8x64xf32> to vector<8x16xf32>
    %371 = math.tanh %370 : vector<8x16xf32>
    %372 = vector.extract_strided_slice %332 {offsets = [0, 48], sizes = [8, 16], strides = [1, 1]} : vector<8x64xf32> to vector<8x16xf32>
    %373 = arith.negf %372 : vector<8x16xf32>
    %374 = math.exp %373 : vector<8x16xf32>
    %cst_83 = arith.constant 1.000000e+00 : f32
    %375 = vector.broadcast %cst_83 : f32 to vector<8x16xf32>
    %376 = arith.addf %375, %374 : vector<8x16xf32>
    %377 = arith.divf %375, %376 : vector<8x16xf32>
    %378 = arith.mulf %369, %299 : vector<8x16xf32>
    %379 = arith.mulf %363, %371 : vector<8x16xf32>
    %380 = arith.addf %378, %379 : vector<8x16xf32>
    %381 = math.tanh %380 : vector<8x16xf32>
    %382 = arith.mulf %377, %381 : vector<8x16xf32>
    %383 = arith.subf %357, %287 : vector<8x16xf32>
    %384 = vector.broadcast %316 : vector<8x1xf32> to vector<8x16xf32>
    %385 = arith.mulf %384, %383 : vector<8x16xf32>
    %386 = arith.addf %287, %385 : vector<8x16xf32>
    %387 = arith.subf %355, %291 : vector<8x16xf32>
    %388 = vector.broadcast %316 : vector<8x1xf32> to vector<8x16xf32>
    %389 = arith.mulf %388, %387 : vector<8x16xf32>
    %390 = arith.addf %291, %389 : vector<8x16xf32>
    %391 = arith.subf %382, %295 : vector<8x16xf32>
    %392 = vector.broadcast %320 : vector<8x1xf32> to vector<8x16xf32>
    %393 = arith.mulf %392, %391 : vector<8x16xf32>
    %394 = arith.addf %295, %393 : vector<8x16xf32>
    %395 = arith.subf %380, %299 : vector<8x16xf32>
    %396 = vector.broadcast %320 : vector<8x1xf32> to vector<8x16xf32>
    %397 = arith.mulf %396, %395 : vector<8x16xf32>
    %398 = arith.addf %299, %397 : vector<8x16xf32>
    %399 = vector.broadcast %316 : vector<8x1xf32> to vector<8x16xf32>
    %400 = arith.mulf %399, %386 : vector<8x16xf32>
    %401 = arith.index_cast %c3_i32 : i32 to index
    %c0_84 = arith.constant 0 : index
    %c0_85 = arith.constant 0 : index
    %402 = vector.load %arg15[%401, %c0_84, %c0_85] : memref<8x8x16xf32, #tpu.memory_space<vmem>>, vector<1x8x16xf32>
    %403 = vector.shape_cast %402 : vector<1x8x16xf32> to vector<8x16xf32>
    %404 = vector.shape_cast %400 : vector<8x16xf32> to vector<1x8x16xf32>
    tpu.vector_store %arg15[%401, %c0_84, %c0_85], %404 {strides = array<i32>} : memref<8x8x16xf32, #tpu.memory_space<vmem>>, vector<1x8x16xf32>,
    %405 = vector.broadcast %320 : vector<8x1xf32> to vector<8x16xf32>
    %406 = arith.mulf %405, %394 : vector<8x16xf32>
    %407 = arith.index_cast %312 : i32 to index
    %c0_86 = arith.constant 0 : index
    %c0_87 = arith.constant 0 : index
    %408 = vector.load %arg16[%407, %c0_86, %c0_87] : memref<8x8x16xf32, #tpu.memory_space<vmem>>, vector<1x8x16xf32>
    %409 = vector.shape_cast %408 : vector<1x8x16xf32> to vector<8x16xf32>
    %410 = vector.shape_cast %406 : vector<8x16xf32> to vector<1x8x16xf32>
    tpu.vector_store %arg16[%407, %c0_86, %c0_87], %410 {strides = array<i32>} : memref<8x8x16xf32, #tpu.memory_space<vmem>>, vector<1x8x16xf32>,
    %c4_i32 = arith.constant 4 : i32
    %c7_i32_88 = arith.constant 7 : i32
    %411 = arith.subi %c7_i32_88, %c4_i32 : i32
    %412 = vector.broadcast %c4_i32 : i32 to vector<8x1xi32>
    %413 = arith.cmpi slt, %412, %0 : vector<8x1xi32>
    %414 = arith.extui %413 : vector<8x1xi1> to vector<8x1xi32>
    %415 = arith.sitofp %414 : vector<8x1xi32> to vector<8x1xf32>
    %416 = vector.broadcast %411 : i32 to vector<8x1xi32>
    %417 = arith.cmpi slt, %416, %0 : vector<8x1xi32>
    %418 = arith.extui %417 : vector<8x1xi1> to vector<8x1xi32>
    %419 = arith.sitofp %418 : vector<8x1xi32> to vector<8x1xf32>
    %420 = arith.index_cast %c4_i32 : i32 to index
    %c0_89 = arith.constant 0 : index
    %c0_90 = arith.constant 0 : index
    %421 = vector.load %arg14[%420, %c0_89, %c0_90] : memref<8x8x128xf32, #tpu.memory_space<vmem>>, vector<1x8x128xf32>
    %422 = vector.shape_cast %421 : vector<1x8x128xf32> to vector<8x128xf32>
    %423 = arith.index_cast %411 : i32 to index
    %c0_91 = arith.constant 0 : index
    %c0_92 = arith.constant 0 : index
    %424 = vector.load %arg14[%423, %c0_91, %c0_92] : memref<8x8x128xf32, #tpu.memory_space<vmem>>, vector<1x8x128xf32>
    %425 = vector.shape_cast %424 : vector<1x8x128xf32> to vector<8x128xf32>
    %426 = vector.extract_strided_slice %422 {offsets = [0, 0], sizes = [8, 64], strides = [1, 1]} : vector<8x128xf32> to vector<8x64xf32>
    %cst_93 = arith.constant dense<0.000000e+00> : vector<8x64xf32>
    %427 = tpu.matmul %386, %1, %cst_93 {dimension_numbers = #tpu.dot_dimension_numbers<[1], [0], [0], [1], [0, 0, 1, 1], [], []>} : vector<8x16xf32>, vector<16x64xf32>, vector<8x64xf32> -> vector<8x64xf32>
    %428 = arith.addf %426, %427 : vector<8x64xf32>
    %429 = vector.extract_strided_slice %425 {offsets = [0, 64], sizes = [8, 64], strides = [1, 1]} : vector<8x128xf32> to vector<8x64xf32>
    %cst_94 = arith.constant dense<0.000000e+00> : vector<8x64xf32>
    %430 = tpu.matmul %394, %2, %cst_94 {dimension_numbers = #tpu.dot_dimension_numbers<[1], [0], [0], [1], [0, 0, 1, 1], [], []>} : vector<8x16xf32>, vector<16x64xf32>, vector<8x64xf32> -> vector<8x64xf32>
    %431 = arith.addf %429, %430 : vector<8x64xf32>
    %432 = vector.extract_strided_slice %428 {offsets = [0, 0], sizes = [8, 16], strides = [1, 1]} : vector<8x64xf32> to vector<8x16xf32>
    %433 = arith.negf %432 : vector<8x16xf32>
    %434 = math.exp %433 : vector<8x16xf32>
    %cst_95 = arith.constant 1.000000e+00 : f32
    %435 = vector.broadcast %cst_95 : f32 to vector<8x16xf32>
    %436 = arith.addf %435, %434 : vector<8x16xf32>
    %437 = arith.divf %435, %436 : vector<8x16xf32>
    %438 = vector.extract_strided_slice %428 {offsets = [0, 16], sizes = [8, 16], strides = [1, 1]} : vector<8x64xf32> to vector<8x16xf32>
    %439 = arith.negf %438 : vector<8x16xf32>
    %440 = math.exp %439 : vector<8x16xf32>
    %cst_96 = arith.constant 1.000000e+00 : f32
    %441 = vector.broadcast %cst_96 : f32 to vector<8x16xf32>
    %442 = arith.addf %441, %440 : vector<8x16xf32>
    %443 = arith.divf %441, %442 : vector<8x16xf32>
    %444 = vector.extract_strided_slice %428 {offsets = [0, 32], sizes = [8, 16], strides = [1, 1]} : vector<8x64xf32> to vector<8x16xf32>
    %445 = math.tanh %444 : vector<8x16xf32>
    %446 = vector.extract_strided_slice %428 {offsets = [0, 48], sizes = [8, 16], strides = [1, 1]} : vector<8x64xf32> to vector<8x16xf32>
    %447 = arith.negf %446 : vector<8x16xf32>
    %448 = math.exp %447 : vector<8x16xf32>
    %cst_97 = arith.constant 1.000000e+00 : f32
    %449 = vector.broadcast %cst_97 : f32 to vector<8x16xf32>
    %450 = arith.addf %449, %448 : vector<8x16xf32>
    %451 = arith.divf %449, %450 : vector<8x16xf32>
    %452 = arith.mulf %443, %390 : vector<8x16xf32>
    %453 = arith.mulf %437, %445 : vector<8x16xf32>
    %454 = arith.addf %452, %453 : vector<8x16xf32>
    %455 = math.tanh %454 : vector<8x16xf32>
    %456 = arith.mulf %451, %455 : vector<8x16xf32>
    %457 = vector.extract_strided_slice %431 {offsets = [0, 0], sizes = [8, 16], strides = [1, 1]} : vector<8x64xf32> to vector<8x16xf32>
    %458 = arith.negf %457 : vector<8x16xf32>
    %459 = math.exp %458 : vector<8x16xf32>
    %cst_98 = arith.constant 1.000000e+00 : f32
    %460 = vector.broadcast %cst_98 : f32 to vector<8x16xf32>
    %461 = arith.addf %460, %459 : vector<8x16xf32>
    %462 = arith.divf %460, %461 : vector<8x16xf32>
    %463 = vector.extract_strided_slice %431 {offsets = [0, 16], sizes = [8, 16], strides = [1, 1]} : vector<8x64xf32> to vector<8x16xf32>
    %464 = arith.negf %463 : vector<8x16xf32>
    %465 = math.exp %464 : vector<8x16xf32>
    %cst_99 = arith.constant 1.000000e+00 : f32
    %466 = vector.broadcast %cst_99 : f32 to vector<8x16xf32>
    %467 = arith.addf %466, %465 : vector<8x16xf32>
    %468 = arith.divf %466, %467 : vector<8x16xf32>
    %469 = vector.extract_strided_slice %431 {offsets = [0, 32], sizes = [8, 16], strides = [1, 1]} : vector<8x64xf32> to vector<8x16xf32>
    %470 = math.tanh %469 : vector<8x16xf32>
    %471 = vector.extract_strided_slice %431 {offsets = [0, 48], sizes = [8, 16], strides = [1, 1]} : vector<8x64xf32> to vector<8x16xf32>
    %472 = arith.negf %471 : vector<8x16xf32>
    %473 = math.exp %472 : vector<8x16xf32>
    %cst_100 = arith.constant 1.000000e+00 : f32
    %474 = vector.broadcast %cst_100 : f32 to vector<8x16xf32>
    %475 = arith.addf %474, %473 : vector<8x16xf32>
    %476 = arith.divf %474, %475 : vector<8x16xf32>
    %477 = arith.mulf %468, %398 : vector<8x16xf32>
    %478 = arith.mulf %462, %470 : vector<8x16xf32>
    %479 = arith.addf %477, %478 : vector<8x16xf32>
    %480 = math.tanh %479 : vector<8x16xf32>
    %481 = arith.mulf %476, %480 : vector<8x16xf32>
    %482 = arith.subf %456, %386 : vector<8x16xf32>
    %483 = vector.broadcast %415 : vector<8x1xf32> to vector<8x16xf32>
    %484 = arith.mulf %483, %482 : vector<8x16xf32>
    %485 = arith.addf %386, %484 : vector<8x16xf32>
    %486 = arith.subf %454, %390 : vector<8x16xf32>
    %487 = vector.broadcast %415 : vector<8x1xf32> to vector<8x16xf32>
    %488 = arith.mulf %487, %486 : vector<8x16xf32>
    %489 = arith.addf %390, %488 : vector<8x16xf32>
    %490 = arith.subf %481, %394 : vector<8x16xf32>
    %491 = vector.broadcast %419 : vector<8x1xf32> to vector<8x16xf32>
    %492 = arith.mulf %491, %490 : vector<8x16xf32>
    %493 = arith.addf %394, %492 : vector<8x16xf32>
    %494 = arith.subf %479, %398 : vector<8x16xf32>
    %495 = vector.broadcast %419 : vector<8x1xf32> to vector<8x16xf32>
    %496 = arith.mulf %495, %494 : vector<8x16xf32>
    %497 = arith.addf %398, %496 : vector<8x16xf32>
    %498 = vector.broadcast %415 : vector<8x1xf32> to vector<8x16xf32>
    %499 = arith.mulf %498, %485 : vector<8x16xf32>
    %500 = arith.index_cast %c4_i32 : i32 to index
    %c0_101 = arith.constant 0 : index
    %c0_102 = arith.constant 0 : index
    %501 = vector.load %arg15[%500, %c0_101, %c0_102] : memref<8x8x16xf32, #tpu.memory_space<vmem>>, vector<1x8x16xf32>
    %502 = vector.shape_cast %501 : vector<1x8x16xf32> to vector<8x16xf32>
    %503 = vector.shape_cast %499 : vector<8x16xf32> to vector<1x8x16xf32>
    tpu.vector_store %arg15[%500, %c0_101, %c0_102], %503 {strides = array<i32>} : memref<8x8x16xf32, #tpu.memory_space<vmem>>, vector<1x8x16xf32>,
    %504 = vector.broadcast %419 : vector<8x1xf32> to vector<8x16xf32>
    %505 = arith.mulf %504, %493 : vector<8x16xf32>
    %506 = arith.index_cast %411 : i32 to index
    %c0_103 = arith.constant 0 : index
    %c0_104 = arith.constant 0 : index
    %507 = vector.load %arg16[%506, %c0_103, %c0_104] : memref<8x8x16xf32, #tpu.memory_space<vmem>>, vector<1x8x16xf32>
    %508 = vector.shape_cast %507 : vector<1x8x16xf32> to vector<8x16xf32>
    %509 = vector.shape_cast %505 : vector<8x16xf32> to vector<1x8x16xf32>
    tpu.vector_store %arg16[%506, %c0_103, %c0_104], %509 {strides = array<i32>} : memref<8x8x16xf32, #tpu.memory_space<vmem>>, vector<1x8x16xf32>,
    %c5_i32 = arith.constant 5 : i32
    %c7_i32_105 = arith.constant 7 : i32
    %510 = arith.subi %c7_i32_105, %c5_i32 : i32
    %511 = vector.broadcast %c5_i32 : i32 to vector<8x1xi32>
    %512 = arith.cmpi slt, %511, %0 : vector<8x1xi32>
    %513 = arith.extui %512 : vector<8x1xi1> to vector<8x1xi32>
    %514 = arith.sitofp %513 : vector<8x1xi32> to vector<8x1xf32>
    %515 = vector.broadcast %510 : i32 to vector<8x1xi32>
    %516 = arith.cmpi slt, %515, %0 : vector<8x1xi32>
    %517 = arith.extui %516 : vector<8x1xi1> to vector<8x1xi32>
    %518 = arith.sitofp %517 : vector<8x1xi32> to vector<8x1xf32>
    %519 = arith.index_cast %c5_i32 : i32 to index
    %c0_106 = arith.constant 0 : index
    %c0_107 = arith.constant 0 : index
    %520 = vector.load %arg14[%519, %c0_106, %c0_107] : memref<8x8x128xf32, #tpu.memory_space<vmem>>, vector<1x8x128xf32>
    %521 = vector.shape_cast %520 : vector<1x8x128xf32> to vector<8x128xf32>
    %522 = arith.index_cast %510 : i32 to index
    %c0_108 = arith.constant 0 : index
    %c0_109 = arith.constant 0 : index
    %523 = vector.load %arg14[%522, %c0_108, %c0_109] : memref<8x8x128xf32, #tpu.memory_space<vmem>>, vector<1x8x128xf32>
    %524 = vector.shape_cast %523 : vector<1x8x128xf32> to vector<8x128xf32>
    %525 = vector.extract_strided_slice %521 {offsets = [0, 0], sizes = [8, 64], strides = [1, 1]} : vector<8x128xf32> to vector<8x64xf32>
    %cst_110 = arith.constant dense<0.000000e+00> : vector<8x64xf32>
    %526 = tpu.matmul %485, %1, %cst_110 {dimension_numbers = #tpu.dot_dimension_numbers<[1], [0], [0], [1], [0, 0, 1, 1], [], []>} : vector<8x16xf32>, vector<16x64xf32>, vector<8x64xf32> -> vector<8x64xf32>
    %527 = arith.addf %525, %526 : vector<8x64xf32>
    %528 = vector.extract_strided_slice %524 {offsets = [0, 64], sizes = [8, 64], strides = [1, 1]} : vector<8x128xf32> to vector<8x64xf32>
    %cst_111 = arith.constant dense<0.000000e+00> : vector<8x64xf32>
    %529 = tpu.matmul %493, %2, %cst_111 {dimension_numbers = #tpu.dot_dimension_numbers<[1], [0], [0], [1], [0, 0, 1, 1], [], []>} : vector<8x16xf32>, vector<16x64xf32>, vector<8x64xf32> -> vector<8x64xf32>
    %530 = arith.addf %528, %529 : vector<8x64xf32>
    %531 = vector.extract_strided_slice %527 {offsets = [0, 0], sizes = [8, 16], strides = [1, 1]} : vector<8x64xf32> to vector<8x16xf32>
    %532 = arith.negf %531 : vector<8x16xf32>
    %533 = math.exp %532 : vector<8x16xf32>
    %cst_112 = arith.constant 1.000000e+00 : f32
    %534 = vector.broadcast %cst_112 : f32 to vector<8x16xf32>
    %535 = arith.addf %534, %533 : vector<8x16xf32>
    %536 = arith.divf %534, %535 : vector<8x16xf32>
    %537 = vector.extract_strided_slice %527 {offsets = [0, 16], sizes = [8, 16], strides = [1, 1]} : vector<8x64xf32> to vector<8x16xf32>
    %538 = arith.negf %537 : vector<8x16xf32>
    %539 = math.exp %538 : vector<8x16xf32>
    %cst_113 = arith.constant 1.000000e+00 : f32
    %540 = vector.broadcast %cst_113 : f32 to vector<8x16xf32>
    %541 = arith.addf %540, %539 : vector<8x16xf32>
    %542 = arith.divf %540, %541 : vector<8x16xf32>
    %543 = vector.extract_strided_slice %527 {offsets = [0, 32], sizes = [8, 16], strides = [1, 1]} : vector<8x64xf32> to vector<8x16xf32>
    %544 = math.tanh %543 : vector<8x16xf32>
    %545 = vector.extract_strided_slice %527 {offsets = [0, 48], sizes = [8, 16], strides = [1, 1]} : vector<8x64xf32> to vector<8x16xf32>
    %546 = arith.negf %545 : vector<8x16xf32>
    %547 = math.exp %546 : vector<8x16xf32>
    %cst_114 = arith.constant 1.000000e+00 : f32
    %548 = vector.broadcast %cst_114 : f32 to vector<8x16xf32>
    %549 = arith.addf %548, %547 : vector<8x16xf32>
    %550 = arith.divf %548, %549 : vector<8x16xf32>
    %551 = arith.mulf %542, %489 : vector<8x16xf32>
    %552 = arith.mulf %536, %544 : vector<8x16xf32>
    %553 = arith.addf %551, %552 : vector<8x16xf32>
    %554 = math.tanh %553 : vector<8x16xf32>
    %555 = arith.mulf %550, %554 : vector<8x16xf32>
    %556 = vector.extract_strided_slice %530 {offsets = [0, 0], sizes = [8, 16], strides = [1, 1]} : vector<8x64xf32> to vector<8x16xf32>
    %557 = arith.negf %556 : vector<8x16xf32>
    %558 = math.exp %557 : vector<8x16xf32>
    %cst_115 = arith.constant 1.000000e+00 : f32
    %559 = vector.broadcast %cst_115 : f32 to vector<8x16xf32>
    %560 = arith.addf %559, %558 : vector<8x16xf32>
    %561 = arith.divf %559, %560 : vector<8x16xf32>
    %562 = vector.extract_strided_slice %530 {offsets = [0, 16], sizes = [8, 16], strides = [1, 1]} : vector<8x64xf32> to vector<8x16xf32>
    %563 = arith.negf %562 : vector<8x16xf32>
    %564 = math.exp %563 : vector<8x16xf32>
    %cst_116 = arith.constant 1.000000e+00 : f32
    %565 = vector.broadcast %cst_116 : f32 to vector<8x16xf32>
    %566 = arith.addf %565, %564 : vector<8x16xf32>
    %567 = arith.divf %565, %566 : vector<8x16xf32>
    %568 = vector.extract_strided_slice %530 {offsets = [0, 32], sizes = [8, 16], strides = [1, 1]} : vector<8x64xf32> to vector<8x16xf32>
    %569 = math.tanh %568 : vector<8x16xf32>
    %570 = vector.extract_strided_slice %530 {offsets = [0, 48], sizes = [8, 16], strides = [1, 1]} : vector<8x64xf32> to vector<8x16xf32>
    %571 = arith.negf %570 : vector<8x16xf32>
    %572 = math.exp %571 : vector<8x16xf32>
    %cst_117 = arith.constant 1.000000e+00 : f32
    %573 = vector.broadcast %cst_117 : f32 to vector<8x16xf32>
    %574 = arith.addf %573, %572 : vector<8x16xf32>
    %575 = arith.divf %573, %574 : vector<8x16xf32>
    %576 = arith.mulf %567, %497 : vector<8x16xf32>
    %577 = arith.mulf %561, %569 : vector<8x16xf32>
    %578 = arith.addf %576, %577 : vector<8x16xf32>
    %579 = math.tanh %578 : vector<8x16xf32>
    %580 = arith.mulf %575, %579 : vector<8x16xf32>
    %581 = arith.subf %555, %485 : vector<8x16xf32>
    %582 = vector.broadcast %514 : vector<8x1xf32> to vector<8x16xf32>
    %583 = arith.mulf %582, %581 : vector<8x16xf32>
    %584 = arith.addf %485, %583 : vector<8x16xf32>
    %585 = arith.subf %553, %489 : vector<8x16xf32>
    %586 = vector.broadcast %514 : vector<8x1xf32> to vector<8x16xf32>
    %587 = arith.mulf %586, %585 : vector<8x16xf32>
    %588 = arith.addf %489, %587 : vector<8x16xf32>
    %589 = arith.subf %580, %493 : vector<8x16xf32>
    %590 = vector.broadcast %518 : vector<8x1xf32> to vector<8x16xf32>
    %591 = arith.mulf %590, %589 : vector<8x16xf32>
    %592 = arith.addf %493, %591 : vector<8x16xf32>
    %593 = arith.subf %578, %497 : vector<8x16xf32>
    %594 = vector.broadcast %518 : vector<8x1xf32> to vector<8x16xf32>
    %595 = arith.mulf %594, %593 : vector<8x16xf32>
    %596 = arith.addf %497, %595 : vector<8x16xf32>
    %597 = vector.broadcast %514 : vector<8x1xf32> to vector<8x16xf32>
    %598 = arith.mulf %597, %584 : vector<8x16xf32>
    %599 = arith.index_cast %c5_i32 : i32 to index
    %c0_118 = arith.constant 0 : index
    %c0_119 = arith.constant 0 : index
    %600 = vector.load %arg15[%599, %c0_118, %c0_119] : memref<8x8x16xf32, #tpu.memory_space<vmem>>, vector<1x8x16xf32>
    %601 = vector.shape_cast %600 : vector<1x8x16xf32> to vector<8x16xf32>
    %602 = vector.shape_cast %598 : vector<8x16xf32> to vector<1x8x16xf32>
    tpu.vector_store %arg15[%599, %c0_118, %c0_119], %602 {strides = array<i32>} : memref<8x8x16xf32, #tpu.memory_space<vmem>>, vector<1x8x16xf32>,
    %603 = vector.broadcast %518 : vector<8x1xf32> to vector<8x16xf32>
    %604 = arith.mulf %603, %592 : vector<8x16xf32>
    %605 = arith.index_cast %510 : i32 to index
    %c0_120 = arith.constant 0 : index
    %c0_121 = arith.constant 0 : index
    %606 = vector.load %arg16[%605, %c0_120, %c0_121] : memref<8x8x16xf32, #tpu.memory_space<vmem>>, vector<1x8x16xf32>
    %607 = vector.shape_cast %606 : vector<1x8x16xf32> to vector<8x16xf32>
    %608 = vector.shape_cast %604 : vector<8x16xf32> to vector<1x8x16xf32>
    tpu.vector_store %arg16[%605, %c0_120, %c0_121], %608 {strides = array<i32>} : memref<8x8x16xf32, #tpu.memory_space<vmem>>, vector<1x8x16xf32>,
    %c6_i32 = arith.constant 6 : i32
    %c7_i32_122 = arith.constant 7 : i32
    %609 = arith.subi %c7_i32_122, %c6_i32 : i32
    %610 = vector.broadcast %c6_i32 : i32 to vector<8x1xi32>
    %611 = arith.cmpi slt, %610, %0 : vector<8x1xi32>
    %612 = arith.extui %611 : vector<8x1xi1> to vector<8x1xi32>
    %613 = arith.sitofp %612 : vector<8x1xi32> to vector<8x1xf32>
    %614 = vector.broadcast %609 : i32 to vector<8x1xi32>
    %615 = arith.cmpi slt, %614, %0 : vector<8x1xi32>
    %616 = arith.extui %615 : vector<8x1xi1> to vector<8x1xi32>
    %617 = arith.sitofp %616 : vector<8x1xi32> to vector<8x1xf32>
    %618 = arith.index_cast %c6_i32 : i32 to index
    %c0_123 = arith.constant 0 : index
    %c0_124 = arith.constant 0 : index
    %619 = vector.load %arg14[%618, %c0_123, %c0_124] : memref<8x8x128xf32, #tpu.memory_space<vmem>>, vector<1x8x128xf32>
    %620 = vector.shape_cast %619 : vector<1x8x128xf32> to vector<8x128xf32>
    %621 = arith.index_cast %609 : i32 to index
    %c0_125 = arith.constant 0 : index
    %c0_126 = arith.constant 0 : index
    %622 = vector.load %arg14[%621, %c0_125, %c0_126] : memref<8x8x128xf32, #tpu.memory_space<vmem>>, vector<1x8x128xf32>
    %623 = vector.shape_cast %622 : vector<1x8x128xf32> to vector<8x128xf32>
    %624 = vector.extract_strided_slice %620 {offsets = [0, 0], sizes = [8, 64], strides = [1, 1]} : vector<8x128xf32> to vector<8x64xf32>
    %cst_127 = arith.constant dense<0.000000e+00> : vector<8x64xf32>
    %625 = tpu.matmul %584, %1, %cst_127 {dimension_numbers = #tpu.dot_dimension_numbers<[1], [0], [0], [1], [0, 0, 1, 1], [], []>} : vector<8x16xf32>, vector<16x64xf32>, vector<8x64xf32> -> vector<8x64xf32>
    %626 = arith.addf %624, %625 : vector<8x64xf32>
    %627 = vector.extract_strided_slice %623 {offsets = [0, 64], sizes = [8, 64], strides = [1, 1]} : vector<8x128xf32> to vector<8x64xf32>
    %cst_128 = arith.constant dense<0.000000e+00> : vector<8x64xf32>
    %628 = tpu.matmul %592, %2, %cst_128 {dimension_numbers = #tpu.dot_dimension_numbers<[1], [0], [0], [1], [0, 0, 1, 1], [], []>} : vector<8x16xf32>, vector<16x64xf32>, vector<8x64xf32> -> vector<8x64xf32>
    %629 = arith.addf %627, %628 : vector<8x64xf32>
    %630 = vector.extract_strided_slice %626 {offsets = [0, 0], sizes = [8, 16], strides = [1, 1]} : vector<8x64xf32> to vector<8x16xf32>
    %631 = arith.negf %630 : vector<8x16xf32>
    %632 = math.exp %631 : vector<8x16xf32>
    %cst_129 = arith.constant 1.000000e+00 : f32
    %633 = vector.broadcast %cst_129 : f32 to vector<8x16xf32>
    %634 = arith.addf %633, %632 : vector<8x16xf32>
    %635 = arith.divf %633, %634 : vector<8x16xf32>
    %636 = vector.extract_strided_slice %626 {offsets = [0, 16], sizes = [8, 16], strides = [1, 1]} : vector<8x64xf32> to vector<8x16xf32>
    %637 = arith.negf %636 : vector<8x16xf32>
    %638 = math.exp %637 : vector<8x16xf32>
    %cst_130 = arith.constant 1.000000e+00 : f32
    %639 = vector.broadcast %cst_130 : f32 to vector<8x16xf32>
    %640 = arith.addf %639, %638 : vector<8x16xf32>
    %641 = arith.divf %639, %640 : vector<8x16xf32>
    %642 = vector.extract_strided_slice %626 {offsets = [0, 32], sizes = [8, 16], strides = [1, 1]} : vector<8x64xf32> to vector<8x16xf32>
    %643 = math.tanh %642 : vector<8x16xf32>
    %644 = vector.extract_strided_slice %626 {offsets = [0, 48], sizes = [8, 16], strides = [1, 1]} : vector<8x64xf32> to vector<8x16xf32>
    %645 = arith.negf %644 : vector<8x16xf32>
    %646 = math.exp %645 : vector<8x16xf32>
    %cst_131 = arith.constant 1.000000e+00 : f32
    %647 = vector.broadcast %cst_131 : f32 to vector<8x16xf32>
    %648 = arith.addf %647, %646 : vector<8x16xf32>
    %649 = arith.divf %647, %648 : vector<8x16xf32>
    %650 = arith.mulf %641, %588 : vector<8x16xf32>
    %651 = arith.mulf %635, %643 : vector<8x16xf32>
    %652 = arith.addf %650, %651 : vector<8x16xf32>
    %653 = math.tanh %652 : vector<8x16xf32>
    %654 = arith.mulf %649, %653 : vector<8x16xf32>
    %655 = vector.extract_strided_slice %629 {offsets = [0, 0], sizes = [8, 16], strides = [1, 1]} : vector<8x64xf32> to vector<8x16xf32>
    %656 = arith.negf %655 : vector<8x16xf32>
    %657 = math.exp %656 : vector<8x16xf32>
    %cst_132 = arith.constant 1.000000e+00 : f32
    %658 = vector.broadcast %cst_132 : f32 to vector<8x16xf32>
    %659 = arith.addf %658, %657 : vector<8x16xf32>
    %660 = arith.divf %658, %659 : vector<8x16xf32>
    %661 = vector.extract_strided_slice %629 {offsets = [0, 16], sizes = [8, 16], strides = [1, 1]} : vector<8x64xf32> to vector<8x16xf32>
    %662 = arith.negf %661 : vector<8x16xf32>
    %663 = math.exp %662 : vector<8x16xf32>
    %cst_133 = arith.constant 1.000000e+00 : f32
    %664 = vector.broadcast %cst_133 : f32 to vector<8x16xf32>
    %665 = arith.addf %664, %663 : vector<8x16xf32>
    %666 = arith.divf %664, %665 : vector<8x16xf32>
    %667 = vector.extract_strided_slice %629 {offsets = [0, 32], sizes = [8, 16], strides = [1, 1]} : vector<8x64xf32> to vector<8x16xf32>
    %668 = math.tanh %667 : vector<8x16xf32>
    %669 = vector.extract_strided_slice %629 {offsets = [0, 48], sizes = [8, 16], strides = [1, 1]} : vector<8x64xf32> to vector<8x16xf32>
    %670 = arith.negf %669 : vector<8x16xf32>
    %671 = math.exp %670 : vector<8x16xf32>
    %cst_134 = arith.constant 1.000000e+00 : f32
    %672 = vector.broadcast %cst_134 : f32 to vector<8x16xf32>
    %673 = arith.addf %672, %671 : vector<8x16xf32>
    %674 = arith.divf %672, %673 : vector<8x16xf32>
    %675 = arith.mulf %666, %596 : vector<8x16xf32>
    %676 = arith.mulf %660, %668 : vector<8x16xf32>
    %677 = arith.addf %675, %676 : vector<8x16xf32>
    %678 = math.tanh %677 : vector<8x16xf32>
    %679 = arith.mulf %674, %678 : vector<8x16xf32>
    %680 = arith.subf %654, %584 : vector<8x16xf32>
    %681 = vector.broadcast %613 : vector<8x1xf32> to vector<8x16xf32>
    %682 = arith.mulf %681, %680 : vector<8x16xf32>
    %683 = arith.addf %584, %682 : vector<8x16xf32>
    %684 = arith.subf %652, %588 : vector<8x16xf32>
    %685 = vector.broadcast %613 : vector<8x1xf32> to vector<8x16xf32>
    %686 = arith.mulf %685, %684 : vector<8x16xf32>
    %687 = arith.addf %588, %686 : vector<8x16xf32>
    %688 = arith.subf %679, %592 : vector<8x16xf32>
    %689 = vector.broadcast %617 : vector<8x1xf32> to vector<8x16xf32>
    %690 = arith.mulf %689, %688 : vector<8x16xf32>
    %691 = arith.addf %592, %690 : vector<8x16xf32>
    %692 = arith.subf %677, %596 : vector<8x16xf32>
    %693 = vector.broadcast %617 : vector<8x1xf32> to vector<8x16xf32>
    %694 = arith.mulf %693, %692 : vector<8x16xf32>
    %695 = arith.addf %596, %694 : vector<8x16xf32>
    %696 = vector.broadcast %613 : vector<8x1xf32> to vector<8x16xf32>
    %697 = arith.mulf %696, %683 : vector<8x16xf32>
    %698 = arith.index_cast %c6_i32 : i32 to index
    %c0_135 = arith.constant 0 : index
    %c0_136 = arith.constant 0 : index
    %699 = vector.load %arg15[%698, %c0_135, %c0_136] : memref<8x8x16xf32, #tpu.memory_space<vmem>>, vector<1x8x16xf32>
    %700 = vector.shape_cast %699 : vector<1x8x16xf32> to vector<8x16xf32>
    %701 = vector.shape_cast %697 : vector<8x16xf32> to vector<1x8x16xf32>
    tpu.vector_store %arg15[%698, %c0_135, %c0_136], %701 {strides = array<i32>} : memref<8x8x16xf32, #tpu.memory_space<vmem>>, vector<1x8x16xf32>,
    %702 = vector.broadcast %617 : vector<8x1xf32> to vector<8x16xf32>
    %703 = arith.mulf %702, %691 : vector<8x16xf32>
    %704 = arith.index_cast %609 : i32 to index
    %c0_137 = arith.constant 0 : index
    %c0_138 = arith.constant 0 : index
    %705 = vector.load %arg16[%704, %c0_137, %c0_138] : memref<8x8x16xf32, #tpu.memory_space<vmem>>, vector<1x8x16xf32>
    %706 = vector.shape_cast %705 : vector<1x8x16xf32> to vector<8x16xf32>
    %707 = vector.shape_cast %703 : vector<8x16xf32> to vector<1x8x16xf32>
    tpu.vector_store %arg16[%704, %c0_137, %c0_138], %707 {strides = array<i32>} : memref<8x8x16xf32, #tpu.memory_space<vmem>>, vector<1x8x16xf32>,
    %c7_i32_139 = arith.constant 7 : i32
    %c7_i32_140 = arith.constant 7 : i32
    %708 = arith.subi %c7_i32_140, %c7_i32_139 : i32
    %709 = vector.broadcast %c7_i32_139 : i32 to vector<8x1xi32>
    %710 = arith.cmpi slt, %709, %0 : vector<8x1xi32>
    %711 = arith.extui %710 : vector<8x1xi1> to vector<8x1xi32>
    %712 = arith.sitofp %711 : vector<8x1xi32> to vector<8x1xf32>
    %713 = vector.broadcast %708 : i32 to vector<8x1xi32>
    %714 = arith.cmpi slt, %713, %0 : vector<8x1xi32>
    %715 = arith.extui %714 : vector<8x1xi1> to vector<8x1xi32>
    %716 = arith.sitofp %715 : vector<8x1xi32> to vector<8x1xf32>
    %717 = arith.index_cast %c7_i32_139 : i32 to index
    %c0_141 = arith.constant 0 : index
    %c0_142 = arith.constant 0 : index
    %718 = vector.load %arg14[%717, %c0_141, %c0_142] : memref<8x8x128xf32, #tpu.memory_space<vmem>>, vector<1x8x128xf32>
    %719 = vector.shape_cast %718 : vector<1x8x128xf32> to vector<8x128xf32>
    %720 = arith.index_cast %708 : i32 to index
    %c0_143 = arith.constant 0 : index
    %c0_144 = arith.constant 0 : index
    %721 = vector.load %arg14[%720, %c0_143, %c0_144] : memref<8x8x128xf32, #tpu.memory_space<vmem>>, vector<1x8x128xf32>
    %722 = vector.shape_cast %721 : vector<1x8x128xf32> to vector<8x128xf32>
    %723 = vector.extract_strided_slice %719 {offsets = [0, 0], sizes = [8, 64], strides = [1, 1]} : vector<8x128xf32> to vector<8x64xf32>
    %cst_145 = arith.constant dense<0.000000e+00> : vector<8x64xf32>
    %724 = tpu.matmul %683, %1, %cst_145 {dimension_numbers = #tpu.dot_dimension_numbers<[1], [0], [0], [1], [0, 0, 1, 1], [], []>} : vector<8x16xf32>, vector<16x64xf32>, vector<8x64xf32> -> vector<8x64xf32>
    %725 = arith.addf %723, %724 : vector<8x64xf32>
    %726 = vector.extract_strided_slice %722 {offsets = [0, 64], sizes = [8, 64], strides = [1, 1]} : vector<8x128xf32> to vector<8x64xf32>
    %cst_146 = arith.constant dense<0.000000e+00> : vector<8x64xf32>
    %727 = tpu.matmul %691, %2, %cst_146 {dimension_numbers = #tpu.dot_dimension_numbers<[1], [0], [0], [1], [0, 0, 1, 1], [], []>} : vector<8x16xf32>, vector<16x64xf32>, vector<8x64xf32> -> vector<8x64xf32>
    %728 = arith.addf %726, %727 : vector<8x64xf32>
    %729 = vector.extract_strided_slice %725 {offsets = [0, 0], sizes = [8, 16], strides = [1, 1]} : vector<8x64xf32> to vector<8x16xf32>
    %730 = arith.negf %729 : vector<8x16xf32>
    %731 = math.exp %730 : vector<8x16xf32>
    %cst_147 = arith.constant 1.000000e+00 : f32
    %732 = vector.broadcast %cst_147 : f32 to vector<8x16xf32>
    %733 = arith.addf %732, %731 : vector<8x16xf32>
    %734 = arith.divf %732, %733 : vector<8x16xf32>
    %735 = vector.extract_strided_slice %725 {offsets = [0, 16], sizes = [8, 16], strides = [1, 1]} : vector<8x64xf32> to vector<8x16xf32>
    %736 = arith.negf %735 : vector<8x16xf32>
    %737 = math.exp %736 : vector<8x16xf32>
    %cst_148 = arith.constant 1.000000e+00 : f32
    %738 = vector.broadcast %cst_148 : f32 to vector<8x16xf32>
    %739 = arith.addf %738, %737 : vector<8x16xf32>
    %740 = arith.divf %738, %739 : vector<8x16xf32>
    %741 = vector.extract_strided_slice %725 {offsets = [0, 32], sizes = [8, 16], strides = [1, 1]} : vector<8x64xf32> to vector<8x16xf32>
    %742 = math.tanh %741 : vector<8x16xf32>
    %743 = vector.extract_strided_slice %725 {offsets = [0, 48], sizes = [8, 16], strides = [1, 1]} : vector<8x64xf32> to vector<8x16xf32>
    %744 = arith.negf %743 : vector<8x16xf32>
    %745 = math.exp %744 : vector<8x16xf32>
    %cst_149 = arith.constant 1.000000e+00 : f32
    %746 = vector.broadcast %cst_149 : f32 to vector<8x16xf32>
    %747 = arith.addf %746, %745 : vector<8x16xf32>
    %748 = arith.divf %746, %747 : vector<8x16xf32>
    %749 = arith.mulf %740, %687 : vector<8x16xf32>
    %750 = arith.mulf %734, %742 : vector<8x16xf32>
    %751 = arith.addf %749, %750 : vector<8x16xf32>
    %752 = math.tanh %751 : vector<8x16xf32>
    %753 = arith.mulf %748, %752 : vector<8x16xf32>
    %754 = vector.extract_strided_slice %728 {offsets = [0, 0], sizes = [8, 16], strides = [1, 1]} : vector<8x64xf32> to vector<8x16xf32>
    %755 = arith.negf %754 : vector<8x16xf32>
    %756 = math.exp %755 : vector<8x16xf32>
    %cst_150 = arith.constant 1.000000e+00 : f32
    %757 = vector.broadcast %cst_150 : f32 to vector<8x16xf32>
    %758 = arith.addf %757, %756 : vector<8x16xf32>
    %759 = arith.divf %757, %758 : vector<8x16xf32>
    %760 = vector.extract_strided_slice %728 {offsets = [0, 16], sizes = [8, 16], strides = [1, 1]} : vector<8x64xf32> to vector<8x16xf32>
    %761 = arith.negf %760 : vector<8x16xf32>
    %762 = math.exp %761 : vector<8x16xf32>
    %cst_151 = arith.constant 1.000000e+00 : f32
    %763 = vector.broadcast %cst_151 : f32 to vector<8x16xf32>
    %764 = arith.addf %763, %762 : vector<8x16xf32>
    %765 = arith.divf %763, %764 : vector<8x16xf32>
    %766 = vector.extract_strided_slice %728 {offsets = [0, 32], sizes = [8, 16], strides = [1, 1]} : vector<8x64xf32> to vector<8x16xf32>
    %767 = math.tanh %766 : vector<8x16xf32>
    %768 = vector.extract_strided_slice %728 {offsets = [0, 48], sizes = [8, 16], strides = [1, 1]} : vector<8x64xf32> to vector<8x16xf32>
    %769 = arith.negf %768 : vector<8x16xf32>
    %770 = math.exp %769 : vector<8x16xf32>
    %cst_152 = arith.constant 1.000000e+00 : f32
    %771 = vector.broadcast %cst_152 : f32 to vector<8x16xf32>
    %772 = arith.addf %771, %770 : vector<8x16xf32>
    %773 = arith.divf %771, %772 : vector<8x16xf32>
    %774 = arith.mulf %765, %695 : vector<8x16xf32>
    %775 = arith.mulf %759, %767 : vector<8x16xf32>
    %776 = arith.addf %774, %775 : vector<8x16xf32>
    %777 = math.tanh %776 : vector<8x16xf32>
    %778 = arith.mulf %773, %777 : vector<8x16xf32>
    %779 = arith.subf %753, %683 : vector<8x16xf32>
    %780 = vector.broadcast %712 : vector<8x1xf32> to vector<8x16xf32>
    %781 = arith.mulf %780, %779 : vector<8x16xf32>
    %782 = arith.addf %683, %781 : vector<8x16xf32>
    %783 = arith.subf %751, %687 : vector<8x16xf32>
    %784 = vector.broadcast %712 : vector<8x1xf32> to vector<8x16xf32>
    %785 = arith.mulf %784, %783 : vector<8x16xf32>
    %786 = arith.addf %687, %785 : vector<8x16xf32>
    %787 = arith.subf %778, %691 : vector<8x16xf32>
    %788 = vector.broadcast %716 : vector<8x1xf32> to vector<8x16xf32>
    %789 = arith.mulf %788, %787 : vector<8x16xf32>
    %790 = arith.addf %691, %789 : vector<8x16xf32>
    %791 = arith.subf %776, %695 : vector<8x16xf32>
    %792 = vector.broadcast %716 : vector<8x1xf32> to vector<8x16xf32>
    %793 = arith.mulf %792, %791 : vector<8x16xf32>
    %794 = arith.addf %695, %793 : vector<8x16xf32>
    %795 = vector.broadcast %712 : vector<8x1xf32> to vector<8x16xf32>
    %796 = arith.mulf %795, %782 : vector<8x16xf32>
    %797 = arith.index_cast %c7_i32_139 : i32 to index
    %c0_153 = arith.constant 0 : index
    %c0_154 = arith.constant 0 : index
    %798 = vector.load %arg15[%797, %c0_153, %c0_154] : memref<8x8x16xf32, #tpu.memory_space<vmem>>, vector<1x8x16xf32>
    %799 = vector.shape_cast %798 : vector<1x8x16xf32> to vector<8x16xf32>
    %800 = vector.shape_cast %796 : vector<8x16xf32> to vector<1x8x16xf32>
    tpu.vector_store %arg15[%797, %c0_153, %c0_154], %800 {strides = array<i32>} : memref<8x8x16xf32, #tpu.memory_space<vmem>>, vector<1x8x16xf32>,
    %801 = vector.broadcast %716 : vector<8x1xf32> to vector<8x16xf32>
    %802 = arith.mulf %801, %790 : vector<8x16xf32>
    %803 = arith.index_cast %708 : i32 to index
    %c0_155 = arith.constant 0 : index
    %c0_156 = arith.constant 0 : index
    %804 = vector.load %arg16[%803, %c0_155, %c0_156] : memref<8x8x16xf32, #tpu.memory_space<vmem>>, vector<1x8x16xf32>
    %805 = vector.shape_cast %804 : vector<1x8x16xf32> to vector<8x16xf32>
    %806 = vector.shape_cast %802 : vector<8x16xf32> to vector<1x8x16xf32>
    tpu.vector_store %arg16[%803, %c0_155, %c0_156], %806 {strides = array<i32>} : memref<8x8x16xf32, #tpu.memory_space<vmem>>, vector<1x8x16xf32>,
    %c8_i32 = arith.constant 8 : i32
    %c0_157 = arith.constant 0 : index
    %c0_158 = arith.constant 0 : index
    %c0_159 = arith.constant 0 : index
    %807 = vector.load %arg15[%c0_157, %c0_158, %c0_159] : memref<8x8x16xf32, #tpu.memory_space<vmem>>, vector<8x8x16xf32>
    %808 = vector.shape_cast %807 : vector<8x8x16xf32> to vector<64x16xf32>
    %c0_160 = arith.constant 0 : index
    %c0_161 = arith.constant 0 : index
    %c0_162 = arith.constant 0 : index
    %809 = vector.load %arg16[%c0_160, %c0_161, %c0_162] : memref<8x8x16xf32, #tpu.memory_space<vmem>>, vector<8x8x16xf32>
    %810 = vector.shape_cast %809 : vector<8x8x16xf32> to vector<64x16xf32>
    %811 = tpu.concatenate %808, %810 in 1 : vector<64x16xf32>, vector<64x16xf32> -> vector<64x32xf32>
    %c0_163 = arith.constant 0 : index
    %c0_164 = arith.constant 0 : index
    %812 = vector.load %arg8[%c0_163, %c0_164] : memref<32x5xf32, #tpu.memory_space<vmem>>, vector<32x5xf32>
    %cst_165 = arith.constant dense<0.000000e+00> : vector<64x5xf32>
    %813 = tpu.matmul %811, %812, %cst_165 {dimension_numbers = #tpu.dot_dimension_numbers<[1], [0], [0], [1], [0, 0, 1, 1], [], []>} : vector<64x32xf32>, vector<32x5xf32>, vector<64x5xf32> -> vector<64x5xf32>
    %c0_166 = arith.constant 0 : index
    %c0_167 = arith.constant 0 : index
    %814 = vector.load %arg9[%c0_166, %c0_167] : memref<1x5xf32, #tpu.memory_space<vmem>>, vector<1x5xf32>
    %815 = vector.broadcast %814 : vector<1x5xf32> to vector<64x5xf32>
    %816 = arith.addf %813, %815 : vector<64x5xf32>
    %817 = vector.shape_cast %816 : vector<64x5xf32> to vector<8x8x5xf32>
    %c0_168 = arith.constant 0 : index
    %c0_169 = arith.constant 0 : index
    %c0_170 = arith.constant 0 : index
    %818 = vector.load %arg17[%c0_168, %c0_169, %c0_170] : memref<8x8x5xf32, #tpu.memory_space<vmem>>, vector<8x8x5xf32>
    tpu.vector_store %arg17[%c0_168, %c0_169, %c0_170], %817 {strides = array<i32>} : memref<8x8x5xf32, #tpu.memory_space<vmem>>, vector<8x8x5xf32>,
    %c0_171 = arith.constant 0 : index
    %c0_172 = arith.constant 0 : index
    %819 = vector.load %arg2[%c0_171, %c0_172] : memref<64x5xf32, #tpu.memory_space<vmem>>, vector<64x5xf32>
    %820 = vector.extract_strided_slice %819 {offsets = [0, 0], sizes = [8, 5], strides = [1, 1]} : vector<64x5xf32> to vector<8x5xf32>
    %821 = vector.broadcast %4 : vector<1x5xf32> to vector<8x5xf32>
    %822 = arith.mulf %820, %821 : vector<8x5xf32>
    %823 = vector.shape_cast %822 : vector<8x5xf32> to vector<1x8x5xf32>
    %cst_173 = arith.constant dense<0.000000e+00> : vector<1xf32>
    %824 = vector.multi_reduction <add>, %823, %cst_173 [1, 2] : vector<1x8x5xf32> to vector<1xf32>
    %825 = vector.shape_cast %824 : vector<1xf32> to vector<1x1x1xf32>
    %826 = vector.extract %825[0, 0, 0] : f32 from vector<1x1x1xf32>
    %827 = vector.broadcast %826 : f32 to vector<1x1xf32>
    %828 = arith.mulf %816, %819 : vector<64x5xf32>
    %829 = vector.shape_cast %828 : vector<64x5xf32> to vector<1x64x5xf32>
    %cst_174 = arith.constant dense<0.000000e+00> : vector<1xf32>
    %830 = vector.multi_reduction <add>, %829, %cst_174 [1, 2] : vector<1x64x5xf32> to vector<1xf32>
    %831 = vector.shape_cast %830 : vector<1xf32> to vector<1x1x1xf32>
    %832 = vector.extract %831[0, 0, 0] : f32 from vector<1x1x1xf32>
    %833 = vector.broadcast %832 : f32 to vector<1x1xf32>
    %834 = vector.extract_strided_slice %819 {offsets = [0, 0], sizes = [56, 5], strides = [1, 1]} : vector<64x5xf32> to vector<56x5xf32>
    %835 = vector.extract_strided_slice %819 {offsets = [8, 0], sizes = [56, 5], strides = [1, 1]} : vector<64x5xf32> to vector<56x5xf32>
    %cst_175 = arith.constant dense<0.000000e+00> : vector<56x5xf32>
    %836 = tpu.matmul %834, %3, %cst_175 {dimension_numbers = #tpu.dot_dimension_numbers<[1], [0], [0], [1], [0, 0, 1, 1], [], []>} : vector<56x5xf32>, vector<5x5xf32>, vector<56x5xf32> -> vector<56x5xf32>
    %837 = arith.mulf %836, %835 : vector<56x5xf32>
    %838 = vector.shape_cast %837 : vector<56x5xf32> to vector<1x56x5xf32>
    %cst_176 = arith.constant dense<0.000000e+00> : vector<1xf32>
    %839 = vector.multi_reduction <add>, %838, %cst_176 [1, 2] : vector<1x56x5xf32> to vector<1xf32>
    %840 = vector.shape_cast %839 : vector<1xf32> to vector<1x1x1xf32>
    %841 = vector.extract %840[0, 0, 0] : f32 from vector<1x1x1xf32>
    %842 = vector.broadcast %841 : f32 to vector<1x1xf32>
    %c0_177 = arith.constant 0 : index
    %c0_178 = arith.constant 0 : index
    %843 = vector.load %arg3[%c0_177, %c0_178] : memref<64x5xf32, #tpu.memory_space<vmem>>, vector<64x5xf32>
    %844 = vector.broadcast %5 : vector<1x5xf32> to vector<64x5xf32>
    %845 = arith.mulf %843, %844 : vector<64x5xf32>
    %846 = vector.shape_cast %845 : vector<64x5xf32> to vector<1x64x5xf32>
    %cst_179 = arith.constant dense<0.000000e+00> : vector<1xf32>
    %847 = vector.multi_reduction <add>, %846, %cst_179 [1, 2] : vector<1x64x5xf32> to vector<1xf32>
    %848 = vector.shape_cast %847 : vector<1xf32> to vector<1x1x1xf32>
    %849 = vector.extract %848[0, 0, 0] : f32 from vector<1x1x1xf32>
    %850 = vector.broadcast %849 : f32 to vector<1x1xf32>
    %851 = arith.addf %827, %833 : vector<1x1xf32>
    %852 = arith.addf %851, %842 : vector<1x1xf32>
    %853 = arith.addf %852, %850 : vector<1x1xf32>
    %c0_i32_180 = arith.constant 0 : i32
    %854 = vector.broadcast %c0_i32_180 : i32 to vector<8x1xi32>
    %855 = arith.cmpi sgt, %0, %854 : vector<8x1xi32>
    %856 = arith.extui %855 : vector<8x1xi1> to vector<8x1xi32>
    %857 = arith.sitofp %856 : vector<8x1xi32> to vector<8x1xf32>
    %cst_181 = arith.constant dense<0xFF800000> : vector<5xf32>
    %858 = vector.multi_reduction <maximumf>, %3, %cst_181 [0] : vector<5x5xf32> to vector<5xf32>
    %859 = vector.shape_cast %858 : vector<5xf32> to vector<1x5xf32>
    %860 = vector.broadcast %859 : vector<1x5xf32> to vector<5x5xf32>
    %861 = arith.subf %3, %860 : vector<5x5xf32>
    %862 = math.exp %861 : vector<5x5xf32>
    %c0_182 = arith.constant 0 : index
    %c0_183 = arith.constant 0 : index
    %c0_184 = arith.constant 0 : index
    %863 = vector.load %arg17[%c0_182, %c0_183, %c0_184] : memref<8x8x5xf32, #tpu.memory_space<vmem>>, vector<1x8x5xf32>
    %864 = vector.shape_cast %863 : vector<1x8x5xf32> to vector<8x5xf32>
    %865 = vector.broadcast %4 : vector<1x5xf32> to vector<8x5xf32>
    %866 = arith.addf %865, %864 : vector<8x5xf32>
    %c1_i32_185 = arith.constant 1 : i32
    %867 = vector.broadcast %c1_i32_185 : i32 to vector<8x1xi32>
    %868 = arith.cmpi slt, %867, %0 : vector<8x1xi32>
    %869 = arith.extui %868 : vector<8x1xi1> to vector<8x1xi32>
    %870 = arith.sitofp %869 : vector<8x1xi32> to vector<8x1xf32>
    %cst_186 = arith.constant dense<0xFF800000> : vector<8xf32>
    %871 = vector.multi_reduction <maximumf>, %866, %cst_186 [1] : vector<8x5xf32> to vector<8xf32>
    %872 = vector.shape_cast %871 : vector<8xf32> to vector<8x1xf32>
    %873 = vector.broadcast %872 : vector<8x1xf32> to vector<8x5xf32>
    %874 = arith.subf %866, %873 : vector<8x5xf32>
    %875 = math.exp %874 : vector<8x5xf32>
    %cst_187 = arith.constant dense<0.000000e+00> : vector<8x5xf32>
    %876 = tpu.matmul %875, %862, %cst_187 {dimension_numbers = #tpu.dot_dimension_numbers<[1], [0], [0], [1], [0, 0, 1, 1], [], []>} : vector<8x5xf32>, vector<5x5xf32>, vector<8x5xf32> -> vector<8x5xf32>
    %877 = vector.broadcast %872 : vector<8x1xf32> to vector<8x5xf32>
    %878 = vector.broadcast %859 : vector<1x5xf32> to vector<8x5xf32>
    %879 = arith.addf %877, %878 : vector<8x5xf32>
    %880 = math.log %876 : vector<8x5xf32>
    %881 = arith.addf %879, %880 : vector<8x5xf32>
    %882 = arith.index_cast %c1_i32_185 : i32 to index
    %c0_188 = arith.constant 0 : index
    %c0_189 = arith.constant 0 : index
    %883 = vector.load %arg17[%882, %c0_188, %c0_189] : memref<8x8x5xf32, #tpu.memory_space<vmem>>, vector<1x8x5xf32>
    %884 = vector.shape_cast %883 : vector<1x8x5xf32> to vector<8x5xf32>
    %885 = arith.addf %881, %884 : vector<8x5xf32>
    %cst_190 = arith.constant 5.000000e-01 : f32
    %886 = vector.broadcast %cst_190 : f32 to vector<8x1xf32>
    %887 = arith.cmpf ogt, %870, %886 : vector<8x1xf32>
    %888 = vector.shape_cast %887 : vector<8x1xi1> to vector<8x1xi1>
    %889 = vector.broadcast %888 : vector<8x1xi1> to vector<8x5xi1>
    %890 = arith.select %889, %885, %866 : vector<8x5xi1>, vector<8x5xf32>
    %c2_i32_191 = arith.constant 2 : i32
    %891 = vector.broadcast %c2_i32_191 : i32 to vector<8x1xi32>
    %892 = arith.cmpi slt, %891, %0 : vector<8x1xi32>
    %893 = arith.extui %892 : vector<8x1xi1> to vector<8x1xi32>
    %894 = arith.sitofp %893 : vector<8x1xi32> to vector<8x1xf32>
    %cst_192 = arith.constant dense<0xFF800000> : vector<8xf32>
    %895 = vector.multi_reduction <maximumf>, %890, %cst_192 [1] : vector<8x5xf32> to vector<8xf32>
    %896 = vector.shape_cast %895 : vector<8xf32> to vector<8x1xf32>
    %897 = vector.broadcast %896 : vector<8x1xf32> to vector<8x5xf32>
    %898 = arith.subf %890, %897 : vector<8x5xf32>
    %899 = math.exp %898 : vector<8x5xf32>
    %cst_193 = arith.constant dense<0.000000e+00> : vector<8x5xf32>
    %900 = tpu.matmul %899, %862, %cst_193 {dimension_numbers = #tpu.dot_dimension_numbers<[1], [0], [0], [1], [0, 0, 1, 1], [], []>} : vector<8x5xf32>, vector<5x5xf32>, vector<8x5xf32> -> vector<8x5xf32>
    %901 = vector.broadcast %896 : vector<8x1xf32> to vector<8x5xf32>
    %902 = vector.broadcast %859 : vector<1x5xf32> to vector<8x5xf32>
    %903 = arith.addf %901, %902 : vector<8x5xf32>
    %904 = math.log %900 : vector<8x5xf32>
    %905 = arith.addf %903, %904 : vector<8x5xf32>
    %906 = arith.index_cast %c2_i32_191 : i32 to index
    %c0_194 = arith.constant 0 : index
    %c0_195 = arith.constant 0 : index
    %907 = vector.load %arg17[%906, %c0_194, %c0_195] : memref<8x8x5xf32, #tpu.memory_space<vmem>>, vector<1x8x5xf32>
    %908 = vector.shape_cast %907 : vector<1x8x5xf32> to vector<8x5xf32>
    %909 = arith.addf %905, %908 : vector<8x5xf32>
    %cst_196 = arith.constant 5.000000e-01 : f32
    %910 = vector.broadcast %cst_196 : f32 to vector<8x1xf32>
    %911 = arith.cmpf ogt, %894, %910 : vector<8x1xf32>
    %912 = vector.shape_cast %911 : vector<8x1xi1> to vector<8x1xi1>
    %913 = vector.broadcast %912 : vector<8x1xi1> to vector<8x5xi1>
    %914 = arith.select %913, %909, %890 : vector<8x5xi1>, vector<8x5xf32>
    %c3_i32_197 = arith.constant 3 : i32
    %915 = vector.broadcast %c3_i32_197 : i32 to vector<8x1xi32>
    %916 = arith.cmpi slt, %915, %0 : vector<8x1xi32>
    %917 = arith.extui %916 : vector<8x1xi1> to vector<8x1xi32>
    %918 = arith.sitofp %917 : vector<8x1xi32> to vector<8x1xf32>
    %cst_198 = arith.constant dense<0xFF800000> : vector<8xf32>
    %919 = vector.multi_reduction <maximumf>, %914, %cst_198 [1] : vector<8x5xf32> to vector<8xf32>
    %920 = vector.shape_cast %919 : vector<8xf32> to vector<8x1xf32>
    %921 = vector.broadcast %920 : vector<8x1xf32> to vector<8x5xf32>
    %922 = arith.subf %914, %921 : vector<8x5xf32>
    %923 = math.exp %922 : vector<8x5xf32>
    %cst_199 = arith.constant dense<0.000000e+00> : vector<8x5xf32>
    %924 = tpu.matmul %923, %862, %cst_199 {dimension_numbers = #tpu.dot_dimension_numbers<[1], [0], [0], [1], [0, 0, 1, 1], [], []>} : vector<8x5xf32>, vector<5x5xf32>, vector<8x5xf32> -> vector<8x5xf32>
    %925 = vector.broadcast %920 : vector<8x1xf32> to vector<8x5xf32>
    %926 = vector.broadcast %859 : vector<1x5xf32> to vector<8x5xf32>
    %927 = arith.addf %925, %926 : vector<8x5xf32>
    %928 = math.log %924 : vector<8x5xf32>
    %929 = arith.addf %927, %928 : vector<8x5xf32>
    %930 = arith.index_cast %c3_i32_197 : i32 to index
    %c0_200 = arith.constant 0 : index
    %c0_201 = arith.constant 0 : index
    %931 = vector.load %arg17[%930, %c0_200, %c0_201] : memref<8x8x5xf32, #tpu.memory_space<vmem>>, vector<1x8x5xf32>
    %932 = vector.shape_cast %931 : vector<1x8x5xf32> to vector<8x5xf32>
    %933 = arith.addf %929, %932 : vector<8x5xf32>
    %cst_202 = arith.constant 5.000000e-01 : f32
    %934 = vector.broadcast %cst_202 : f32 to vector<8x1xf32>
    %935 = arith.cmpf ogt, %918, %934 : vector<8x1xf32>
    %936 = vector.shape_cast %935 : vector<8x1xi1> to vector<8x1xi1>
    %937 = vector.broadcast %936 : vector<8x1xi1> to vector<8x5xi1>
    %938 = arith.select %937, %933, %914 : vector<8x5xi1>, vector<8x5xf32>
    %c4_i32_203 = arith.constant 4 : i32
    %939 = vector.broadcast %c4_i32_203 : i32 to vector<8x1xi32>
    %940 = arith.cmpi slt, %939, %0 : vector<8x1xi32>
    %941 = arith.extui %940 : vector<8x1xi1> to vector<8x1xi32>
    %942 = arith.sitofp %941 : vector<8x1xi32> to vector<8x1xf32>
    %cst_204 = arith.constant dense<0xFF800000> : vector<8xf32>
    %943 = vector.multi_reduction <maximumf>, %938, %cst_204 [1] : vector<8x5xf32> to vector<8xf32>
    %944 = vector.shape_cast %943 : vector<8xf32> to vector<8x1xf32>
    %945 = vector.broadcast %944 : vector<8x1xf32> to vector<8x5xf32>
    %946 = arith.subf %938, %945 : vector<8x5xf32>
    %947 = math.exp %946 : vector<8x5xf32>
    %cst_205 = arith.constant dense<0.000000e+00> : vector<8x5xf32>
    %948 = tpu.matmul %947, %862, %cst_205 {dimension_numbers = #tpu.dot_dimension_numbers<[1], [0], [0], [1], [0, 0, 1, 1], [], []>} : vector<8x5xf32>, vector<5x5xf32>, vector<8x5xf32> -> vector<8x5xf32>
    %949 = vector.broadcast %944 : vector<8x1xf32> to vector<8x5xf32>
    %950 = vector.broadcast %859 : vector<1x5xf32> to vector<8x5xf32>
    %951 = arith.addf %949, %950 : vector<8x5xf32>
    %952 = math.log %948 : vector<8x5xf32>
    %953 = arith.addf %951, %952 : vector<8x5xf32>
    %954 = arith.index_cast %c4_i32_203 : i32 to index
    %c0_206 = arith.constant 0 : index
    %c0_207 = arith.constant 0 : index
    %955 = vector.load %arg17[%954, %c0_206, %c0_207] : memref<8x8x5xf32, #tpu.memory_space<vmem>>, vector<1x8x5xf32>
    %956 = vector.shape_cast %955 : vector<1x8x5xf32> to vector<8x5xf32>
    %957 = arith.addf %953, %956 : vector<8x5xf32>
    %cst_208 = arith.constant 5.000000e-01 : f32
    %958 = vector.broadcast %cst_208 : f32 to vector<8x1xf32>
    %959 = arith.cmpf ogt, %942, %958 : vector<8x1xf32>
    %960 = vector.shape_cast %959 : vector<8x1xi1> to vector<8x1xi1>
    %961 = vector.broadcast %960 : vector<8x1xi1> to vector<8x5xi1>
    %962 = arith.select %961, %957, %938 : vector<8x5xi1>, vector<8x5xf32>
    %c5_i32_209 = arith.constant 5 : i32
    %963 = vector.broadcast %c5_i32_209 : i32 to vector<8x1xi32>
    %964 = arith.cmpi slt, %963, %0 : vector<8x1xi32>
    %965 = arith.extui %964 : vector<8x1xi1> to vector<8x1xi32>
    %966 = arith.sitofp %965 : vector<8x1xi32> to vector<8x1xf32>
    %cst_210 = arith.constant dense<0xFF800000> : vector<8xf32>
    %967 = vector.multi_reduction <maximumf>, %962, %cst_210 [1] : vector<8x5xf32> to vector<8xf32>
    %968 = vector.shape_cast %967 : vector<8xf32> to vector<8x1xf32>
    %969 = vector.broadcast %968 : vector<8x1xf32> to vector<8x5xf32>
    %970 = arith.subf %962, %969 : vector<8x5xf32>
    %971 = math.exp %970 : vector<8x5xf32>
    %cst_211 = arith.constant dense<0.000000e+00> : vector<8x5xf32>
    %972 = tpu.matmul %971, %862, %cst_211 {dimension_numbers = #tpu.dot_dimension_numbers<[1], [0], [0], [1], [0, 0, 1, 1], [], []>} : vector<8x5xf32>, vector<5x5xf32>, vector<8x5xf32> -> vector<8x5xf32>
    %973 = vector.broadcast %968 : vector<8x1xf32> to vector<8x5xf32>
    %974 = vector.broadcast %859 : vector<1x5xf32> to vector<8x5xf32>
    %975 = arith.addf %973, %974 : vector<8x5xf32>
    %976 = math.log %972 : vector<8x5xf32>
    %977 = arith.addf %975, %976 : vector<8x5xf32>
    %978 = arith.index_cast %c5_i32_209 : i32 to index
    %c0_212 = arith.constant 0 : index
    %c0_213 = arith.constant 0 : index
    %979 = vector.load %arg17[%978, %c0_212, %c0_213] : memref<8x8x5xf32, #tpu.memory_space<vmem>>, vector<1x8x5xf32>
    %980 = vector.shape_cast %979 : vector<1x8x5xf32> to vector<8x5xf32>
    %981 = arith.addf %977, %980 : vector<8x5xf32>
    %cst_214 = arith.constant 5.000000e-01 : f32
    %982 = vector.broadcast %cst_214 : f32 to vector<8x1xf32>
    %983 = arith.cmpf ogt, %966, %982 : vector<8x1xf32>
    %984 = vector.shape_cast %983 : vector<8x1xi1> to vector<8x1xi1>
    %985 = vector.broadcast %984 : vector<8x1xi1> to vector<8x5xi1>
    %986 = arith.select %985, %981, %962 : vector<8x5xi1>, vector<8x5xf32>
    %c6_i32_215 = arith.constant 6 : i32
    %987 = vector.broadcast %c6_i32_215 : i32 to vector<8x1xi32>
    %988 = arith.cmpi slt, %987, %0 : vector<8x1xi32>
    %989 = arith.extui %988 : vector<8x1xi1> to vector<8x1xi32>
    %990 = arith.sitofp %989 : vector<8x1xi32> to vector<8x1xf32>
    %cst_216 = arith.constant dense<0xFF800000> : vector<8xf32>
    %991 = vector.multi_reduction <maximumf>, %986, %cst_216 [1] : vector<8x5xf32> to vector<8xf32>
    %992 = vector.shape_cast %991 : vector<8xf32> to vector<8x1xf32>
    %993 = vector.broadcast %992 : vector<8x1xf32> to vector<8x5xf32>
    %994 = arith.subf %986, %993 : vector<8x5xf32>
    %995 = math.exp %994 : vector<8x5xf32>
    %cst_217 = arith.constant dense<0.000000e+00> : vector<8x5xf32>
    %996 = tpu.matmul %995, %862, %cst_217 {dimension_numbers = #tpu.dot_dimension_numbers<[1], [0], [0], [1], [0, 0, 1, 1], [], []>} : vector<8x5xf32>, vector<5x5xf32>, vector<8x5xf32> -> vector<8x5xf32>
    %997 = vector.broadcast %992 : vector<8x1xf32> to vector<8x5xf32>
    %998 = vector.broadcast %859 : vector<1x5xf32> to vector<8x5xf32>
    %999 = arith.addf %997, %998 : vector<8x5xf32>
    %1000 = math.log %996 : vector<8x5xf32>
    %1001 = arith.addf %999, %1000 : vector<8x5xf32>
    %1002 = arith.index_cast %c6_i32_215 : i32 to index
    %c0_218 = arith.constant 0 : index
    %c0_219 = arith.constant 0 : index
    %1003 = vector.load %arg17[%1002, %c0_218, %c0_219] : memref<8x8x5xf32, #tpu.memory_space<vmem>>, vector<1x8x5xf32>
    %1004 = vector.shape_cast %1003 : vector<1x8x5xf32> to vector<8x5xf32>
    %1005 = arith.addf %1001, %1004 : vector<8x5xf32>
    %cst_220 = arith.constant 5.000000e-01 : f32
    %1006 = vector.broadcast %cst_220 : f32 to vector<8x1xf32>
    %1007 = arith.cmpf ogt, %990, %1006 : vector<8x1xf32>
    %1008 = vector.shape_cast %1007 : vector<8x1xi1> to vector<8x1xi1>
    %1009 = vector.broadcast %1008 : vector<8x1xi1> to vector<8x5xi1>
    %1010 = arith.select %1009, %1005, %986 : vector<8x5xi1>, vector<8x5xf32>
    %c7_i32_221 = arith.constant 7 : i32
    %1011 = vector.broadcast %c7_i32_221 : i32 to vector<8x1xi32>
    %1012 = arith.cmpi slt, %1011, %0 : vector<8x1xi32>
    %1013 = arith.extui %1012 : vector<8x1xi1> to vector<8x1xi32>
    %1014 = arith.sitofp %1013 : vector<8x1xi32> to vector<8x1xf32>
    %cst_222 = arith.constant dense<0xFF800000> : vector<8xf32>
    %1015 = vector.multi_reduction <maximumf>, %1010, %cst_222 [1] : vector<8x5xf32> to vector<8xf32>
    %1016 = vector.shape_cast %1015 : vector<8xf32> to vector<8x1xf32>
    %1017 = vector.broadcast %1016 : vector<8x1xf32> to vector<8x5xf32>
    %1018 = arith.subf %1010, %1017 : vector<8x5xf32>
    %1019 = math.exp %1018 : vector<8x5xf32>
    %cst_223 = arith.constant dense<0.000000e+00> : vector<8x5xf32>
    %1020 = tpu.matmul %1019, %862, %cst_223 {dimension_numbers = #tpu.dot_dimension_numbers<[1], [0], [0], [1], [0, 0, 1, 1], [], []>} : vector<8x5xf32>, vector<5x5xf32>, vector<8x5xf32> -> vector<8x5xf32>
    %1021 = vector.broadcast %1016 : vector<8x1xf32> to vector<8x5xf32>
    %1022 = vector.broadcast %859 : vector<1x5xf32> to vector<8x5xf32>
    %1023 = arith.addf %1021, %1022 : vector<8x5xf32>
    %1024 = math.log %1020 : vector<8x5xf32>
    %1025 = arith.addf %1023, %1024 : vector<8x5xf32>
    %1026 = arith.index_cast %c7_i32_221 : i32 to index
    %c0_224 = arith.constant 0 : index
    %c0_225 = arith.constant 0 : index
    %1027 = vector.load %arg17[%1026, %c0_224, %c0_225] : memref<8x8x5xf32, #tpu.memory_space<vmem>>, vector<1x8x5xf32>
    %1028 = vector.shape_cast %1027 : vector<1x8x5xf32> to vector<8x5xf32>
    %1029 = arith.addf %1025, %1028 : vector<8x5xf32>
    %cst_226 = arith.constant 5.000000e-01 : f32
    %1030 = vector.broadcast %cst_226 : f32 to vector<8x1xf32>
    %1031 = arith.cmpf ogt, %1014, %1030 : vector<8x1xf32>
    %1032 = vector.shape_cast %1031 : vector<8x1xi1> to vector<8x1xi1>
    %1033 = vector.broadcast %1032 : vector<8x1xi1> to vector<8x5xi1>
    %1034 = arith.select %1033, %1029, %1010 : vector<8x5xi1>, vector<8x5xf32>
    %c7_i32_227 = arith.constant 7 : i32
    %1035 = vector.broadcast %5 : vector<1x5xf32> to vector<8x5xf32>
    %1036 = arith.addf %1034, %1035 : vector<8x5xf32>
    %cst_228 = arith.constant dense<0xFF800000> : vector<8xf32>
    %1037 = vector.multi_reduction <maximumf>, %1036, %cst_228 [1] : vector<8x5xf32> to vector<8xf32>
    %1038 = vector.shape_cast %1037 : vector<8xf32> to vector<8x1xf32>
    %1039 = vector.broadcast %1038 : vector<8x1xf32> to vector<8x5xf32>
    %1040 = arith.subf %1036, %1039 : vector<8x5xf32>
    %1041 = math.exp %1040 : vector<8x5xf32>
    %cst_229 = arith.constant dense<0.000000e+00> : vector<8xf32>
    %1042 = vector.multi_reduction <add>, %1041, %cst_229 [1] : vector<8x5xf32> to vector<8xf32>
    %1043 = vector.shape_cast %1042 : vector<8xf32> to vector<8x1xf32>
    %1044 = math.log %1043 : vector<8x1xf32>
    %1045 = arith.addf %1038, %1044 : vector<8x1xf32>
    %1046 = arith.mulf %1045, %857 : vector<8x1xf32>
    %1047 = vector.shape_cast %1046 : vector<8x1xf32> to vector<1x8x1xf32>
    %cst_230 = arith.constant dense<0.000000e+00> : vector<1xf32>
    %1048 = vector.multi_reduction <add>, %1047, %cst_230 [1, 2] : vector<1x8x1xf32> to vector<1xf32>
    %1049 = vector.shape_cast %1048 : vector<1xf32> to vector<1x1x1xf32>
    %1050 = vector.extract %1049[0, 0, 0] : f32 from vector<1x1x1xf32>
    %1051 = vector.broadcast %1050 : f32 to vector<1x1xf32>
    %1052 = arith.subf %853, %1051 : vector<1x1xf32>
    %c0_231 = arith.constant 0 : index
    %c0_232 = arith.constant 0 : index
    %1053 = vector.load %arg13[%c0_231, %c0_232] : memref<1x1xf32, #tpu.memory_space<vmem>>, vector<1x1xf32>
    tpu.vector_store %arg13[%c0_231, %c0_232], %1052 {strides = array<i32>} : memref<1x1xf32, #tpu.memory_space<vmem>>, vector<1x1xf32>,
    return
  }
}

</mosaic_0001>

<bundles_post_ra>
// kernel: tpu_custom_call.1
= control target key start
LH: loop header
LB: loop body
LE: loop exit
PB: predicated region body
PF: predicated region fallthrough
CT: control target
= control target key end

     0   :  { %v3942_v3 = vmov 0.0|0.0   ;;  %vm3943_vm0 = vmmov 0   ;;  %v3944_v6 = vmov 0.0   ;;  %vm70_vm1 = vcmask 130048   ;;  %s4899_s0 = inlined_call_operand.vmem [shape: s32[8,1], index: 0, kind: input, shape index: {}]   ;;  %s4900_s1 = inlined_call_operand.vmem [shape: f32[64,16], index: 1, kind: input, shape index: {}]   ;;  %s4901_s2 = inlined_call_operand.vmem [shape: f32[64,5], index: 2, kind: input, shape index: {}]   ;;  %s4902_s3 = inlined_call_operand.vmem [shape: f32[64,5], index: 3, kind: input, shape index: {}]   ;;  %s4903_s4 = inlined_call_operand.vmem [shape: f32[16,128], index: 4, kind: input, shape index: {}]   ;;  %s4904_s5 = inlined_call_operand.vmem [shape: f32[1,128], index: 5, kind: input, shape index: {}]   ;;  %s4905_s6 = inlined_call_operand.vmem [shape: f32[16,64], index: 6, kind: input, shape index: {}]   ;;  %s4906_s7 = inlined_call_operand.vmem [shape: f32[16,64], index: 7, kind: input, shape index: {}]   ;;  %s4907_s8 = inlined_call_operand.vmem [shape: f32[32,5], index: 8, kind: input, shape index: {}]   ;;  %s4908_s9 = inlined_call_operand.vmem [shape: f32[1,5], index: 9, kind: input, shape index: {}]   ;;  %s4909_s10 = inlined_call_operand.vmem [shape: f32[5,5], index: 10, kind: input, shape index: {}]   ;;  %s4910_s11 = inlined_call_operand.vmem [shape: f32[1,5], index: 11, kind: input, shape index: {}]   ;;  %s4911_s12 = inlined_call_operand.vmem [shape: f32[1,5], index: 12, kind: input, shape index: {}]   ;;  %s4912_s13 = inlined_call_operand.hbm [shape: f32[1,1], index: 13, kind: output, shape index: {}]  }
   0x1   :  { %v61_v0 = vld [vmem:[%s4903_s4] sm:$0xff]  ;;  %v62_v1 = vld [vmem:[%s4903_s4 + $0x8] sm:$0xff]  ;;  %3678 = vmatprep.subr.bf16.mxu1 %v3942_v3  ;;  %3488 = vmatprep.mubr.msk.f32.mxu1 %vm3943_vm0, %v3944_v6 }
   0x2   :  { %v46_v2 = vld [vmem:[%s4905_s6] sm:$0xff]  ;;  %v3674_v4 = vpack.c.bf16 %v62_v1, %v61_v0  ;;  %v47_v5 = vld [vmem:[%s4905_s6 + $0x8] sm:$0xff] }
   0x3   :  { %v53_v7 = vld [vmem:[%s4900_s1] sm:$0xff]  ;;  %v4040_v8 = vpack.c.bf16 %v47_v5, %v46_v2  ;;  %v49_v10 = vld [vmem:[%s4906_s7 + $0x8] sm:$0xff] }
   0x4   :  { %3472 = vmatprep.mubr.msk.f32.mxu0 %vm70_vm1, %v53_v7  ;;  %v48_v9 = vld [vmem:[%s4906_s7] sm:$0xff]  ;;  %3675 = vmatprep.subr.bf16.mxu0 %v3674_v4  ;;  %v54_v11 = vld [vmem:[%s4900_s1 + $0x8] sm:$0xff] }
   0x5   :  { %3680 = vmatpush3.bf16.msra.mxu1 %v4040_v8  ;;  %3677 = vmatpush3.bf16.msra.mxu0 %v3674_v4  ;;  %v4053_v12 = vpack.c.bf16 %v49_v10, %v48_v9 }
   0x6   :  { %18 = vsyncpa [#allocation7], 0  ;;  %3681 = vmatprep.subr.bf16.mxu1 %v3942_v3  ;;  %3690 = vmatprep.subr.bf16.mxu0 %v3942_v3  ;;  %v55_v13 = vld [vmem:[%s4900_s1 + $0x10] sm:$0xff]  ;;  %v56_v14 = vld [vmem:[%s4900_s1 + $0x18] sm:$0xff]  ;;  %v3946_v37 = vmov 0   ;;  %s3948_s19 = smov 16  }
   0x7   :  { %v57_v15 = vld [vmem:[%s4900_s1 + $0x20] sm:$0xff]  ;;  %v58_v16 = vld [vmem:[%s4900_s1 + $0x28] sm:$0xff]  ;;  %v59_v17 = vld [vmem:[%s4900_s1 + $0x30] sm:$0xff]  ;;  %3754 = vset.pattern.permute.xlu1 %v3946_v37  ;;  %3755 = vset.pattern.permute.xlu0 %v3946_v37  ;;  %s3950_s6 = smov 80   ;;  %vm2183_vm10 = vcmask 261120   ;;  %vm2586_vm11 = vcmask 36864  }
   0x8   :  { %3489 = vmatmul.mubr.f32.vlgmr.msra.gmra.mrb[0].mxu1 %v3944_v6  ;;  %3473 = vmatmul.mubr.msk.f32.vlgmr.msra.gmra.mrb[0].mxu0 %vm70_vm1, %v54_v11  ;;  %v60_v18 = vld [vmem:[%s4900_s1 + $0x38] sm:$0xff]  ;;  %v3296_v19 = vld [vmem:[%s4904_s5] ss:$0 sm:$0xff]  ;;  %s3945_s1 = smov 64   ;;  %s3947_s5 = smov 96   ;;  %vm2313_vm12 = vcmask 39936  }
   0x9   :  { %3683 = vmatpush3.bf16.msra.mxu1 %v4053_v12  ;;  %3495 = vmatprep.mubr.msk.f32.mxu1 %vm3943_vm0, %v3944_v6  ;;  %v4124_v50 = vld [vmem:[%s4899_s0] sm:$0xff]  ;;  %s3949_s0 = smov 32   ;;  %vm2402_vm13 = vcmask 1044480   ;;  %s3951_s4 = smov [#allocation6]  }
   0xa   :  { %3475 = vmatprep.mubr.msk.f32.mxu0 %vm70_vm1, %v55_v13  ;;  %3684 = vmatprep.subr.bf16.mxu1 %v3942_v3  ;;  %vm208_vm2 = vcmp.gt.s32.totalorder %v4124_v50, 0  ;;  %vm211_vm3 = vcmp.gt.s32.totalorder %v4124_v50, 7  ;;  %vm448_vm4 = vcmp.gt.s32.totalorder %v4124_v50, 6  ;;  %vm698_vm5 = vcmp.gt.s32.totalorder %v4124_v50, 5  ;;  %s3288_s18 = sshll.u32 %s3951_s4, 4  ;;  %s3289_s18 = int_to_ptr.vmem [resolvable:$true] %s3288_s18 }
   0xb   :  { %3692 = vmatpush3.bf16.msra.mxu0 %v4040_v8  ;;  %v4130_v53 = vsel %vm208_vm2, 1.0, %v3944_v6  ;;  %v4136_v62 = vsel %vm211_vm3, 1.0, %v3944_v6  ;;  %vm445_vm6 = vcmp.gt.s32.totalorder %v4124_v50, 1  ;;  %vm948_vm7 = vcmp.gt.s32.totalorder %v4124_v50, 4  ;;  %p3923_p1 = scmp.lt.s32.totalorder %s3289_s18, %s3289_s18 }
   0xc   :  { %3496 = vmatmul.mubr.f32.vlgmr.msra.gmra.mrb[2].mxu1 %v3944_v6  ;;  %3476 = vmatmul.mubr.msk.f32.gmra.mrb[2].mxu0 %vm70_vm1, %v56_v14  ;;  %vm695_vm8 = vcmp.gt.s32.totalorder %v4124_v50, 2  ;;  %vm945_vm9 = vcmp.gt.s32.totalorder %v4124_v50, 3 }
   0xd   :  { %3478 = vmatprep.mubr.msk.f32.mxu0 %vm70_vm1, %v57_v15  ;;  %3686 = vmatpush3.bf16.msra.mxu1 %v4040_v8 }
   0xe   :  { %3502 = vmatprep.mubr.msk.f32.mxu1 %vm3943_vm0, %v3944_v6  ;;  %3687 = vmatprep.subr.bf16.mxu1 %v3942_v3 }
   0xf   :  { %3696 = vmatprep.subr.bf16.mxu0 %v3942_v3 }
  0x10   :  { %3479 = vmatmul.mubr.msk.f32.gmra.mrb[4].mxu0 %vm70_vm1, %v58_v16 }
  0x11   :  { %3481 = vmatprep.mubr.msk.f32.mxu0 %vm70_vm1, %v59_v17 }
  0x14   :  { %3482 = vmatmul.mubr.msk.f32.gmra.mrb[6].mxu0 %vm70_vm1, %v60_v18 }
  0x15   :  { %3516 = vmatprep.mubr.msk.f32.mxu0 %vm3943_vm0, %v3944_v6 }
  0xdb   :  { %v286_v20 = vpop.f32.mrb[0].mxu1  ;;  %v3474_v21 = vpop.f32.mrb[0].mxu0 }
  0xdc   :  { %v4099_v22 = vadd.f32 %v3474_v21, %v3296_v19  ;;  %v3490_v23 = vpop.f32.mrb[1].mxu1  ;;  %v161_v24 = vpop.f32.mrb[1].mxu0 }
  0xdd   :  { %v4101_v25 = vadd.f32 %v3296_v19, %v161_v24 }
  0xdf   :  { %v290_v26 = vadd.f32 %v286_v20, %v4101_v25  ;;  %v357_v27 = vpop.f32.mrb[2].mxu1  ;;  %v3477_v28 = vpop.f32.mrb[2].mxu0 }
  0xe0   :  { %362 = vrot.lane.b32.xlu0 %v357_v27, %s3945_s1  ;;  %v3497_v29 = vpop.f32.mrb[3].mxu1  ;;  %v4105_v30 = vadd.f32 %v3477_v28, %v3296_v19  ;;  %v171_v31 = vpop.f32.mrb[3].mxu0  ;;  %v4173_v28 = vsel %vm448_vm4, 1.0, %v3944_v6 }
  0xe1   :  { %3756 = vtanh.f32 %v290_v26  ;;  %v4107_v32 = vadd.f32 %v3296_v19, %v171_v31  ;;  %v3307_v43 = vmul.f32 -1.442695, %v290_v26 }
  0xe3   :  { %v3480_v33 = vpop.f32.mrb[4].mxu0  ;;  %3758 = vpow2.f32 %v3307_v43 }
  0xe4   :  { %v4109_v34 = vadd.f32 %v3480_v33, %v3296_v19  ;;  %v181_v35 = vpop.f32.mrb[5].mxu0 }
  0xe5   :  { %v4111_v36 = vadd.f32 %v3296_v19, %v181_v35 }
  0xe7   :  { %v3483_v38 = vpop.f32.mrb[6].mxu0 }
  0xe8   :  { %v4115_v39 = vadd.f32 %v3483_v38, %v3296_v19  ;;  %v191_v40 = vpop.f32.mrb[7].mxu0 }
  0xe9   :  { %v4117_v41 = vadd.f32 %v3296_v19, %v191_v40 }
  0xeb   :  { %v3757_v42 = vpop.eup %3756 }
  0xec   :  { %375 = vrot.lane.b32.xlu0 %v3757_v42, %s3947_s5 }
  0xed   :  { %v3759_v44 = vpop.eup %3758 }
  0xee   :  { %v369_v46 = vadd.f32 1.0, %v3759_v44 }
 0x152   :  { %v363_v45 = vpop.permute.xlu0 %362 }
 0x153   :  { %v365_v47 = vadd.f32 %v363_v45, %v4115_v39 }
 0x155   :  { %3760 = vtanh.f32 %v365_v47  ;;  %v3308_v54 = vmul.f32 -1.442695, %v365_v47 }
 0x156   :  { %3762 = vrcp.f32 %v369_v46 }
 0x157   :  { %3764 = vpow2.f32 %v3308_v54 }
 0x15e   :  { %v376_v49 = vpop.permute.xlu0 %375 }
 0x15f   :  { %v3761_v48 = vpop.eup %3760 }
 0x160   :  { %399 = vrot.lane.b32.xlu1 %v3761_v48, %s3947_s5  ;;  %v3763_v51 = vpop.eup %3762 }
 0x161   :  { %v378_v52 = vmul.f32 %v3763_v51, %v376_v49  ;;  %v3765_v55 = vpop.eup %3764  ;;  %v373_v60 = vmul.f32 0.0, %v3763_v51 }
 0x162   :  { %v393_v56 = vadd.f32 1.0, %v3765_v55 }
 0x164   :  { %380 = vrot.lane.b32.xlu1 %v378_v52, %s3948_s19  ;;  %3766 = vrcp.f32 %v393_v56 }
 0x168   :  { %416 = vperm.xlu1 %3754, %v4130_v53  }
 0x16e   :  { %v3767_v57 = vpop.eup %3766 }
 0x16f   :  { %v397_v1 = vmul.f32 0.0, %v3767_v57 }
 0x1d2   :  { %v400_v58 = vpop.permute.xlu1 %399 }
 0x1d3   :  { %v402_v59 = vmul.f32 %v3767_v57, %v400_v58 }
 0x1d5   :  { %404 = vrot.lane.b32.xlu0 %v402_v59, %s3948_s19 }
 0x1d6   :  { %v381_v61 = vpop.permute.xlu1 %380 }
 0x1d7   :  { %v4138_v63 = vadd.f32 %v381_v61, %v373_v60 }
 0x1d9   :  { %3768 = vtanh.f32 %v4138_v63  ;;  %425 = vperm.xlu0 %3755, %v4136_v62  }
 0x1e3   :  { %v3769_v0 = vpop.eup %3768 }
 0x1e4   :  { %386 = vrot.lane.b32.xlu1 %v3769_v0, %s3949_s0  ;;  %v4199_v0 = vsel %vm698_vm5, 1.0, %v3944_v6 }
 0x1e7   :  { %v4143_v5 = vpop.permute.xlu1 %416 }
 0x247   :  { %v405_v2 = vpop.permute.xlu0 %404 }
 0x248   :  { %v407_v4 = vadd.f32 %v405_v2, %v397_v1 }
 0x24a   :  { %3770 = vtanh.f32 %v407_v4 }
 0x254   :  { %v3771_v7 = vpop.eup %3770 }
 0x255   :  { %410 = vrot.lane.b32.xlu1 %v3771_v7, %s3949_s0 }
 0x256   :  { %v387_v9 = vpop.permute.xlu1 %386 }
 0x257   :  { %v389_v10 = vmul.f32 %v3763_v51, %v387_v9 }
 0x258   :  { %v4151_v15 = vpop.permute.xlu0 %425 }
 0x259   :  { %v4147_v11 = vmul.f32 %v4143_v5, %v389_v10  ;;  %v430_v42 = vmul.f32 %v4151_v15, %v407_v4 }
 0x25b   :  { %456 = vrot.lane.b32.xlu0 %v4147_v11, %s3950_s6 }
 0x2c7   :  { %v411_v13 = vpop.permute.xlu1 %410 }
 0x2c8   :  { %v413_v14 = vmul.f32 %v3767_v57, %v411_v13 }
 0x2ca   :  { %v4154_v16 = vmul.f32 %v4151_v15, %v413_v14 }
 0x2cc   :  { %532 = vrot.lane.b32.xlu1 %v4154_v16, %s3948_s19 }
 0x2cd   :  { %v457_v17 = vpop.permute.xlu0 %456 }
 0x2ce   :  { %3503 = vmatmul.mubr.msk.f32.vlgmr.msra.gmra.mrb[4].mxu1 %vm70_vm1, %v457_v17 }
 0x2cf   :  { %3689 = vmatpush3.bf16.msra.mxu1 %v4053_v12  ;;  %3509 = vmatprep.mubr.msk.f32.mxu1 %vm3943_vm0, %v3944_v6 }
 0x2d0   :  { %3693 = vmatprep.subr.bf16.mxu1 %v3942_v3 }
 0x33e   :  { %v533_v18 = vpop.permute.xlu1 %532 }
 0x33f   :  { %3510 = vmatmul.mubr.msk.f32.vlgmr.msra.gmra.mrb[6].mxu1 %vm70_vm1, %v533_v18 }
 0x340   :  { %3695 = vmatpush3.bf16.msra.mxu1 %v4053_v12  ;;  %3523 = vmatprep.mubr.msk.f32.mxu1 %vm3943_vm0, %v3944_v6 }
 0x341   :  { %3699 = vmatprep.subr.bf16.mxu1 %v3942_v3 }
 0x3a1   :  { %v526_v19 = vpop.f32.mrb[4].mxu1 }
 0x3a2   :  { %v3504_v20 = vpop.f32.mrb[5].mxu1  ;;  %v530_v60 = vadd.f32 %v526_v19, %v4099_v22 }
 0x3a4   :  { %v3313_v9 = vmul.f32 -1.442695, %v530_v60 }
 0x412   :  { %v602_v21 = vpop.f32.mrb[6].mxu1 }
 0x413   :  { %607 = vrot.lane.b32.xlu0 %v602_v21, %s3945_s1  ;;  %v3511_v23 = vpop.f32.mrb[7].mxu1 }
 0x485   :  { %v608_v24 = vpop.permute.xlu0 %607 }
 0x486   :  { %v610_v26 = vadd.f32 %v608_v24, %v4117_v41 }
 0x488   :  { %3772 = vtanh.f32 %v610_v26  ;;  %v3314_v29 = vmul.f32 -1.442695, %v610_v26 }
 0x48a   :  { %3774 = vpow2.f32 %v3314_v29 }
 0x492   :  { %v3773_v27 = vpop.eup %3772 }
 0x493   :  { %644 = vrot.lane.b32.xlu1 %v3773_v27, %s3947_s5 }
 0x494   :  { %v3775_v31 = vpop.eup %3774 }
 0x495   :  { %v638_v33 = vadd.f32 1.0, %v3775_v31 }
 0x497   :  { %673 = vperm.xlu1 %3754, %v4173_v28   ;;  %3776 = vrcp.f32 %v638_v33 }
 0x4a1   :  { %v3777_v35 = vpop.eup %3776 }
 0x4a2   :  { %v642_v43 = vmul.f32 %v3777_v35, %v430_v42 }
 0x505   :  { %v645_v38 = vpop.permute.xlu1 %644 }
 0x506   :  { %v647_v40 = vmul.f32 %v3777_v35, %v645_v38  ;;  %v4217_v38 = vmul.f32 %v4143_v5, %v4138_v63  ;;  %v4233_v63 = vsel %vm445_vm6, 1.0, %v3944_v6  ;;  %vm3060_vm6 = vcmp.gt.f32.partialorder %v4199_v0, 0.5 }
 0x507   :  { %vm2688_vm15 = vcmp.gt.f32.partialorder %v4233_v63, 0.5 }
 0x508   :  { %649 = vrot.lane.b32.xlu0 %v647_v40, %s3948_s19 }
 0x516   :  { %v4180_v51 = vpop.permute.xlu1 %673 }
 0x57a   :  { %v650_v44 = vpop.permute.xlu0 %649 }
 0x57b   :  { %v652_v45 = vadd.f32 %v650_v44, %v642_v43 }
 0x57d   :  { %3778 = vtanh.f32 %v652_v45  ;;  %v678_v24 = vsub.f32 %v652_v45, %v430_v42 }
 0x57f   :  { %v679_v26 = vmul.f32 %v678_v24, %v4180_v51 }
 0x581   :  { %v4208_v27 = vadd.f32 %v679_v26, %v430_v42 }
 0x587   :  { %v3779_v46 = vpop.eup %3778 }
 0x588   :  { %655 = vrot.lane.b32.xlu0 %v3779_v46, %s3949_s0 }
 0x5fa   :  { %v656_v47 = vpop.permute.xlu0 %655 }
 0x5fb   :  { %v658_v48 = vmul.f32 %v3777_v35, %v656_v47 }
 0x5fd   :  { %v670_v49 = vsub.f32 %v658_v48, %v4154_v16 }
 0x5ff   :  { %v676_v52 = vmul.f32 %v4180_v51, %v670_v49 }
 0x601   :  { %v4184_v54 = vadd.f32 %v676_v52, %v4154_v16 }
 0x603   :  { %782 = vrot.lane.b32.xlu1 %v4184_v54, %s3948_s19 }
 0x675   :  { %v783_v55 = vpop.permute.xlu1 %782 }
 0x676   :  { %3524 = vmatmul.mubr.msk.f32.vlgmr.msra.gmra.mrb[8].mxu1 %vm70_vm1, %v783_v55 }
 0x677   :  { %3701 = vmatpush3.bf16.msra.mxu1 %v4053_v12  ;;  %3537 = vmatprep.mubr.msk.f32.mxu1 %vm3943_vm0, %v3944_v6 }
 0x678   :  { %3705 = vmatprep.subr.bf16.mxu1 %v3942_v3 }
 0x749   :  { %v852_v56 = vpop.f32.mrb[8].mxu1 }
 0x74a   :  { %857 = vrot.lane.b32.xlu0 %v852_v56, %s3945_s1  ;;  %v3525_v57 = vpop.f32.mrb[9].mxu1 }
 0x7bc   :  { %v858_v58 = vpop.permute.xlu0 %857 }
 0x7bd   :  { %v860_v59 = vadd.f32 %v858_v58, %v4109_v34 }
 0x7bf   :  { %3780 = vtanh.f32 %v860_v59  ;;  %v3320_v2 = vmul.f32 -1.442695, %v860_v59 }
 0x7c0   :  { %3782 = vtanh.f32 %v530_v60 }
 0x7c1   :  { %3784 = vpow2.f32 %v3320_v2 }
 0x7c9   :  { %v3781_v61 = vpop.eup %3780 }
 0x7ca   :  { %894 = vrot.lane.b32.xlu1 %v3781_v61, %s3947_s5  ;;  %v3783_v1 = vpop.eup %3782 }
 0x7cb   :  { %v3785_v4 = vpop.eup %3784 }
 0x7cc   :  { %v888_v7 = vadd.f32 1.0, %v3785_v4 }
 0x7ce   :  { %923 = vperm.xlu1 %3754, %v4199_v0   ;;  %3786 = vrcp.f32 %v888_v7 }
 0x7cf   :  { %3788 = vpow2.f32 %v3313_v9 }
 0x7d2   :  { %620 = vrot.lane.b32.xlu1 %v3783_v1, %s3947_s5 }
 0x7d8   :  { %v3787_v10 = vpop.eup %3786 }
 0x7d9   :  { %v3789_v17 = vpop.eup %3788  ;;  %v892_v29 = vmul.f32 %v3787_v10, %v4208_v27 }
 0x7da   :  { %v614_v18 = vadd.f32 1.0, %v3789_v17 }
 0x7dc   :  { %3790 = vrcp.f32 %v614_v18 }
 0x7e6   :  { %v3791_v20 = vpop.eup %3790 }
 0x7e7   :  { %v618_v40 = vmul.f32 %v3791_v20, %v4217_v38 }
 0x83c   :  { %v895_v13 = vpop.permute.xlu1 %894 }
 0x83d   :  { %v897_v14 = vmul.f32 %v3787_v10, %v895_v13 }
 0x83f   :  { %899 = vrot.lane.b32.xlu0 %v897_v14, %s3948_s19 }
 0x84d   :  { %v4204_v19 = vpop.permute.xlu1 %923 }
 0x851   :  { %v621_v21 = vpop.permute.xlu1 %620 }
 0x852   :  { %v623_v23 = vmul.f32 %v3791_v20, %v621_v21 }
 0x854   :  { %625 = vrot.lane.b32.xlu1 %v623_v23, %s3948_s19 }
 0x8b1   :  { %v900_v31 = vpop.permute.xlu0 %899 }
 0x8b2   :  { %v4211_v33 = vadd.f32 %v900_v31, %v892_v29 }
 0x8b4   :  { %3792 = vtanh.f32 %v4211_v33 }
 0x8be   :  { %v3793_v35 = vpop.eup %3792 }
 0x8bf   :  { %905 = vrot.lane.b32.xlu0 %v3793_v35, %s3949_s0  ;;  %v4263_v35 = vsel %vm948_vm7, 1.0, %v3944_v6 }
 0x8c0   :  { %vm2967_vm5 = vcmp.gt.f32.partialorder %v4263_v35, 0.5 }
 0x8c6   :  { %v626_v43 = vpop.permute.xlu1 %625 }
 0x8c7   :  { %v4220_v44 = vadd.f32 %v626_v43, %v618_v40 }
 0x8c9   :  { %3794 = vtanh.f32 %v4220_v44 }
 0x8d3   :  { %v3795_v42 = vpop.eup %3794 }
 0x8d4   :  { %631 = vrot.lane.b32.xlu1 %v3795_v42, %s3949_s0 }
 0x931   :  { %v906_v45 = vpop.permute.xlu0 %905 }
 0x932   :  { %v908_v46 = vmul.f32 %v3787_v10, %v906_v45 }
 0x934   :  { %v920_v47 = vsub.f32 %v908_v46, %v4184_v54  ;;  %v4269_v46 = vsel %vm695_vm8, 1.0, %v3944_v6  ;;  %vm3153_vm8 = vcmp.gt.f32.partialorder %v4173_v28, 0.5 }
 0x935   :  { %vm2781_vm14 = vcmp.gt.f32.partialorder %v4269_v46, 0.5 }
 0x936   :  { %v926_v48 = vmul.f32 %v4204_v19, %v920_v47  ;;  %v928_v47 = vsub.f32 %v4211_v33, %v4208_v27 }
 0x938   :  { %v4227_v49 = vadd.f32 %v926_v48, %v4184_v54  ;;  %v929_v48 = vmul.f32 %v928_v47, %v4204_v19 }
 0x93a   :  { %1032 = vrot.lane.b32.xlu0 %v4227_v49, %s3948_s19 }
 0x93e   :  { %662 = vperm.xlu0 %3755, %v4233_v63  }
 0x946   :  { %v632_v55 = vpop.permute.xlu1 %631 }
 0x947   :  { %v634_v56 = vmul.f32 %v3791_v20, %v632_v55 }
 0x949   :  { %v659_v57 = vsub.f32 %v634_v56, %v4147_v11 }
 0x9ac   :  { %v1033_v52 = vpop.permute.xlu0 %1032 }
 0x9ad   :  { %3538 = vmatmul.mubr.msk.f32.vlgmr.msra.gmra.mrb[10].mxu1 %vm70_vm1, %v1033_v52  ;;  %v4276_v52 = vadd.f32 %v929_v48, %v4208_v27 }
 0x9ae   :  { %3707 = vmatpush3.bf16.msra.mxu1 %v4053_v12  ;;  %3551 = vmatprep.mubr.msk.f32.mxu1 %vm3943_vm0, %v3944_v6 }
 0x9af   :  { %3711 = vmatprep.subr.bf16.mxu1 %v3942_v3 }
 0x9bd   :  { %v4242_v58 = vpop.permute.xlu0 %662 }
 0x9be   :  { %v665_v59 = vmul.f32 %v4242_v58, %v659_v57 }
 0x9c0   :  { %v4246_v60 = vadd.f32 %v665_v59, %v4147_v11 }
 0x9c2   :  { %706 = vrot.lane.b32.xlu0 %v4246_v60, %s3950_s6 }
 0xa34   :  { %v707_v61 = vpop.permute.xlu0 %706 }
 0xa35   :  { %3517 = vmatmul.mubr.msk.f32.vlgmr.msra.gmra.mrb[8].mxu0 %vm70_vm1, %v707_v61  ;;  %v667_v61 = vsub.f32 %v4220_v44, %v4217_v38 }
 0xa36   :  { %3698 = vmatpush3.bf16.msra.mxu0 %v4040_v8  ;;  %3530 = vmatprep.mubr.msk.f32.mxu0 %vm3943_vm0, %v3944_v6 }
 0xa37   :  { %3702 = vmatprep.subr.bf16.mxu0 %v3942_v3  ;;  %v668_v33 = vmul.f32 %v667_v61, %v4242_v58 }
 0xa39   :  { %v4289_v27 = vadd.f32 %v668_v33, %v4217_v38 }
 0xa80   :  { %v1102_v1 = vpop.f32.mrb[10].mxu1 }
 0xa81   :  { %1107 = vrot.lane.b32.xlu1 %v1102_v1, %s3945_s1  ;;  %v3539_v2 = vpop.f32.mrb[11].mxu1 }
 0xaf3   :  { %v1108_v4 = vpop.permute.xlu1 %1107 }
 0xaf4   :  { %v1110_v7 = vadd.f32 %v1108_v4, %v4111_v36 }
 0xaf6   :  { %3796 = vtanh.f32 %v1110_v7  ;;  %v3326_v18 = vmul.f32 -1.442695, %v1110_v7 }
 0xb00   :  { %v3797_v9 = vpop.eup %3796 }
 0xb01   :  { %1144 = vrot.lane.b32.xlu0 %v3797_v9, %s3947_s5 }
 0xb08   :  { %v776_v10 = vpop.f32.mrb[8].mxu0 }
 0xb09   :  { %v780_v13 = vadd.f32 %v776_v10, %v4107_v32  ;;  %v3518_v14 = vpop.f32.mrb[9].mxu0 }
 0xb0b   :  { %3798 = vtanh.f32 %v780_v13  ;;  %v3319_v23 = vmul.f32 -1.442695, %v780_v13 }
 0xb0c   :  { %3800 = vpow2.f32 %v3326_v18 }
 0xb15   :  { %v3799_v17 = vpop.eup %3798 }
 0xb16   :  { %870 = vrot.lane.b32.xlu0 %v3799_v17, %s3947_s5  ;;  %v3801_v20 = vpop.eup %3800 }
 0xb17   :  { %v1138_v21 = vadd.f32 1.0, %v3801_v20 }
 0xb19   :  { %3802 = vrcp.f32 %v1138_v21 }
 0xb1a   :  { %3804 = vpow2.f32 %v3319_v23 }
 0xb23   :  { %v3803_v24 = vpop.eup %3802 }
 0xb24   :  { %v3805_v31 = vpop.eup %3804  ;;  %v1142_v55 = vmul.f32 %v3803_v24, %v4276_v52 }
 0xb25   :  { %v864_v40 = vadd.f32 1.0, %v3805_v31 }
 0xb27   :  { %3806 = vrcp.f32 %v864_v40 }
 0xb31   :  { %v3807_v43 = vpop.eup %3806 }
 0xb32   :  { %v868_v4 = vmul.f32 %v3807_v43, %v4289_v27 }
 0xb73   :  { %v1145_v26 = vpop.permute.xlu0 %1144 }
 0xb74   :  { %v1147_v29 = vmul.f32 %v3803_v24, %v1145_v26 }
 0xb76   :  { %1149 = vrot.lane.b32.xlu1 %v1147_v29, %s3948_s19 }
 0xb7a   :  { %1173 = vperm.xlu1 %3754, %v4263_v35  }
 0xb88   :  { %v871_v42 = vpop.permute.xlu0 %870 }
 0xb89   :  { %v873_v45 = vmul.f32 %v3807_v43, %v871_v42 }
 0xb8b   :  { %875 = vrot.lane.b32.xlu1 %v873_v45, %s3948_s19 }
 0xb8f   :  { %912 = vperm.xlu1 %3754, %v4269_v46  }
 0xbe8   :  { %v1150_v56 = vpop.permute.xlu1 %1149 }
 0xbe9   :  { %v4279_v57 = vadd.f32 %v1150_v56, %v1142_v55 }
 0xbeb   :  { %3808 = vtanh.f32 %v4279_v57 }
 0xbf5   :  { %v3809_v59 = vpop.eup %3808 }
 0xbf6   :  { %1155 = vrot.lane.b32.xlu0 %v3809_v59, %s3949_s0  ;;  %v4329_v59 = vsel %vm945_vm9, 1.0, %v3944_v6  ;;  %vm3246_vm9 = vcmp.gt.f32.partialorder %v4136_v62, 0.5 }
 0xbf7   :  { %vm2874_vm2 = vcmp.gt.f32.partialorder %v4329_v59, 0.5 }
 0xbf9   :  { %v4285_v1 = vpop.permute.xlu1 %1173 }
 0xbfd   :  { %v876_v2 = vpop.permute.xlu1 %875 }
 0xbfe   :  { %v4292_v7 = vadd.f32 %v876_v2, %v868_v4 }
 0xc00   :  { %3810 = vtanh.f32 %v4292_v7 }
 0xc0a   :  { %v3811_v38 = vpop.eup %3810 }
 0xc0e   :  { %v4309_v23 = vpop.permute.xlu1 %912 }
 0xc68   :  { %v1156_v9 = vpop.permute.xlu0 %1155 }
 0xc69   :  { %v1158_v10 = vmul.f32 %v3803_v24, %v1156_v9 }
 0xc6b   :  { %v1170_v13 = vsub.f32 %v1158_v10, %v4227_v49 }
 0xc6d   :  { %v1176_v44 = vmul.f32 %v4285_v1, %v1170_v13 }
 0xc6f   :  { %v4298_v14 = vadd.f32 %v1176_v44, %v4227_v49 }
 0xc71   :  { %1274 = vrot.lane.b32.xlu0 %v4298_v14, %s3948_s19 }
 0xc75   :  { %881 = vrot.lane.b32.xlu0 %v3811_v38, %s3949_s0 }
 0xce3   :  { %v1275_v17 = vpop.permute.xlu0 %1274 }
 0xce4   :  { %3552 = vmatmul.mubr.msk.f32.vlgmr.msra.gmra.mrb[12].mxu1 %vm70_vm1, %v1275_v17 }
 0xce5   :  { %3713 = vmatpush3.bf16.msra.mxu1 %v4053_v12  ;;  %3565 = vmatprep.mubr.msk.f32.mxu1 %vm3943_vm0, %v3944_v6 }
 0xce6   :  { %3717 = vmatprep.subr.bf16.mxu1 %v3942_v3 }
 0xce7   :  { %v882_v18 = vpop.permute.xlu0 %881 }
 0xce8   :  { %v884_v20 = vmul.f32 %v3807_v43, %v882_v18  ;;  %v1178_v18 = vsub.f32 %v4279_v57, %v4276_v52 }
 0xcea   :  { %v909_v21 = vsub.f32 %v884_v20, %v4246_v60  ;;  %v1179_v20 = vmul.f32 %v1178_v18, %v4285_v1 }
 0xcec   :  { %v915_v24 = vmul.f32 %v4309_v23, %v909_v21  ;;  %v4338_v21 = vadd.f32 %v1179_v20, %v4276_v52 }
 0xcee   :  { %v4313_v26 = vadd.f32 %v915_v24, %v4246_v60 }
 0xcf0   :  { %956 = vrot.lane.b32.xlu1 %v4313_v26, %s3950_s6 }
 0xd62   :  { %v957_v29 = vpop.permute.xlu1 %956 }
 0xd63   :  { %3531 = vmatmul.mubr.msk.f32.vlgmr.msra.gmra.mrb[10].mxu0 %vm70_vm1, %v957_v29 }
 0xd64   :  { %3704 = vmatpush3.bf16.msra.mxu0 %v4040_v8  ;;  %3544 = vmatprep.mubr.msk.f32.mxu0 %vm3943_vm0, %v3944_v6 }
 0xd65   :  { %3708 = vmatprep.subr.bf16.mxu0 %v3942_v3 }
 0xdb7   :  { %v1344_v31 = vpop.f32.mrb[12].mxu1 }
 0xdb8   :  { %1349 = vrot.lane.b32.xlu0 %v1344_v31, %s3945_s1  ;;  %v3553_v40 = vpop.f32.mrb[13].mxu1 }
 0xdb9   :  { %v917_v40 = vsub.f32 %v4292_v7, %v4289_v27 }
 0xe2a   :  { %v1350_v43 = vpop.permute.xlu0 %1349 }
 0xe2b   :  { %v1352_v42 = vadd.f32 %v1350_v43, %v4105_v30  ;;  %v918_v43 = vmul.f32 %v917_v40, %v4309_v23 }
 0xe2d   :  { %3812 = vtanh.f32 %v1352_v42  ;;  %v3330_v61 = vmul.f32 -1.442695, %v1352_v42  ;;  %v4348_v42 = vadd.f32 %v918_v43, %v4289_v27 }
 0xe36   :  { %v1026_v45 = vpop.f32.mrb[10].mxu0 }
 0xe37   :  { %v3813_v47 = vpop.eup %3812  ;;  %v1030_v48 = vadd.f32 %v1026_v45, %v4105_v30  ;;  %v3532_v55 = vpop.f32.mrb[11].mxu0 }
 0xe38   :  { %1386 = vrot.lane.b32.xlu1 %v3813_v47, %s3947_s5 }
 0xe39   :  { %3814 = vtanh.f32 %v1030_v48  ;;  %v3325_v33 = vmul.f32 -1.442695, %v1030_v48 }
 0xe3a   :  { %3816 = vpow2.f32 %v3330_v61 }
 0xe3b   :  { %3818 = vpow2.f32 %v3325_v33 }
 0xe43   :  { %v3815_v56 = vpop.eup %3814 }
 0xe44   :  { %1120 = vrot.lane.b32.xlu1 %v3815_v56, %s3947_s5  ;;  %v3817_v2 = vpop.eup %3816 }
 0xe45   :  { %v1380_v30 = vadd.f32 1.0, %v3817_v2  ;;  %v3819_v4 = vpop.eup %3818 }
 0xe46   :  { %v1114_v9 = vadd.f32 1.0, %v3819_v4 }
 0xe47   :  { %3820 = vrcp.f32 %v1380_v30 }
 0xe48   :  { %1162 = vperm.xlu1 %3754, %v4329_v59   ;;  %3822 = vrcp.f32 %v1114_v9 }
 0xe51   :  { %v3821_v10 = vpop.eup %3820 }
 0xe52   :  { %v3823_v44 = vpop.eup %3822  ;;  %v1384_v24 = vmul.f32 %v3821_v10, %v4338_v21 }
 0xe53   :  { %v1118_v57 = vmul.f32 %v3823_v44, %v4348_v42 }
 0xeaa   :  { %v1387_v13 = vpop.permute.xlu1 %1386 }
 0xeab   :  { %v1389_v50 = vmul.f32 %v3821_v10, %v1387_v13 }
 0xead   :  { %1391 = vrot.lane.b32.xlu0 %v1389_v50, %s3948_s19 }
 0xeb6   :  { %v1121_v38 = vpop.permute.xlu1 %1120 }
 0xeb7   :  { %v1123_v17 = vmul.f32 %v3823_v44, %v1121_v38 }
 0xeb9   :  { %1125 = vrot.lane.b32.xlu0 %v1123_v17, %s3948_s19 }
 0xec7   :  { %v4354_v61 = vpop.permute.xlu1 %1162 }
 0xf1f   :  { %v1392_v29 = vpop.permute.xlu0 %1391 }
 0xf20   :  { %v4341_v31 = vadd.f32 %v1392_v29, %v1384_v24 }
 0xf22   :  { %3824 = vtanh.f32 %v4341_v31 }
 0xf2b   :  { %v1126_v45 = vpop.permute.xlu0 %1125 }
 0xf2c   :  { %v3825_v52 = vpop.eup %3824  ;;  %v1128_v47 = vadd.f32 %v1126_v45, %v1118_v57 }
 0xf2d   :  { %1397 = vrot.lane.b32.xlu0 %v3825_v52, %s3949_s0 }
 0xf2e   :  { %3826 = vtanh.f32 %v1128_v47 }
 0xf38   :  { %v3827_v48 = vpop.eup %3826 }
 0xf39   :  { %1131 = vrot.lane.b32.xlu1 %v3827_v48, %s3949_s0 }
 0xf9f   :  { %v1398_v55 = vpop.permute.xlu0 %1397 }
 0xfa0   :  { %v1400_v7 = vmul.f32 %v3821_v10, %v1398_v55 }
 0xfa2   :  { %v1407_v56 = vsub.f32 %v1400_v7, %v4298_v14 }
 0xfa4   :  { %v1408_v27 = vmul.f32 %v1407_v56, %v4354_v61 }
 0xfa6   :  { %v4358_v33 = vadd.f32 %v1408_v27, %v4298_v14 }
 0xfa8   :  { %1506 = vrot.lane.b32.xlu0 %v4358_v33, %s3948_s19 }
 0xfab   :  { %v1132_v2 = vpop.permute.xlu1 %1131 }
 0xfac   :  { %v1134_v30 = vmul.f32 %v3823_v44, %v1132_v2 }
 0xfae   :  { %v1159_v4 = vsub.f32 %v1134_v30, %v4313_v26 }
 0xfb0   :  { %v1165_v9 = vmul.f32 %v4354_v61, %v1159_v4  ;;  %v1167_v4 = vsub.f32 %v1128_v47, %v4348_v42 }
 0xfb2   :  { %v4365_v10 = vadd.f32 %v1165_v9, %v4313_v26  ;;  %v1168_v9 = vmul.f32 %v1167_v4, %v4354_v61 }
 0xfb4   :  { %1198 = vrot.lane.b32.xlu1 %v4365_v10, %s3950_s6 }
0x101a   :  { %v1507_v13 = vpop.permute.xlu0 %1506 }
0x101b   :  { %3566 = vmatmul.mubr.msk.f32.vlgmr.msra.gmra.mrb[14].mxu1 %vm70_vm1, %v1507_v13  ;;  %v4389_v13 = vadd.f32 %v1168_v9, %v4348_v42 }
0x101c   :  { %3719 = vmatpush3.bf16.msra.mxu1 %v4053_v12  ;;  %3579 = vmatprep.mubr.msk.f32.mxu1 %vm3943_vm0, %v3944_v6 }
0x101d   :  { %3723 = vmatprep.subr.bf16.mxu1 %v3942_v3 }
0x1026   :  { %v1199_v50 = vpop.permute.xlu1 %1198 }
0x1027   :  { %3545 = vmatmul.mubr.msk.f32.vlgmr.msra.gmra.mrb[12].mxu0 %vm70_vm1, %v1199_v50 }
0x1028   :  { %3710 = vmatpush3.bf16.msra.mxu0 %v4040_v8  ;;  %3558 = vmatprep.mubr.msk.f32.mxu0 %vm3943_vm0, %v3944_v6 }
0x1029   :  { %3714 = vmatprep.subr.bf16.mxu0 %v3942_v3 }
0x10ee   :  { %v1576_v44 = vpop.f32.mrb[14].mxu1 }
0x10ef   :  { %1581 = vrot.lane.b32.xlu0 %v1576_v44, %s3945_s1  ;;  %v3567_v38 = vpop.f32.mrb[15].mxu1 }
0x10fa   :  { %v1268_v17 = vpop.f32.mrb[12].mxu0 }
0x10fb   :  { %v1272_v18 = vadd.f32 %v1268_v17, %v4111_v36  ;;  %v3546_v20 = vpop.f32.mrb[13].mxu0 }
0x10fd   :  { %3828 = vtanh.f32 %v1272_v18  ;;  %v3329_v29 = vmul.f32 -1.442695, %v1272_v18  ;;  %v1410_v18 = vsub.f32 %v4341_v31, %v4338_v21 }
0x10ff   :  { %3830 = vpow2.f32 %v3329_v29  ;;  %v1411_v47 = vmul.f32 %v1410_v18, %v4354_v61 }
0x1101   :  { %v4397_v20 = vadd.f32 %v1411_v47, %v4338_v21 }
0x1107   :  { %v3829_v24 = vpop.eup %3828 }
0x1108   :  { %1362 = vrot.lane.b32.xlu0 %v3829_v24, %s3947_s5 }
0x1109   :  { %v3831_v57 = vpop.eup %3830 }
0x110a   :  { %v1356_v45 = vadd.f32 1.0, %v3831_v57 }
0x1161   :  { %v1582_v40 = vpop.permute.xlu0 %1581 }
0x1162   :  { %v1584_v43 = vadd.f32 %v1582_v40, %v4107_v32 }
0x1164   :  { %3832 = vtanh.f32 %v1584_v43  ;;  %v3334_v7 = vmul.f32 -1.442695, %v1584_v43 }
0x1165   :  { %3834 = vrcp.f32 %v1356_v45 }
0x1166   :  { %3836 = vpow2.f32 %v3334_v7 }
0x116e   :  { %v3833_v52 = vpop.eup %3832 }
0x116f   :  { %1618 = vrot.lane.b32.xlu1 %v3833_v52, %s3947_s5  ;;  %v3835_v48 = vpop.eup %3834 }
0x1170   :  { %v3837_v56 = vpop.eup %3836  ;;  %v1360_v50 = vmul.f32 %v3835_v48, %v4389_v13 }
0x1171   :  { %v1612_v27 = vadd.f32 1.0, %v3837_v56 }
0x1173   :  { %3838 = vrcp.f32 %v1612_v27 }
0x117a   :  { %v1363_v55 = vpop.permute.xlu0 %1362 }
0x117b   :  { %v1365_v36 = vmul.f32 %v3835_v48, %v1363_v55 }
0x117d   :  { %1367 = vrot.lane.b32.xlu0 %v1365_v36, %s3948_s19  ;;  %v3839_v2 = vpop.eup %3838 }
0x117e   :  { %v1616_v24 = vmul.f32 %v3839_v2, %v4397_v20 }
0x11e1   :  { %v1619_v30 = vpop.permute.xlu1 %1618 }
0x11e2   :  { %v1621_v32 = vmul.f32 %v3839_v2, %v1619_v30 }
0x11e4   :  { %1623 = vrot.lane.b32.xlu1 %v1621_v32, %s3948_s19 }
0x11ef   :  { %v1368_v44 = vpop.permute.xlu0 %1367 }
0x11f0   :  { %v1370_v38 = vadd.f32 %v1368_v44, %v1360_v50 }
0x11f2   :  { %3840 = vtanh.f32 %v1370_v38 }
0x11fc   :  { %v3841_v17 = vpop.eup %3840 }
0x11fd   :  { %1373 = vrot.lane.b32.xlu0 %v3841_v17, %s3949_s0 }
0x1256   :  { %v1624_v42 = vpop.permute.xlu1 %1623 }
0x1257   :  { %v4400_v29 = vadd.f32 %v1624_v42, %v1616_v24 }
0x1259   :  { %3842 = vtanh.f32 %v4400_v29 }
0x1263   :  { %v3843_v40 = vpop.eup %3842 }
0x1264   :  { %1629 = vrot.lane.b32.xlu1 %v3843_v40, %s3949_s0  ;;  %v1404_v40 = vsub.f32 %v1370_v38, %v4389_v13 }
0x126f   :  { %v1374_v43 = vpop.permute.xlu0 %1373 }
0x1270   :  { %v1376_v57 = vmul.f32 %v3835_v48, %v1374_v43  ;;  %v1405_v43 = vmul.f32 %v1404_v40, %v4285_v1 }
0x1272   :  { %v1401_v45 = vsub.f32 %v1376_v57, %v4365_v10  ;;  %v4437_v57 = vadd.f32 %v1405_v43, %v4389_v13 }
0x1274   :  { %v1402_v31 = vmul.f32 %v1401_v45, %v4285_v1 }
0x1276   :  { %v4407_v52 = vadd.f32 %v1402_v31, %v4365_v10 }
0x1278   :  { %1430 = vrot.lane.b32.xlu0 %v4407_v52, %s3950_s6 }
0x12d6   :  { %v1630_v21 = vpop.permute.xlu1 %1629 }
0x12d7   :  { %v1632_v55 = vmul.f32 %v3839_v2, %v1630_v21 }
0x12d9   :  { %v1639_v36 = vsub.f32 %v1632_v55, %v4358_v33 }
0x12db   :  { %v1640_v7 = vmul.f32 %v1639_v36, %v4309_v23 }
0x12dd   :  { %v4414_v56 = vadd.f32 %v1640_v7, %v4358_v33 }
0x12df   :  { %1738 = vrot.lane.b32.xlu1 %v4414_v56, %s3948_s19 }
0x12ea   :  { %v1431_v48 = vpop.permute.xlu0 %1430 }
0x12eb   :  { %3559 = vmatmul.mubr.msk.f32.vlgmr.msra.gmra.mrb[14].mxu0 %vm70_vm1, %v1431_v48 }
0x12ec   :  { %3716 = vmatpush3.bf16.msra.mxu0 %v4040_v8  ;;  %3572 = vmatprep.mubr.msk.f32.mxu0 %vm3943_vm0, %v3944_v6 }
0x12ed   :  { %3720 = vmatprep.subr.bf16.mxu0 %v3942_v3 }
0x1351   :  { %v1739_v27 = vpop.permute.xlu1 %1738 }
0x1352   :  { %3580 = vmatmul.mubr.msk.f32.vlgmr.msra.gmra.mrb[16].mxu1 %vm70_vm1, %v1739_v27 }
0x1353   :  { %3725 = vmatpush3.bf16.msra.mxu1 %v4053_v12  ;;  %3593 = vmatprep.mubr.msk.f32.mxu1 %vm3943_vm0, %v3944_v6 }
0x1354   :  { %3616 = vmatprep.subr.mxu1 %v3944_v6 }
0x13be   :  { %v1500_v2 = vpop.f32.mrb[14].mxu0 }
0x13bf   :  { %v1504_v30 = vadd.f32 %v1500_v2, %v4109_v34  ;;  %v3560_v32 = vpop.f32.mrb[15].mxu0 }
0x13c1   :  { %3844 = vtanh.f32 %v1504_v30  ;;  %v3333_v9 = vmul.f32 -1.442695, %v1504_v30 }
0x13c3   :  { %3846 = vpow2.f32 %v3333_v9  ;;  %v1642_v9 = vsub.f32 %v4400_v29, %v4397_v20 }
0x13cb   :  { %v3845_v4 = vpop.eup %3844 }
0x13cc   :  { %1594 = vrot.lane.b32.xlu0 %v3845_v4, %s3947_s5 }
0x13cd   :  { %v3847_v12 = vpop.eup %3846 }
0x13ce   :  { %v1588_v44 = vadd.f32 1.0, %v3847_v12 }
0x13d0   :  { %3848 = vrcp.f32 %v1588_v44 }
0x13da   :  { %v3849_v17 = vpop.eup %3848 }
0x13db   :  { %v1592_v45 = vmul.f32 %v3849_v17, %v4437_v57 }
0x1425   :  { %v1808_v3 = vpop.f32.mrb[16].mxu1 }
0x1426   :  { %1813 = vrot.lane.b32.xlu1 %v1808_v3, %s3945_s1  ;;  %v3581_v50 = vpop.f32.mrb[17].mxu1  ;;  %v1643_v3 = vmul.f32 %v1642_v9, %v4309_v23 }
0x1428   :  { %v4453_v50 = vadd.f32 %v1643_v3, %v4397_v20 }
0x143e   :  { %v1595_v18 = vpop.permute.xlu0 %1594 }
0x143f   :  { %v1597_v47 = vmul.f32 %v3849_v17, %v1595_v18 }
0x1441   :  { %1599 = vrot.lane.b32.xlu0 %v1597_v47, %s3948_s19 }
0x1498   :  { %v1814_v34 = vpop.permute.xlu1 %1813 }
0x1499   :  { %v1816_v24 = vadd.f32 %v1814_v34, %v4099_v22 }
0x149b   :  { %3850 = vtanh.f32 %v1816_v24  ;;  %v3338_v22 = vmul.f32 -1.442695, %v1816_v24 }
0x14a5   :  { %v3851_v42 = vpop.eup %3850 }
0x14a6   :  { %1850 = vrot.lane.b32.xlu1 %v3851_v42, %s3947_s5 }
0x14b3   :  { %v1600_v31 = vpop.permute.xlu0 %1599 }
0x14b4   :  { %v1602_v21 = vadd.f32 %v1600_v31, %v1592_v45 }
0x14b6   :  { %3852 = vtanh.f32 %v1602_v21 }
0x14b7   :  { %3854 = vpow2.f32 %v3338_v22 }
0x14c0   :  { %v3853_v55 = vpop.eup %3852 }
0x14c1   :  { %1605 = vrot.lane.b32.xlu0 %v3853_v55, %s3949_s0  ;;  %v3855_v36 = vpop.eup %3854 }
0x14c2   :  { %v1844_v7 = vadd.f32 1.0, %v3855_v36 }
0x14c4   :  { %3856 = vrcp.f32 %v1844_v7 }
0x14ce   :  { %v3857_v48 = vpop.eup %3856 }
0x14cf   :  { %v1848_v12 = vmul.f32 %v3857_v48, %v4453_v50 }
0x1518   :  { %v1851_v38 = vpop.permute.xlu1 %1850 }
0x1519   :  { %v1853_v27 = vmul.f32 %v3857_v48, %v1851_v38 }
0x151b   :  { %1855 = vrot.lane.b32.xlu1 %v1853_v27, %s3948_s19 }
0x1533   :  { %v1606_v13 = vpop.permute.xlu0 %1605 }
0x1534   :  { %v1608_v2 = vmul.f32 %v3849_v17, %v1606_v13  ;;  %v1636_v13 = vsub.f32 %v1602_v21, %v4437_v57 }
0x1536   :  { %v1633_v30 = vsub.f32 %v1608_v2, %v4407_v52  ;;  %v1637_v2 = vmul.f32 %v1636_v13, %v4204_v19  ;;  %v681_v13 = vmul.f32 %v4246_v60, %v4242_v58  ;;  %v2172_v60 = vld [vmem:[%s4907_s8] sm:$0xff] }
0x1538   :  { %v1634_v32 = vmul.f32 %v1633_v30, %v4204_v19  ;;  %v4481_v30 = vadd.f32 %v1637_v2, %v4437_v57 }
0x153a   :  { %v4445_v4 = vadd.f32 %v1634_v32, %v4407_v52 }
0x153c   :  { %1662 = vrot.lane.b32.xlu0 %v4445_v4, %s3950_s6 }
0x158d   :  { %v1856_v44 = vpop.permute.xlu1 %1855 }
0x158e   :  { %v4456_v17 = vadd.f32 %v1856_v44, %v1848_v12 }
0x1590   :  { %3858 = vtanh.f32 %v4456_v17 }
0x159a   :  { %v3859_v18 = vpop.eup %3858 }
0x159b   :  { %1861 = vrot.lane.b32.xlu1 %v3859_v18, %s3949_s0 }
0x15ae   :  { %v1663_v47 = vpop.permute.xlu0 %1662 }
0x15af   :  { %3573 = vmatmul.mubr.msk.f32.vlgmr.msra.gmra.mrb[16].mxu0 %vm70_vm1, %v1663_v47 }
0x15b0   :  { %3722 = vmatpush3.bf16.msra.mxu0 %v4040_v8  ;;  %3586 = vmatprep.mubr.msk.f32.mxu0 %vm3943_vm0, %v3944_v6 }
0x160d   :  { %v1862_v20 = vpop.permute.xlu1 %1861 }
0x160e   :  { %v1864_v29 = vmul.f32 %v3857_v48, %v1862_v20 }
0x1610   :  { %v1871_v34 = vsub.f32 %v1864_v29, %v4414_v56 }
0x1612   :  { %v1872_v24 = vmul.f32 %v1871_v34, %v4242_v58 }
0x1614   :  { %v4467_v42 = vadd.f32 %v1872_v24, %v4414_v56 }
0x1616   :  { %1970 = vrot.lane.b32.xlu1 %v4467_v42, %s3948_s19 }
0x1682   :  { %v1732_v40 = vpop.f32.mrb[16].mxu0 }
0x1683   :  { %v1736_v43 = vadd.f32 %v1732_v40, %v4117_v41  ;;  %v3574_v45 = vpop.f32.mrb[17].mxu0 }
0x1685   :  { %3860 = vtanh.f32 %v1736_v43  ;;  %v3337_v55 = vmul.f32 -1.442695, %v1736_v43 }
0x1687   :  { %3862 = vpow2.f32 %v3337_v55  ;;  %v1874_v55 = vsub.f32 %v4456_v17, %v4453_v50 }
0x1688   :  { %v1971_v8 = vpop.permute.xlu1 %1970 }
0x1689   :  { %3594 = vmatmul.mubr.msk.f32.vlgmr.msra.gmra.mrb[18].mxu1 %vm70_vm1, %v1971_v8 }
0x168a   :  { %3618 = vmatprep.mubr.msk.f32.mxu1 %vm3943_vm0, %v3944_v6 }
0x168f   :  { %v3861_v31 = vpop.eup %3860 }
0x1690   :  { %1826 = vrot.lane.b32.xlu0 %v3861_v31, %s3947_s5 }
0x1691   :  { %v3863_v22 = vpop.eup %3862 }
0x1692   :  { %v1820_v36 = vadd.f32 1.0, %v3863_v22  ;;  %v1875_v22 = vmul.f32 %v1874_v55, %v4242_v58 }
0x1694   :  { %3864 = vrcp.f32 %v1820_v36  ;;  %v1876_v36 = vadd.f32 %v1875_v22, %v4453_v50 }
0x169e   :  { %v3865_v7 = vpop.eup %3864 }
0x169f   :  { %v1824_v32 = vmul.f32 %v3865_v7, %v4481_v30 }
0x1702   :  { %v1827_v48 = vpop.permute.xlu0 %1826 }
0x1703   :  { %v1829_v38 = vmul.f32 %v3865_v7, %v1827_v48 }
0x1705   :  { %1831 = vrot.lane.b32.xlu0 %v1829_v38, %s3948_s19 }
0x175c   :  { %v2040_v41 = vpop.f32.mrb[18].mxu1 }
0x175d   :  { %2045 = vrot.lane.b32.xlu1 %v2040_v41, %s3945_s1  ;;  %v3595_v27 = vpop.f32.mrb[19].mxu1 }
0x175e   :  { %v1884_v27 = vmul.f32 %v4467_v42, %v4242_v58 }
0x1777   :  { %v1832_v9 = vpop.permute.xlu0 %1831 }
0x1778   :  { %v4484_v3 = vadd.f32 %v1832_v9, %v1824_v32 }
0x177a   :  { %3866 = vtanh.f32 %v4484_v3 }
0x1784   :  { %v3867_v12 = vpop.eup %3866 }
0x1785   :  { %1837 = vrot.lane.b32.xlu0 %v3867_v12, %s3949_s0 }
0x17cf   :  { %v2046_v44 = vpop.permute.xlu1 %2045 }
0x17d0   :  { %v2048_v18 = vadd.f32 %v2046_v44, %v4101_v25 }
0x17d2   :  { %3868 = vtanh.f32 %v2048_v18  ;;  %v3342_v24 = vmul.f32 -1.442695, %v2048_v18 }
0x17d4   :  { %3870 = vpow2.f32 %v3342_v24 }
0x17dc   :  { %v3869_v21 = vpop.eup %3868 }
0x17dd   :  { %2082 = vrot.lane.b32.xlu1 %v3869_v21, %s3947_s5 }
0x17de   :  { %v3871_v40 = vpop.eup %3870 }
0x17df   :  { %v2076_v25 = vadd.f32 1.0, %v3871_v40  ;;  %v432_v40 = vmul.f32 %v4147_v11, %v4143_v5 }
0x17e1   :  { %3872 = vrcp.f32 %v2076_v25 }
0x17eb   :  { %v3873_v43 = vpop.eup %3872 }
0x17f7   :  { %v1838_v47 = vpop.permute.xlu0 %1837 }
0x17f8   :  { %v1840_v57 = vmul.f32 %v3865_v7, %v1838_v47  ;;  %v2080_v7 = vmul.f32 %v3873_v43, %v1876_v36  ;;  %v2173_v47 = vld [vmem:[%s4907_s8 + $0x8] sm:$0xff] }
0x17fa   :  { %v1865_v20 = vsub.f32 %v1840_v57, %v4445_v4  ;;  %v2174_v57 = vld [vmem:[%s4907_s8 + $0x10] sm:$0xff] }
0x17fc   :  { %v1866_v29 = vmul.f32 %v1865_v20, %v4180_v51  ;;  %v2175_v20 = vld [vmem:[%s4907_s8 + $0x18] sm:$0xff] }
0x17fd   :  { %v3730_v24 = vpack.c.bf16 %v2175_v20, %v2174_v57 }
0x17fe   :  { %v4493_v34 = vadd.f32 %v1866_v29, %v4445_v4 }
0x1800   :  { %1894 = vrot.lane.b32.xlu0 %v4493_v34, %s3950_s6 }
0x184f   :  { %v2083_v45 = vpop.permute.xlu1 %2082 }
0x1850   :  { %v2085_v8 = vmul.f32 %v3873_v43, %v2083_v45 }
0x1852   :  { %2087 = vrot.lane.b32.xlu1 %v2085_v8, %s3948_s19 }
0x1872   :  { %v1895_v31 = vpop.permute.xlu0 %1894 }
0x1873   :  { %3587 = vmatmul.mubr.msk.f32.vlgmr.msra.gmra.mrb[18].mxu0 %vm70_vm1, %v1895_v31 }
0x18c4   :  { %v2088_v48 = vpop.permute.xlu1 %2087 }
0x18c5   :  { %v2090_v38 = vadd.f32 %v2088_v48, %v2080_v7 }
0x18c7   :  { %3874 = vtanh.f32 %v2090_v38 }
0x18d1   :  { %v3875_v41 = vpop.eup %3874 }
0x18d2   :  { %2093 = vrot.lane.b32.xlu1 %v3875_v41, %s3949_s0 }
0x18d6   :  { %1886 = vrot.lane.b32.xlu1 %v1884_v27, %s3948_s19 }
0x18da   :  { %683 = vrot.lane.b32.xlu1 %v681_v13, %s3950_s6 }
0x1944   :  { %v2094_v17 = vpop.permute.xlu1 %2093 }
0x1945   :  { %v2096_v2 = vmul.f32 %v3873_v43, %v2094_v17  ;;  %v1652_v17 = vmul.f32 %v4414_v56, %v4309_v23 }
0x1946   :  { %v1964_v50 = vpop.f32.mrb[18].mxu0 }
0x1947   :  { %v2100_v32 = vsub.f32 %v2096_v2, %v4467_v42  ;;  %v3588_v9 = vpop.f32.mrb[19].mxu0  ;;  %v1968_v25 = vadd.f32 %v1964_v50, %v4115_v39  ;;  %v1188_v2 = vmul.f32 %v4298_v14, %v4285_v1  ;;  %v688_v50 = vmul.f32 %v4184_v54, %v4180_v51 }
0x1948   :  { %v1887_v12 = vpop.permute.xlu1 %1886 }
0x1949   :  { %v2101_v44 = vmul.f32 %v2100_v32, %v4143_v5  ;;  %1890 = vst.msk [vmem:[#allocation4 + $0x8] sm:$0xff] %vm70_vm1, %v1887_v12  ;;  %3876 = vtanh.f32 %v1968_v25  ;;  %v3341_v11 = vmul.f32 -1.442695, %v1968_v25  ;;  %v1868_v32 = vsub.f32 %v4484_v3, %v4481_v30 }
0x194a   :  { %v938_v3 = vmul.f32 %v4227_v49, %v4204_v19  ;;  %v1413_v49 = vmul.f32 %v4407_v52, %v4285_v1 }
0x194b   :  { %v2102_v18 = vadd.f32 %v2101_v44, %v4467_v42  ;;  %v3726_v42 = vpack.c.bf16 %v2173_v47, %v2172_v60  ;;  %3878 = vpow2.f32 %v3341_v11  ;;  %v1869_v9 = vmul.f32 %v1868_v32, %v4180_v51 }
0x194c   :  { %v684_v21 = vpop.permute.xlu1 %683  ;;  %v438_v60 = vmul.f32 %v4154_v16, %v4151_v15  ;;  %v931_v47 = vmul.f32 %v4313_v26, %v4309_v23  ;;  %v1645_v16 = vmul.f32 %v4445_v4, %v4204_v19  ;;  %v1877_v23 = vmul.f32 %v4493_v34, %v4180_v51  ;;  %v4596_v19 = vld [vmem:[%s4908_s9] ss:$0 sm:$0xff]  ;;  %v4601_v51 = vld [vmem:[%s4901_s2 + $0x8] sm:$0xff] }
0x194d   :  { %687 = vst.msk [vmem:[#allocation3 + $0x8] sm:$0xff] %vm70_vm1, %v684_v21  ;;  %v2110_v58 = vmul.f32 %v2102_v18, %v4143_v5  ;;  %3727 = vmatprep.subr.bf16.mxu0 %v3726_v42  ;;  %v1870_v12 = vadd.f32 %v1869_v9, %v4481_v30  ;;  %v1420_v30 = vmul.f32 %v4358_v33, %v4354_v61 }
0x194e   :  { %3729 = vmatpush3.bf16.msra.mxu0 %v3726_v42  ;;  %v1181_v33 = vmul.f32 %v4365_v10, %v4354_v61  ;;  %v50_v61 = vld [vmem:[%s4909_s10] sm:$0x1f] }
0x194f   :  { %2112 = vrot.lane.b32.xlu0 %v2110_v58, %s3948_s19  ;;  %3731 = vmatprep.subr.bf16.mxu0 %v3730_v24  ;;  %v2587_v1 = vsel %vm2586_vm11, %v50_v61, -inf  ;;  %v4607_v42 = vld [vmem:[%s4901_s2] sm:$0xff] }
0x1950   :  { %v2125_v29 = vld [vmem:[#allocation4 + $0x8] sm:$0xff]  ;;  %v2588_v10 = vrot.slane %v2587_v1, 4  ;;  %3617 = vmatpush3.msk.msra.mxu1 %vm2402_vm13, %v50_v61 }
0x1951   :  { %2142 = vrot.lane.b32.xlu1 %v2125_v29, %s3948_s19  ;;  %3619 = vmatmul.mubr.msk.f32.vlgmr.msra.gmra.mrb[20].mxu1 %vm2313_vm12, %v4607_v42 }
0x1952   :  { %3733 = vmatpush3.bf16.msra.mxu0 %v3730_v24  ;;  %v2589_v20 = vmax.f32 %v2587_v1, %v2588_v10  ;;  %3621 = vmatprep.mubr.msk.f32.mxu1 %vm3943_vm0, %v3944_v6 }
0x1953   :  { %434 = vrot.lane.b32.xlu0 %v432_v40, %s3950_s6  ;;  %3639 = vmatprep.subr.mxu0 %v3944_v6  ;;  %v3877_v5 = vpop.eup %3876 }
0x1954   :  { %v2117_v7 = vld [vmem:[#allocation3 + $0x8] sm:$0xff]  ;;  %3654 = vmatprep.subr.mxu1 %v3944_v6 }
0x1955   :  { %v3879_v31 = vpop.eup %3878  ;;  %3622 = vmatmul.mubr.msk.f32.gmra.mrb[22].mxu1 %vm2313_vm12, %v4601_v51 }
0x1956   :  { %v2052_v55 = vadd.f32 1.0, %v3879_v31  ;;  %3624 = vmatprep.mubr.msk.f32.mxu1 %vm3943_vm0, %v3944_v6 }
0x1958   :  { %3880 = vrcp.f32 %v2052_v55 }
0x1962   :  { %v4543_v41 = vpop.eup %3880 }
0x1963   :  { %v2056_v56 = vmul.f32 %v4543_v41, %v1870_v12 }
0x19c1   :  { %v2113_v43 = vpop.permute.xlu0 %2112 }
0x19c2   :  { %2115 = vst.msk [vmem:[#allocation4] sm:$0xff] %vm70_vm1, %v2113_v43  ;;  %v2590_v43 = vrot.slane %v2589_v20, 2 }
0x19c3   :  { %v2143_v22 = vpop.permute.xlu1 %2142 }
0x19c4   :  { %v2165_v38 = vsel %vm70_vm1, %v2117_v7, %v2143_v22  ;;  %v2591_v11 = vmax.f32 %v2589_v20, %v2590_v43 }
0x19c5   :  { %v435_v45 = vpop.permute.xlu0 %434 }
0x19c6   :  { %437 = vst.msk [vmem:[#allocation3] sm:$0xff] %vm70_vm1, %v435_v45  ;;  %v2592_v22 = vrot.slane %v2591_v11, 1 }
0x19c9   :  { %v2124_v8 = vld [vmem:[#allocation4] sm:$0xff] }
0x19ca   :  { %2140 = vrot.lane.b32.xlu0 %v2124_v8, %s3948_s19 }
0x19cd   :  { %v2116_v39 = vld [vmem:[#allocation3] sm:$0xff] }
0x19ce   :  { %2058 = vrot.lane.b32.xlu0 %v3877_v5, %s3947_s5  ;;  %v4621_v5 = vld [vmem:[%s4910_s11] ss:$0 sm:$0xff] }
0x1a3c   :  { %v2141_v36 = vpop.permute.xlu0 %2140 }
0x1a3d   :  { %v2164_v48 = vsel %vm70_vm1, %v2116_v39, %v2141_v36  ;;  %v4628_v36 = vmax.f32 %v2591_v11, %v2592_v22  ;;  %v4700_v22 = vld [vmem:[%s4901_s2 + $0x10] sm:$0xff] }
0x1a3e   :  { %3604 = vmatprep.mubr.msk.f32.mxu0 %vm2183_vm10, %v2164_v48  ;;  %3625 = vmatmul.mubr.msk.f32.gmra.mrb[24].mxu1 %vm2313_vm12, %v4700_v22 }
0x1a3f   :  { %3605 = vmatmul.mubr.msk.f32.vlgmr.msra.gmra.mrb[20].mxu0 %vm2183_vm10, %v2165_v38  ;;  %v2594_v7 = vsub.f32 %v50_v61, %v4628_v36  ;;  %3627 = vmatprep.mubr.msk.f32.mxu1 %vm3943_vm0, %v3944_v6 }
0x1a40   :  { %v2059_v27 = vpop.permute.xlu0 %2058 }
0x1a41   :  { %v2061_v13 = vmul.f32 %v4543_v41, %v2059_v27  ;;  %v2595_v48 = vmul.f32 1.442695, %v2594_v7  ;;  %v4718_v7 = vld [vmem:[%s4901_s2 + $0x20] sm:$0xff] }
0x1a43   :  { %2063 = vrot.lane.b32.xlu1 %v2061_v13, %s3948_s19 }
0x1a47   :  { %1654 = vrot.lane.b32.xlu1 %v1652_v17, %s3948_s19 }
0x1a4b   :  { %1190 = vrot.lane.b32.xlu1 %v1188_v2, %s3948_s19 }
0x1a4f   :  { %690 = vrot.lane.b32.xlu1 %v688_v50, %s3948_s19 }
0x1ab5   :  { %v2064_v44 = vpop.permute.xlu1 %2063 }
0x1ab6   :  { %v2066_v18 = vadd.f32 %v2064_v44, %v2056_v56 }
0x1ab8   :  { %3882 = vtanh.f32 %v2066_v18  ;;  %v2782_v18 = vsel %vm2781_vm14, 1, %v3946_v37 }
0x1ab9   :  { %v1655_v14 = vpop.permute.xlu1 %1654  ;;  %3884 = vpow2.f32 %v2595_v48  ;;  %v4727_v48 = vld [vmem:[%s4901_s2 + $0x28] sm:$0xff] }
0x1aba   :  { %1658 = vst.msk [vmem:[#allocation4 + $0x10] sm:$0xff] %vm70_vm1, %v1655_v14 }
0x1abd   :  { %v1191_v21 = vpop.permute.xlu1 %1190 }
0x1abe   :  { %1194 = vst.msk [vmem:[#allocation4 + $0x20] sm:$0xff] %vm70_vm1, %v1191_v21 }
0x1ac1   :  { %v691_v54 = vpop.permute.xlu1 %690  ;;  %v2126_v26 = vld [vmem:[#allocation4 + $0x10] sm:$0xff] }
0x1ac2   :  { %v3883_v58 = vpop.eup %3882  ;;  %694 = vst.msk [vmem:[#allocation4 + $0x30] sm:$0xff] %vm70_vm1, %v691_v54 }
0x1ac3   :  { %2069 = vrot.lane.b32.xlu0 %v3883_v58, %s3949_s0  ;;  %v4632_v13 = vpop.eup %3884  ;;  %s3918_s0 = scalar_lea.vmem %s3289_s18, 16 }
0x1ac4   :  { %3640 = vmatpush3.msk.msra.mxu0 %vm2402_vm13, %v4632_v13  ;;  %3655 = vmatpush3.msk.msra.mxu1 %vm2402_vm13, %v4632_v13  ;;  %p3919_p0 = scmp.ne.s32.totalorder %s3289_s18, %s3918_s0 }
0x1ac5   :  { %3644 = vmatprep.subr.mxu0 %v3944_v6  ;;  %3664 = vmatprep.subr.mxu1 %v3944_v6  ;;  %v2128_v44 = vld [vmem:[#allocation4 + $0x20] sm:$0xff] }
0x1ac7   :  { %1422 = vrot.lane.b32.xlu0 %v1420_v30, %s3948_s19  ;;  %v2689_v30 = vsel %vm2688_vm15, 1, %v3946_v37 }
0x1ac9   :  { %v2130_v21 = vld [vmem:[#allocation4 + $0x30] sm:$0xff] }
0x1acb   :  { %940 = vrot.lane.b32.xlu0 %v938_v3, %s3948_s19 }
0x1acf   :  { %440 = vrot.lane.b32.xlu0 %v438_v60, %s3948_s19 }
0x1ad3   :  { %933 = vrot.lane.b32.xlu0 %v931_v47, %s3950_s6 }
0x1ad7   :  { %1183 = vrot.lane.b32.xlu0 %v1181_v33, %s3950_s6 }
0x1adb   :  { %1415 = vrot.lane.b32.xlu0 %v1413_v49, %s3950_s6 }
0x1adf   :  { %1647 = vrot.lane.b32.xlu0 %v1645_v16, %s3950_s6 }
0x1ae3   :  { %1879 = vrot.lane.b32.xlu0 %v1877_v23, %s3950_s6 }
0x1ae7   :  { %2144 = vrot.lane.b32.xlu0 %v2126_v26, %s3948_s19 }
0x1b12   :  { %v3606_v52 = vpop.f32.mrb[20].mxu0 }
0x1b13   :  { %v2280_v4 = vadd.f32 %v3606_v52, %v4596_v19  ;;  %v2274_v57 = vpop.f32.mrb[21].mxu0 }
0x1b14   :  { %v2275_v29 = vadd.f32 %v4596_v19, %v2274_v57 }
0x1b15   :  { %2315 = vst.msk [vmem:[#allocation5 + $0x8] sm:$0xff] %vm2313_vm12, %v2280_v4  ;;  %v2349_v24 = vmul.f32 %v4601_v51, %v2280_v4 }
0x1b16   :  { %2314 = vst.msk [vmem:[#allocation5] sm:$0xff] %vm2313_vm12, %v2275_v29  ;;  %v2348_v40 = vmul.f32 %v4607_v42, %v2275_v29 }
0x1b17   :  { %v2357_v25 = vsel %vm2313_vm12, %v2349_v24, 0.0 }
0x1b18   :  { %v2356_v45 = vsel %vm2313_vm12, %v2348_v40, 0.0 }
0x1b19   :  { %v4616_v8 = vadd.f32 %v2357_v25, %v2356_v45 }
0x1b1d   :  { %v2597_v31 = vld [vmem:[#allocation5] sm:$0xff] }
0x1b1e   :  { %v4624_v55 = vadd.f32 %v4621_v5, %v2597_v31 }
0x1b20   :  { %v2599_v39 = vsel %vm2313_vm12, %v4624_v55, -inf }
0x1b21   :  { %2600 = vmax.xlane.f32.xlu1 %v2599_v39  ;;  %v4709_v39 = vld [vmem:[%s4901_s2 + $0x18] sm:$0xff] }
0x1b22   :  { %3628 = vmatmul.mubr.msk.f32.gmra.mrb[26].mxu1 %vm2313_vm12, %v4709_v39 }
0x1b23   :  { %3630 = vmatprep.mubr.msk.f32.mxu1 %vm3943_vm0, %v3944_v6 }
0x1b26   :  { %3631 = vmatmul.mubr.msk.f32.gmra.mrb[28].mxu1 %vm2313_vm12, %v4718_v7 }
0x1b27   :  { %3633 = vmatprep.mubr.msk.f32.mxu1 %vm3943_vm0, %v3944_v6 }
0x1b2a   :  { %3634 = vmatmul.mubr.msk.f32.gmra.mrb[30].mxu1 %vm2313_vm12, %v4727_v48 }
0x1b2b   :  { %3636 = vmatprep.mubr.msk.f32.mxu1 %vm3943_vm0, %v3944_v6 }
0x1b35   :  { %v2070_v38 = vpop.permute.xlu0 %2069 }
0x1b36   :  { %v2072_v27 = vmul.f32 %v4543_v41, %v2070_v38  ;;  %v4736_v38 = vld [vmem:[%s4901_s2 + $0x30] sm:$0xff] }
0x1b37   :  { %3637 = vmatmul.mubr.msk.f32.gmra.mrb[32].mxu1 %vm2313_vm12, %v4736_v38 }
0x1b38   :  { %v2097_v17 = vsub.f32 %v2072_v27, %v4493_v34  ;;  %3656 = vmatprep.mubr.msk.f32.mxu1 %vm3943_vm0, %v3944_v6 }
0x1b39   :  { %v1423_v2 = vpop.permute.xlu0 %1422 }
0x1b3a   :  { %v2098_v50 = vmul.f32 %v2097_v17, %v4151_v15  ;;  %1426 = vst.msk [vmem:[#allocation4 + $0x18] sm:$0xff] %vm70_vm1, %v1423_v2 }
0x1b3c   :  { %v2099_v41 = vadd.f32 %v2098_v50, %v4493_v34 }
0x1b3d   :  { %v941_v32 = vpop.permute.xlu0 %940 }
0x1b3e   :  { %944 = vst.msk [vmem:[#allocation4 + $0x28] sm:$0xff] %vm70_vm1, %v941_v32  ;;  %v2103_v9 = vmul.f32 %v2099_v41, %v4151_v15 }
0x1b40   :  { %2105 = vrot.lane.b32.xlu0 %v2103_v9, %s3950_s6  ;;  %s3922_s6 = scalar_lea.vmem %s3289_s18, 32 }
0x1b41   :  { %v441_v34 = vpop.permute.xlu0 %440  ;;  %v2127_v12 = vld [vmem:[#allocation4 + $0x18] sm:$0xff]  ;;  %p3924_p2 = scmp.lt.s32.totalorder %s3922_s6, %s3918_s0 }
0x1b42   :  { %444 = vst.msk [vmem:[#allocation4 + $0x38] sm:$0xff] %vm70_vm1, %v441_v34 }
0x1b43   :  { %p3925_p3 = por %p3924_p2, %p3923_p1 }
0x1b44   :  { %2146 = vrot.lane.b32.xlu0 %v2127_v12, %s3948_s19 }
0x1b45   :  { %v934_v56 = vpop.permute.xlu0 %933  ;;  %v2129_v15 = vld [vmem:[#allocation4 + $0x28] sm:$0xff]  ;;  %p3926_p4 = pnand %p3925_p3, %p3919_p0 }
0x1b46   :  { %937 = vst.msk [vmem:[#allocation3 + $0x10] sm:$0xff] %vm70_vm1, %v934_v56  ;;  %2150 = vrot.lane.b32.xlu1 %v2129_v15, %s3948_s19 }
0x1b48   :  { %2148 = vrot.lane.b32.xlu0 %v2128_v44, %s3948_s19 }
0x1b49   :  { %v1184_v14 = vpop.permute.xlu0 %1183  ;;  %v2131_v46 = vld [vmem:[#allocation4 + $0x38] sm:$0xff] }
0x1b4a   :  { %1187 = vst.msk [vmem:[#allocation3 + $0x18] sm:$0xff] %vm70_vm1, %v1184_v14  ;;  %2784 = vperm.xlu1 %3754, %v2782_v18  }
0x1b4c   :  { %2152 = vrot.lane.b32.xlu0 %v2130_v21, %s3948_s19 }
0x1b4d   :  { %v1416_v54 = vpop.permute.xlu0 %1415  ;;  %v2118_v60 = vld [vmem:[#allocation3 + $0x10] sm:$0xff] }
0x1b4e   :  { %1419 = vst.msk [vmem:[#allocation3 + $0x20] sm:$0xff] %vm70_vm1, %v1416_v54 }
0x1b50   :  { %2154 = vrot.lane.b32.xlu0 %v2131_v46, %s3948_s19 }
0x1b51   :  { %v1648_v58 = vpop.permute.xlu0 %1647  ;;  %v2119_v23 = vld [vmem:[#allocation3 + $0x18] sm:$0xff] }
0x1b52   :  { %1651 = vst.msk [vmem:[#allocation3 + $0x28] sm:$0xff] %vm70_vm1, %v1648_v58 }
0x1b54   :  { %2691 = vperm.xlu0 %3755, %v2689_v30  }
0x1b55   :  { %v1880_v3 = vpop.permute.xlu0 %1879  ;;  %v2120_v52 = vld [vmem:[#allocation3 + $0x20] sm:$0xff] }
0x1b56   :  { %1883 = vst.msk [vmem:[#allocation3 + $0x30] sm:$0xff] %vm70_vm1, %v1880_v3 }
0x1b59   :  { %v2145_v47 = vpop.permute.xlu0 %2144  ;;  %v2121_v57 = vld [vmem:[#allocation3 + $0x28] sm:$0xff] }
0x1b5a   :  { %v2166_v33 = vsel %vm70_vm1, %v2118_v60, %v2145_v47  ;;  %v4763_v47 = vld [vmem:[%s4901_s2 + $0x38] sm:$0xff] }
0x1b5b   :  { %3607 = vmatprep.mubr.msk.f32.mxu0 %vm2183_vm10, %v2166_v33 }
0x1b5d   :  { %v2122_v24 = vld [vmem:[#allocation3 + $0x30] sm:$0xff] }
0x1bae   :  { %v4674_v63 = vpop.xlane.xlu1 %2600 }
0x1baf   :  { %v2602_v16 = vsub.f32 %v4624_v55, %v4674_v63 }
0x1bb1   :  { %v2603_v1 = vmul.f32 1.442695, %v2602_v16 }
0x1bb2   :  { %v2106_v49 = vpop.permute.xlu0 %2105 }
0x1bb3   :  { %2109 = vst.msk [vmem:[#allocation3 + $0x38] sm:$0xff] %vm70_vm1, %v2106_v49  ;;  %3886 = vpow2.f32 %v2603_v1 }
0x1bb6   :  { %v2147_v26 = vpop.permute.xlu0 %2146 }
0x1bb7   :  { %v2167_v61 = vsel %vm70_vm1, %v2119_v23, %v2147_v26 }
0x1bb8   :  { %3608 = vmatmul.mubr.msk.f32.gmra.mrb[22].mxu0 %vm2183_vm10, %v2167_v61  ;;  %v2151_v10 = vpop.permute.xlu1 %2150 }
0x1bb9   :  { %v2169_v29 = vsel %vm70_vm1, %v2121_v57, %v2151_v10  ;;  %v2681_v57 = vadd.f32 %v4674_v63, %v4628_v36 }
0x1bba   :  { %v2149_v4 = vpop.permute.xlu0 %2148  ;;  %v2123_v43 = vld [vmem:[#allocation3 + $0x38] sm:$0xff] }
0x1bbb   :  { %v2168_v20 = vsel %vm70_vm1, %v2120_v52, %v2149_v4 }
0x1bbc   :  { %3610 = vmatprep.mubr.msk.f32.mxu0 %vm2183_vm10, %v2168_v20 }
0x1bbd   :  { %3611 = vmatmul.mubr.msk.f32.gmra.mrb[24].mxu0 %vm2183_vm10, %v2169_v29  ;;  %v3887_v31 = vpop.eup %3886 }
0x1bbe   :  { %v2153_v40 = vpop.permute.xlu0 %2152 }
0x1bbf   :  { %v2170_v25 = vsel %vm70_vm1, %v2122_v24, %v2153_v40  ;;  %v2686_v40 = vld [vmem:[#allocation5 + $0x8] sm:$0xff] }
0x1bc0   :  { %3613 = vmatprep.mubr.msk.f32.mxu0 %vm2183_vm10, %v2170_v25 }
0x1bc2   :  { %v2155_v45 = vpop.permute.xlu0 %2154 }
0x1bc3   :  { %v2171_v11 = vsel %vm70_vm1, %v2123_v43, %v2155_v45 }
0x1bc4   :  { %3614 = vmatmul.mubr.msk.f32.gmra.mrb[26].mxu0 %vm2183_vm10, %v2171_v11  ;;  %v2875_v11 = vsel %vm2874_vm2, 1, %v3946_v37 }
0x1bc5   :  { %3641 = vmatprep.mubr.msk.f32.mxu0 %vm3943_vm0, %v3944_v6 }
0x1bc8   :  { %3642 = vmatmul.mubr.msk.f32.vlgmr.msra.gmra.mrb[28].mxu0 %vm2313_vm12, %v3887_v31 }
0x1bc9   :  { %3645 = vmatpush3.msk.msra.mxu0 %vm2402_vm13, %v4632_v13  ;;  %3646 = vmatprep.mubr.msk.f32.mxu0 %vm3943_vm0, %v3944_v6 }
0x1bca   :  { %3649 = vmatprep.subr.mxu0 %v3944_v6 }
0x1bd3   :  { %v2692_v29 = vpop.permute.xlu0 %2691 }
0x1bd4   :  { %vm2693_vm1 = vcmp.eq.s32.totalorder %v2692_v29, 1 }
0x1c8b   :  { %v3609_v27 = vpop.f32.mrb[22].mxu0 }
0x1c8c   :  { %v2290_v17 = vadd.f32 %v3609_v27, %v4596_v19  ;;  %v2284_v2 = vpop.f32.mrb[23].mxu0 }
0x1c8d   :  { %v2285_v50 = vadd.f32 %v4596_v19, %v2284_v2 }
0x1c8e   :  { %2317 = vst.msk [vmem:[#allocation5 + $0x18] sm:$0xff] %vm2313_vm12, %v2290_v17  ;;  %v2351_v41 = vmul.f32 %v4709_v39, %v2290_v17 }
0x1c8f   :  { %2316 = vst.msk [vmem:[#allocation5 + $0x10] sm:$0xff] %vm2313_vm12, %v2285_v50  ;;  %v2350_v32 = vmul.f32 %v4700_v22, %v2285_v50 }
0x1c90   :  { %v3612_v9 = vpop.f32.mrb[24].mxu0  ;;  %v2361_v18 = vsel %vm2313_vm12, %v2351_v41, 0.0 }
0x1c91   :  { %v2359_v34 = vsel %vm2313_vm12, %v2350_v32, 0.0  ;;  %v2300_v12 = vadd.f32 %v3612_v9, %v4596_v19  ;;  %v2294_v56 = vpop.f32.mrb[25].mxu0  ;;  %v2785_v32 = vpop.permute.xlu1 %2784 }
0x1c92   :  { %v2360_v15 = vadd.f32 %v2359_v34, %v4616_v8  ;;  %v2295_v44 = vadd.f32 %v4596_v19, %v2294_v56  ;;  %vm2786_vm3 = vcmp.eq.s32.totalorder %v2785_v32, 1 }
0x1c93   :  { %2319 = vst.msk [vmem:[#allocation5 + $0x28] sm:$0xff] %vm2313_vm12, %v2300_v12  ;;  %v2353_v14 = vmul.f32 %v4727_v48, %v2300_v12 }
0x1c94   :  { %2318 = vst.msk [vmem:[#allocation5 + $0x20] sm:$0xff] %vm2313_vm12, %v2295_v44  ;;  %v2352_v21 = vmul.f32 %v4718_v7, %v2295_v44  ;;  %v2362_v54 = vadd.f32 %v2361_v18, %v2360_v15 }
0x1c95   :  { %v2365_v3 = vsel %vm2313_vm12, %v2353_v14, 0.0 }
0x1c96   :  { %v2363_v46 = vsel %vm2313_vm12, %v2352_v21, 0.0  ;;  %v2779_v34 = vld [vmem:[#allocation5 + $0x10] sm:$0xff] }
0x1c97   :  { %v2364_v58 = vadd.f32 %v2363_v46, %v2362_v54  ;;  %v3615_v30 = vpop.f32.mrb[26].mxu0 }
0x1c98   :  { %v2310_v8 = vadd.f32 %v3615_v30, %v4596_v19  ;;  %v2304_v60 = vpop.f32.mrb[27].mxu0 }
0x1c99   :  { %v2305_v33 = vadd.f32 %v4596_v19, %v2304_v60  ;;  %v2366_v49 = vadd.f32 %v2365_v3, %v2364_v58 }
0x1c9a   :  { %2321 = vst.msk [vmem:[#allocation5 + $0x38] sm:$0xff] %vm2313_vm12, %v2310_v8  ;;  %v2355_v26 = vmul.f32 %v4763_v47, %v2310_v8 }
0x1c9b   :  { %2320 = vst.msk [vmem:[#allocation5 + $0x30] sm:$0xff] %vm2313_vm12, %v2305_v33  ;;  %v2354_v16 = vmul.f32 %v4736_v38, %v2305_v33  ;;  %v2677_v23 = vpop.f32.mrb[28].mxu0  ;;  %v2872_v33 = vld [vmem:[#allocation5 + $0x18] sm:$0xff] }
0x1c9c   :  { %3888 = vlog2.f32 %v2677_v23  ;;  %v3643_v61 = vpop.f32.mrb[29].mxu0  ;;  %v2369_v52 = vsel %vm2313_vm12, %v2355_v26, 0.0  ;;  %v2968_v26 = vsel %vm2967_vm5, 1, %v3946_v37 }
0x1c9d   :  { %v2367_v1 = vsel %vm2313_vm12, %v2354_v16, 0.0  ;;  %v3061_v61 = vsel %vm3060_vm6, 1, %v3946_v37 }
0x1c9e   :  { %v2368_v10 = vadd.f32 %v2367_v1, %v2366_v49  ;;  %v2472_v1 = vpop.f32.mrb[20].mxu1 }
0x1ca0   :  { %v4772_v4 = vadd.f32 %v2369_v52, %v2368_v10  ;;  %v2506_v10 = vmul.f32 %v2472_v1, %v4601_v51  ;;  %v3620_v52 = vpop.f32.mrb[21].mxu1 }
0x1ca6   :  { %v3889_v19 = vpop.eup %3888 }
0x1ca7   :  { %v2683_v20 = vmul.f32 0.6931472, %v3889_v19  ;;  %v2477_v19 = vpop.f32.mrb[22].mxu1 }
0x1ca8   :  { %v3623_v29 = vpop.f32.mrb[23].mxu1 }
0x1ca9   :  { %v2684_v24 = vadd.f32 %v2683_v20, %v2681_v57  ;;  %v2513_v57 = vsel %vm2313_vm12, %v2506_v10, 0.0  ;;  %v2507_v20 = vmul.f32 %v2477_v19, %v4700_v22 }
0x1cab   :  { %v2687_v25 = vadd.f32 %v2686_v40, %v2684_v24  ;;  %v2482_v24 = vpop.f32.mrb[24].mxu1  ;;  %v2514_v35 = vsel %vm2313_vm12, %v2507_v20, 0.0  ;;  %v3058_v20 = vld [vmem:[#allocation5 + $0x28] sm:$0xff] }
0x1cac   :  { %v2508_v40 = vmul.f32 %v2482_v24, %v4709_v39  ;;  %v3626_v0 = vpop.f32.mrb[25].mxu1 }
0x1cad   :  { %v2694_v43 = vsel %vm2693_vm1, %v2687_v25, %v4624_v55  ;;  %v2515_v25 = vadd.f32 %v2514_v35, %v2513_v57 }
0x1cae   :  { %v2695_v45 = vsel %vm2313_vm12, %v2694_v43, -inf }
0x1caf   :  { %2696 = vmax.xlane.f32.xlu0 %v2695_v45  ;;  %v2516_v45 = vsel %vm2313_vm12, %v2508_v40, 0.0 }
0x1cc5   :  { %2877 = vperm.xlu0 %3755, %v2875_v11  }
0x1d3c   :  { %v2697_v31 = vpop.xlane.xlu0 %2696 }
0x1d3d   :  { %v2698_v27 = vsub.f32 %v2694_v43, %v2697_v31  ;;  %v2774_v50 = vadd.f32 %v2697_v31, %v4628_v36  ;;  %v2517_v31 = vadd.f32 %v2516_v45, %v2515_v25 }
0x1d3f   :  { %v2699_v17 = vmul.f32 1.442695, %v2698_v27 }
0x1d41   :  { %3890 = vpow2.f32 %v2699_v17 }
0x1d44   :  { %v2878_v8 = vpop.permute.xlu0 %2877 }
0x1d45   :  { %vm2879_vm4 = vcmp.eq.s32.totalorder %v2878_v8, 1 }
0x1d4b   :  { %v3891_v63 = vpop.eup %3890 }
0x1d4c   :  { %3647 = vmatmul.mubr.msk.f32.vlgmr.msra.gmra.mrb[30].mxu0 %vm2313_vm12, %v3891_v63 }
0x1d4d   :  { %3650 = vmatpush3.msk.msra.mxu0 %vm2402_vm13, %v4632_v13  ;;  %3651 = vmatprep.mubr.msk.f32.mxu0 %vm3943_vm0, %v3944_v6 }
0x1d4e   :  { %3659 = vmatprep.subr.mxu0 %v3944_v6 }
0x1e1f   :  { %v2770_v55 = vpop.f32.mrb[30].mxu0 }
0x1e20   :  { %3892 = vlog2.f32 %v2770_v55  ;;  %v3648_v59 = vpop.f32.mrb[31].mxu0 }
0x1e2a   :  { %v3893_v2 = vpop.eup %3892 }
0x1e2b   :  { %v2776_v41 = vmul.f32 0.6931472, %v3893_v2 }
0x1e2d   :  { %v2777_v9 = vadd.f32 %v2776_v41, %v2774_v50 }
0x1e2f   :  { %v2780_v12 = vadd.f32 %v2779_v34, %v2777_v9 }
0x1e31   :  { %v2787_v56 = vsel %vm2786_vm3, %v2780_v12, %v2694_v43  ;;  %v2487_v43 = vpop.f32.mrb[26].mxu1 }
0x1e32   :  { %v2788_v15 = vsel %vm2313_vm12, %v2787_v56, -inf  ;;  %v2509_v11 = vmul.f32 %v2487_v43, %v4718_v7  ;;  %v3629_v51 = vpop.f32.mrb[27].mxu1 }
0x1e33   :  { %2789 = vmax.xlane.f32.xlu1 %v2788_v15  ;;  %v2492_v27 = vpop.f32.mrb[28].mxu1 }
0x1e34   :  { %v2518_v17 = vsel %vm2313_vm12, %v2509_v11, 0.0  ;;  %v2510_v22 = vmul.f32 %v2492_v27, %v4727_v48  ;;  %v3632_v63 = vpop.f32.mrb[29].mxu1 }
0x1e35   :  { %v2519_v55 = vadd.f32 %v2518_v17, %v2517_v31  ;;  %v2497_v59 = vpop.f32.mrb[30].mxu1  ;;  %v3151_v17 = vld [vmem:[#allocation5 + $0x30] sm:$0xff] }
0x1e36   :  { %v2520_v2 = vsel %vm2313_vm12, %v2510_v22, 0.0  ;;  %v2511_v39 = vmul.f32 %v2497_v59, %v4736_v38  ;;  %v3635_v50 = vpop.f32.mrb[31].mxu1 }
0x1e37   :  { %v2521_v41 = vadd.f32 %v2520_v2, %v2519_v55  ;;  %v2502_v32 = vpop.f32.mrb[32].mxu1 }
0x1e38   :  { %v2522_v9 = vsel %vm2313_vm12, %v2511_v39, 0.0  ;;  %v2512_v7 = vmul.f32 %v2502_v32, %v4763_v47  ;;  %v3638_v34 = vpop.f32.mrb[33].mxu1  ;;  %v2536_v32 = vld [vmem:[%s4902_s3] sm:$0xff] }
0x1e39   :  { %v2523_v12 = vadd.f32 %v2522_v9, %v2521_v41  ;;  %v2537_v9 = vld [vmem:[%s4902_s3 + $0x8] sm:$0xff]  ;;  %v3361_v34 = vld [vmem:[%s4911_s12] ss:$0 sm:$0xff] }
0x1ec0   :  { %v2790_v44 = vpop.xlane.xlu1 %2789 }
0x1ec1   :  { %v2791_v18 = vsub.f32 %v2787_v56, %v2790_v44  ;;  %v2867_v30 = vadd.f32 %v2790_v44, %v4628_v36 }
0x1ec3   :  { %v2792_v14 = vmul.f32 1.442695, %v2791_v18 }
0x1ec5   :  { %3894 = vpow2.f32 %v2792_v14 }
0x1ecf   :  { %v3895_v21 = vpop.eup %3894 }
0x1ed0   :  { %3652 = vmatmul.mubr.msk.f32.vlgmr.msra.gmra.mrb[32].mxu0 %vm2313_vm12, %v3895_v21 }
0x1ed1   :  { %3660 = vmatpush3.msk.msra.mxu0 %vm2402_vm13, %v4632_v13  ;;  %3661 = vmatprep.mubr.msk.f32.mxu0 %vm3943_vm0, %v3944_v6 }
0x1ed2   :  { %3669 = vmatprep.subr.mxu0 %v3944_v6 }
0x1fa3   :  { %v2863_v54 = vpop.f32.mrb[32].mxu0 }
0x1fa4   :  { %3896 = vlog2.f32 %v2863_v54  ;;  %v3653_v46 = vpop.f32.mrb[33].mxu0 }
0x1fae   :  { %v3897_v58 = vpop.eup %3896 }
0x1faf   :  { %v2869_v3 = vmul.f32 0.6931472, %v3897_v58 }
0x1fb1   :  { %v2870_v60 = vadd.f32 %v2869_v3, %v2867_v30  ;;  %v2965_v3 = vld [vmem:[#allocation5 + $0x20] sm:$0xff] }
0x1fb3   :  { %v2873_v49 = vadd.f32 %v2872_v33, %v2870_v60 }
0x1fb5   :  { %v4795_v16 = vsel %vm2879_vm4, %v2873_v49, %v2787_v56  ;;  %v2524_v56 = vsel %vm2313_vm12, %v2512_v7, 0.0  ;;  %v3154_v49 = vsel %vm3153_vm8, 1, %v3946_v37 }
0x1fb6   :  { %v2881_v23 = vsel %vm2313_vm12, %v4795_v16, -inf  ;;  %v4817_v15 = vadd.f32 %v2524_v56, %v2523_v12  ;;  %v2550_v12 = vmul.f32 %v3361_v34, %v2536_v32  ;;  %v2551_v56 = vmul.f32 %v3361_v34, %v2537_v9 }
0x1fb7   :  { %2882 = vmax.xlane.f32.xlu1 %v2881_v23  ;;  %v3247_v23 = vsel %vm3246_vm9, 1, %v3946_v37 }
0x1fc8   :  { %2970 = vperm.xlu1 %3754, %v2968_v26  }
0x1fcc   :  { %3063 = vperm.xlu1 %3754, %v3061_v61  }
0x2044   :  { %v2883_v48 = vpop.xlane.xlu1 %2882 }
0x2045   :  { %v2884_v44 = vsub.f32 %v4795_v16, %v2883_v48  ;;  %v2960_v54 = vadd.f32 %v2883_v48, %v4628_v36  ;;  %v2538_v48 = vld [vmem:[%s4902_s3 + $0x10] sm:$0xff] }
0x2047   :  { %v2885_v18 = vmul.f32 1.442695, %v2884_v44  ;;  %v2552_v44 = vmul.f32 %v3361_v34, %v2538_v48 }
0x2048   :  { %v2971_v58 = vpop.permute.xlu1 %2970 }
0x2049   :  { %3898 = vpow2.f32 %v2885_v18  ;;  %vm2972_vm7 = vcmp.eq.s32.totalorder %v2971_v58, 1  ;;  %v2558_v18 = vsel %vm2313_vm12, %v2550_v12, 0.0 }
0x204c   :  { %v3064_v19 = vpop.permute.xlu1 %3063 }
0x204d   :  { %vm3065_vm10 = vcmp.eq.s32.totalorder %v3064_v19, 1 }
0x2053   :  { %v3899_v14 = vpop.eup %3898 }
0x2054   :  { %3657 = vmatmul.mubr.msk.f32.vlgmr.msra.gmra.mrb[34].mxu1 %vm2313_vm12, %v3899_v14  ;;  %v2559_v14 = vsel %vm2313_vm12, %v2551_v56, 0.0 }
0x2055   :  { %3665 = vmatpush3.msk.msra.mxu1 %vm2402_vm13, %v4632_v13  ;;  %3666 = vmatprep.mubr.msk.f32.mxu1 %vm3943_vm0, %v3944_v6 }
0x2127   :  { %v2956_v38 = vpop.f32.mrb[34].mxu1 }
0x2128   :  { %3900 = vlog2.f32 %v2956_v38  ;;  %v3658_v47 = vpop.f32.mrb[35].mxu1  ;;  %v2539_v38 = vld [vmem:[%s4902_s3 + $0x18] sm:$0xff] }
0x2129   :  { %v2560_v47 = vadd.f32 %v2559_v14, %v2558_v18 }
0x2132   :  { %v3901_v21 = vpop.eup %3900 }
0x2133   :  { %v2962_v46 = vmul.f32 0.6931472, %v3901_v21 }
0x2135   :  { %v2963_v30 = vadd.f32 %v2962_v46, %v2960_v54  ;;  %v2553_v54 = vmul.f32 %v3361_v34, %v2539_v38  ;;  %v2561_v46 = vsel %vm2313_vm12, %v2552_v44, 0.0 }
0x2137   :  { %v2966_v8 = vadd.f32 %v2965_v3, %v2963_v30  ;;  %v2540_v3 = vld [vmem:[%s4902_s3 + $0x20] sm:$0xff] }
0x2139   :  { %v2973_v60 = vsel %vm2972_vm7, %v2966_v8, %v4795_v16 }
0x213a   :  { %v2974_v33 = vsel %vm2313_vm12, %v2973_v60, -inf }
0x213b   :  { %2975 = vmax.xlane.f32.xlu0 %v2974_v33  ;;  %v2562_v33 = vadd.f32 %v2561_v46, %v2560_v47 }
0x2151   :  { %3156 = vperm.xlu0 %3755, %v3154_v49   ;;  %v3244_v49 = vld [vmem:[#allocation5 + $0x38] sm:$0xff] }
0x2155   :  { %3249 = vperm.xlu0 %3755, %v3247_v23   ;;  %v2554_v23 = vmul.f32 %v3361_v34, %v2540_v3 }
0x21c8   :  { %v2976_v26 = vpop.xlane.xlu0 %2975 }
0x21c9   :  { %v2977_v61 = vsub.f32 %v2973_v60, %v2976_v26  ;;  %v3053_v37 = vadd.f32 %v2976_v26, %v4628_v36  ;;  %v2563_v26 = vsel %vm2313_vm12, %v2553_v54, 0.0 }
0x21cb   :  { %v2978_v1 = vmul.f32 1.442695, %v2977_v61 }
0x21cd   :  { %3902 = vpow2.f32 %v2978_v1  ;;  %v2541_v1 = vld [vmem:[%s4902_s3 + $0x28] sm:$0xff] }
0x21d0   :  { %v3157_v31 = vpop.permute.xlu0 %3156 }
0x21d4   :  { %v3250_v8 = vpop.permute.xlu0 %3249 }
0x21d5   :  { %vm3251_vm11 = vcmp.eq.s32.totalorder %v3250_v8, 1 }
0x21d7   :  { %v3903_v10 = vpop.eup %3902 }
0x21d8   :  { %3662 = vmatmul.mubr.msk.f32.vlgmr.msra.gmra.mrb[34].mxu0 %vm2313_vm12, %v3903_v10 }
0x21d9   :  { %3670 = vmatpush3.msk.msra.mxu0 %vm2402_vm13, %v4632_v13  ;;  %3671 = vmatprep.mubr.msk.f32.mxu0 %vm3943_vm0, %v3944_v6  ;;  %vm3158_vm0 = vcmp.eq.s32.totalorder %v3157_v31, 1  ;;  %vm3280_vm13 = vcmask 0  }
0x22ab   :  { %v3049_v28 = vpop.f32.mrb[34].mxu0 }
0x22ac   :  { %3904 = vlog2.f32 %v3049_v28  ;;  %v3663_v62 = vpop.f32.mrb[35].mxu0 }
0x22ad   :  { %v2336_v62 = vmul.f32 %v4621_v5, %v4607_v42  ;;  %v2543_v42 = vld [vmem:[%s4902_s3 + $0x38] sm:$0xff] }
0x22b6   :  { %v3905_v16 = vpop.eup %3904 }
0x22b7   :  { %v3055_v52 = vmul.f32 0.6931472, %v3905_v16  ;;  %v2555_v16 = vmul.f32 %v3361_v34, %v2541_v1 }
0x22b9   :  { %v3056_v57 = vadd.f32 %v3055_v52, %v3053_v37  ;;  %v2565_v37 = vsel %vm2313_vm12, %v2554_v23, 0.0  ;;  %v2542_v52 = vld [vmem:[%s4902_s3 + $0x30] sm:$0xff] }
0x22bb   :  { %v3059_v29 = vadd.f32 %v3058_v20, %v3056_v57  ;;  %v2337_v20 = vsel %vm2313_vm12, %v2336_v62, 0.0 }
0x22bd   :  { %v3066_v24 = vsel %vm3065_vm10, %v3059_v29, %v2973_v60  ;;  %v2556_v29 = vmul.f32 %v3361_v34, %v2542_v52 }
0x22be   :  { %v3067_v35 = vsel %vm2313_vm12, %v3066_v24, -inf }
0x22bf   :  { %3068 = vmax.xlane.f32.xlu1 %v3067_v35  ;;  %v2557_v35 = vmul.f32 %v3361_v34, %v2543_v42 }
0x234c   :  { %v3069_v13 = vpop.xlane.xlu1 %3068 }
0x234d   :  { %v3070_v40 = vsub.f32 %v3066_v24, %v3069_v13  ;;  %v3146_v11 = vadd.f32 %v3069_v13, %v4628_v36  ;;  %v2569_v13 = vsel %vm2313_vm12, %v2556_v29, 0.0 }
0x234f   :  { %v3071_v0 = vmul.f32 1.442695, %v3070_v40 }
0x2351   :  { %3906 = vpow2.f32 %v3071_v0  ;;  %v2571_v0 = vsel %vm2313_vm12, %v2557_v35, 0.0 }
0x235b   :  { %v3907_v6 = vpop.eup %3906 }
0x235c   :  { %3667 = vmatmul.mubr.msk.f32.vlgmr.msra.gmra.mrb[36].mxu1 %vm2313_vm12, %v3907_v6 }
0x242f   :  { %v3142_v25 = vpop.f32.mrb[36].mxu1 }
0x2430   :  { %3908 = vlog2.f32 %v3142_v25  ;;  %v3668_v43 = vpop.f32.mrb[37].mxu1 }
0x243a   :  { %v3909_v45 = vpop.eup %3908 }
0x243b   :  { %v3148_v51 = vmul.f32 0.6931472, %v3909_v45 }
0x243d   :  { %v3149_v27 = vadd.f32 %v3148_v51, %v3146_v11 }
0x243f   :  { %v3152_v22 = vadd.f32 %v3151_v17, %v3149_v27 }
0x2441   :  { %v3159_v63 = vsel %vm3158_vm0, %v3152_v22, %v3066_v24  ;;  %v2567_v24 = vsel %vm2313_vm12, %v2555_v16, 0.0 }
0x2442   :  { %v3160_v55 = vsel %vm2313_vm12, %v3159_v63, -inf }
0x2443   :  { %3161 = vmax.xlane.f32.xlu1 %v3160_v55 }
0x24d0   :  { %v3162_v59 = vpop.xlane.xlu1 %3161 }
0x24d1   :  { %v3163_v2 = vsub.f32 %v3159_v63, %v3162_v59  ;;  %v3239_v58 = vadd.f32 %v3162_v59, %v4628_v36  ;;  %v2564_v36 = vadd.f32 %v2563_v26, %v2562_v33 }
0x24d3   :  { %v3164_v39 = vmul.f32 1.442695, %v3163_v2  ;;  %v2566_v57 = vadd.f32 %v2565_v37, %v2564_v36 }
0x24d5   :  { %3910 = vpow2.f32 %v3164_v39  ;;  %v2568_v5 = vadd.f32 %v2567_v24, %v2566_v57 }
0x24d7   :  { %v2570_v40 = vadd.f32 %v2569_v13, %v2568_v5 }
0x24d9   :  { %v2572_v6 = vadd.f32 %v2571_v0, %v2570_v40 }
0x24df   :  { %v3911_v50 = vpop.eup %3910 }
0x24e0   :  { %3672 = vmatmul.mubr.msk.f32.vlgmr.msra.gmra.mrb[36].mxu0 %vm2313_vm12, %v3911_v50 }
0x25b3   :  { %v3235_v41 = vpop.f32.mrb[36].mxu0 }
0x25b4   :  { %3912 = vlog2.f32 %v3235_v41  ;;  %v3673_v7 = vpop.f32.mrb[37].mxu0 }
0x25be   :  { %v3913_v21 = vpop.eup %3912 }
0x25bf   :  { %v3241_v30 = vmul.f32 0.6931472, %v3913_v21 }
0x25c1   :  { %v3242_v60 = vadd.f32 %v3241_v30, %v3239_v58 }
0x25c3   :  { %v3245_v61 = vadd.f32 %v3244_v49, %v3242_v60 }
0x25c5   :  { %v3252_v10 = vsel %vm3251_vm11, %v3245_v61, %v3159_v63 }
0x25c6   :  { %v3253_v28 = vadd.f32 %v3361_v34, %v3252_v10 }
0x25c8   :  { %v3254_v19 = vsel %vm2313_vm12, %v3253_v28, -inf }
0x25c9   :  { %3255 = vmax.xlane.f32.xlu1 %v3254_v19 }
0x25cd   :  { %2338 = vadd.xlane.f32.xlu1 %v2337_v20 }
0x25d1   :  { %2371 = vadd.xlane.f32.xlu1 %v4772_v4 }
0x25d5   :  { %2526 = vadd.xlane.f32.xlu1 %v4817_v15 }
0x25d9   :  { %2573 = vadd.xlane.f32.xlu1 %v2572_v6 }
0x2656   :  { %v3256_v25 = vpop.xlane.xlu1 %3255 }
0x2657   :  { %v3257_v43 = vsub.f32 %v3253_v28, %v3256_v25 }
0x2659   :  { %v3258_v45 = vmul.f32 1.442695, %v3257_v43 }
0x265a   :  { %v2339_v11 = vpop.xlane.xlu1 %2338 }
0x265b   :  { %3914 = vpow2.f32 %v3258_v45  ;;  %v2340_v51 = vrot.slane %v2339_v11, 4 }
0x265d   :  { %v2341_v31 = vadd.f32 %v2340_v51, %v2339_v11 }
0x265e   :  { %v2372_v27 = vpop.xlane.xlu1 %2371 }
0x265f   :  { %v2342_v17 = vrot.slane %v2341_v31, 2  ;;  %v2373_v22 = vrot.slane %v2372_v27, 4 }
0x2661   :  { %v2374_v63 = vadd.f32 %v2373_v22, %v2372_v27  ;;  %v2343_v55 = vadd.f32 %v2342_v17, %v2341_v31 }
0x2662   :  { %v2527_v4 = vpop.xlane.xlu1 %2526 }
0x2663   :  { %v2375_v59 = vrot.slane %v2374_v63, 2  ;;  %v2528_v2 = vrot.slane %v2527_v4, 4  ;;  %v2344_v39 = vrot.slane %v2343_v55, 1 }
0x2665   :  { %v3915_v50 = vpop.eup %3914  ;;  %v2529_v15 = vadd.f32 %v2528_v2, %v2527_v4  ;;  %v2345_v41 = vadd.f32 %v2344_v39, %v2343_v55  ;;  %v2376_v32 = vadd.f32 %v2375_v59, %v2374_v63 }
0x2666   :  { %v2574_v9 = vpop.xlane.xlu1 %2573  ;;  %v3260_v7 = vsel %vm2313_vm12, %v3915_v50, 0.0  ;;  %vm3267_vm12 = vcmask 7168  }
0x2667   :  { %v2530_v34 = vrot.slane %v2529_v15, 2  ;;  %v2575_v12 = vrot.slane %v2574_v9, 4  ;;  %3261 = vadd.xlane.f32.xlu0 %v3260_v7  ;;  %3734 = vpush %v2345_v41  ;;  %v2377_v56 = vrot.slane %v2376_v32, 1 }
0x2669   :  { %v2576_v48 = vadd.f32 %v2575_v12, %v2574_v9  ;;  %v2378_v44 = vadd.f32 %v2377_v56, %v2376_v32  ;;  %v2531_v18 = vadd.f32 %v2530_v34, %v2529_v15 }
0x266b   :  { %v2577_v14 = vrot.slane %v2576_v48, 2  ;;  %3736 = vpush %v2378_v44  ;;  %v2532_v38 = vrot.slane %v2531_v18, 1 }
0x266d   :  { %v2533_v47 = vadd.f32 %v2532_v38, %v2531_v18  ;;  %v2578_v21 = vadd.f32 %v2577_v14, %v2576_v48 }
0x266f   :  { %3738 = vpush %v2533_v47  ;;  %v2579_v54 = vrot.slane %v2578_v21, 1 }
0x2671   :  { %v2580_v46 = vadd.f32 %v2579_v54, %v2578_v21 }
0x2673   :  { %3740 = vpush %v2580_v46 }
0x2698   :  { %s3735_s3 = spop %3734 }
0x2699   :  { %v2347_v28 = vstv %s3735_s3 }
0x269c   :  { %s3737_s17 = spop %3736 }
0x269d   :  { %v2380_v62 = vstv %s3737_s17 }
0x269e   :  { %v2583_v37 = vadd.f32 %v2380_v62, %v2347_v28 }
0x26a0   :  { %s3739_s1 = spop %3738 }
0x26a1   :  { %v2535_v16 = vstv %s3739_s1 }
0x26a4   :  { %s3741_s5 = spop %3740 }
0x26a5   :  { %v2582_v52 = vstv %s3741_s5 }
0x26f4   :  { %v3262_v58 = vpop.xlane.xlu0 %3261 }
0x26f5   :  { %3916 = vlog2.f32 %v3262_v58 }
0x26ff   :  { %v3917_v30 = vpop.eup %3916 }
0x2700   :  { %v3264_v3 = vmul.f32 0.6931472, %v3917_v30 }
0x2702   :  { %v3265_v8 = vadd.f32 %v3264_v3, %v3256_v25 }
0x2704   :  { %v3266_v60 = vmul.f32 %v4130_v53, %v3265_v8  ;;  %v2584_v53 = vadd.f32 %v2583_v37, %v2535_v16 }
0x2706   :  { %v3268_v33 = vsel %vm3267_vm12, %v3266_v60, 0.0  ;;  %v2585_v19 = vadd.f32 %v2584_v53, %v2582_v52 }
0x2707   :  { %3269 = vadd.xlane.f32.xlu1 %v3268_v33 }
0x2794   :  { %v3270_v49 = vpop.xlane.xlu1 %3269 }
0x2795   :  { %v3271_v23 = vrot.slane %v3270_v49, 4 }
0x2797   :  { %v3272_v26 = vadd.f32 %v3271_v23, %v3270_v49 }
0x2799   :  { %v3273_v61 = vrot.slane %v3272_v26, 2 }
0x279b   :  { %v3274_v1 = vadd.f32 %v3273_v61, %v3272_v26 }
0x279d   :  { %v3275_v10 = vrot.slane %v3274_v1, 1 }
0x279f   :  { %v3276_v36 = vadd.f32 %v3275_v10, %v3274_v1 }
0x27a1   :  { %3742 = vpush %v3276_v36 }
0x27d2   :  { %s3743_s19 = spop %3742 }
0x27d3   :  { %v3278_v57 = vstv %s3743_s19 }
0x27d4   :  { %v3279_v20 = vsub.f32 %v2585_v19, %v3278_v57 }
0x27d6   :  { %3281 = vst.msk [vmem:[#allocation6] sm:$0x1] %vm3280_vm13, %v3279_v20 }
0x27d7   :  { %3929 = shalt.err (!%p3926_p4)
}
0x27d8   :  { %s3930_s22 = scalar_lea.hbm %s4912_s13, 16 }
0x27d9   :  { %p3931_p5 = scmp.ne.s32.totalorder %s4912_s13, %s3930_s22  ;;  %p3934_p6 = scmp.lt.u32.totalorder %s3930_s22, %s4912_s13 }
0x27db   :  { %p3936_p7 = pnand %p3934_p6, %p3931_p5 }
0x27dd   :  { %3939 = shalt.err (!%p3936_p7)
}
0x27de   :  { %3291 = dma.vmem_to_hbm [thread:$0]  %s3289_s18, 16, %s4912_s13, [#allocation7]  }
0x27df   :  { %3940 = dma.done.wait [#allocation7], 16  }
0x27e0   :  { %3941 = vsyncadd [#allocation7], 4294967280 }
0x27e1   :  { %3295 = vsyncpa [#allocation7], 1 }

</bundles_post_ra>
